<compile_context>
chip_gen: v5e
topology: v5e:2x2
jax: 0.10.0
libtpu: 0.0.40
codegen_flags: <defaults>
</compile_context>

<pallas_src>
import functools
import math

import jax
import jax.numpy as jnp
from jax import lax
from jax.experimental import pallas as pl
from jax.experimental.pallas import tpu as pltpu

# ---------------- config (small, deterministic) ----------------
BATCH = 2
SEQ = 8
HIDDEN = 32
NUM_HEADS = 4
HEAD_DIM = HIDDEN // NUM_HEADS
INTERMEDIATE = 64
NUM_LAYERS = 2
VOCAB = 50
MAX_POS = 16
TYPE_VOCAB = 2
NUM_LABELS = 3
LN_EPS = 1e-12                 # BERT LayerNorm eps
MATMUL_DTYPE = jnp.bfloat16    # MXU operand dtype; accumulation stays f32


# ---------------- in-kernel helpers ----------------
def _ln(x, g, b):
    """LayerNorm over the last axis, f32 statistics."""
    mean = jnp.mean(x, axis=-1, keepdims=True)
    var = jnp.mean((x - mean) ** 2, axis=-1, keepdims=True)
    return (x - mean) * lax.rsqrt(var + LN_EPS) * g + b


def _mm(a_f32, w_bf16):
    """bf16-operand matmul with f32 accumulation (weights already bf16 from host)."""
    return jnp.dot(a_f32.astype(MATMUL_DTYPE), w_bf16,
                   preferred_element_type=jnp.float32)


# ---------------- fused whole-forward Pallas kernel ----------------
def _bert_fused_kernel(x_ref, m_ref, emb_g_ref, emb_b_ref,
                       wqkv_ref, bqkv_ref, wo_ref, bo_ref,
                       ln1_g_ref, ln1_b_ref,
                       wi_ref, bi_ref, wf_ref, bf_ref,
                       ln2_g_ref, ln2_b_ref,
                       hs_ref, ctx_scratch,
                       *, num_layers, num_heads, head_dim, batch, seq):
    """Embedding LN + all encoder layers, fully VMEM-resident. Activations are [B*S, H]."""
    hidden = num_heads * head_dim

    # ---- embedding LayerNorm (residual-free) ----
    h = _ln(x_ref[...].astype(jnp.float32), emb_g_ref[...], emb_b_ref[...])   # (B*S, H)
    hs_ref[0] = h.astype(hs_ref.dtype)

    for li in range(num_layers):                     # static unroll of the encoder stack
        # ---- fused QKV projection over the whole flattened batch ----
        # 1/sqrt(head_dim) already folded into the Q columns of wqkv/bqkv on the host.
        qkv = _mm(h, wqkv_ref[li]) + bqkv_ref[li]                 # (B*S, 3H) f32
        qkv_b = qkv.astype(MATMUL_DTYPE)                          # single cast for q/k/v

        # ---- attention: per-(batch, head) score/softmax; ctx written to scratch ----
        for b in range(batch):
            rows = slice(b * seq, (b + 1) * seq)
            bias = m_ref[b]                                       # (1, S) additive mask
            for hi in range(num_heads):
                c0 = hi * head_dim
                qh = qkv_b[rows, c0:c0 + head_dim]
                kh = qkv_b[rows, hidden + c0:hidden + c0 + head_dim]
                vh = qkv_b[rows, 2 * hidden + c0:2 * hidden + c0 + head_dim]
                # q @ k^T via contracting dims ((1,),(1,)) -- no explicit transpose
                s = lax.dot_general(qh, kh, (((1,), (1,)), ((), ())),
                                    preferred_element_type=jnp.float32)
                s = s + bias
                s = s - jnp.max(s, axis=-1, keepdims=True)
                p = jnp.exp(s)
                p = p * pl.reciprocal(jnp.sum(p, axis=-1, keepdims=True), approx=False)
                # static-offset store into VMEM scratch (no concatenate relayout)
                ctx_scratch[pl.ds(b * seq, seq), pl.ds(c0, head_dim)] = jnp.dot(
                    p.astype(MATMUL_DTYPE), vh, preferred_element_type=jnp.float32)

        # ---- output projection fused with residual + LayerNorm ----
        attn_out = _mm(ctx_scratch[...], wo_ref[li]) + bo_ref[li]
        h = _ln(attn_out + h, ln1_g_ref[li], ln1_b_ref[li])

        # ---- FFN fused with residual + LayerNorm ----
        # TODO(synk): HF BERT default hidden_act is exact (erf) gelu; tanh approx used here.
        inter = jax.nn.gelu(_mm(h, wi_ref[li]) + bi_ref[li], approximate=True)
        ffn_out = _mm(inter, wf_ref[li]) + bf_ref[li]
        h = _ln(ffn_out + h, ln2_g_ref[li], ln2_b_ref[li])

        hs_ref[li + 1] = h.astype(hs_ref.dtype)


def bert_encoder(x_emb_flat, add_mask, p):
    """x_emb_flat: [B*S, H] f32 embedding sum; add_mask: [B, 1, S] additive mask.
    Returns stacked hidden states [L+1, B*S, H] (post-embedding-LN + each layer)."""
    BS, H = x_emb_flat.shape
    L, I, B, S = NUM_LAYERS, INTERMEDIATE, BATCH, SEQ

    def full(shape):
        return pl.BlockSpec(shape, lambda i, _s=shape: (0,) * len(_s))

    return pl.pallas_call(
        functools.partial(_bert_fused_kernel, num_layers=L, num_heads=NUM_HEADS,
                          head_dim=HEAD_DIM, batch=B, seq=S),
        grid=(1,),
        in_specs=[
            full((BS, H)),                       # embedding sum (flattened batch)
            full((B, 1, S)),                     # additive attention mask
            full((1, H)), full((1, H)),          # embedding LayerNorm
            full((L, H, 3 * H)), full((L, 1, 3 * H)),   # fused QKV (scale pre-folded)
            full((L, H, H)), full((L, 1, H)),           # output proj
            full((L, 1, H)), full((L, 1, H)),           # attn LayerNorm
            full((L, H, I)), full((L, 1, I)),           # FFN up
            full((L, I, H)), full((L, 1, H)),           # FFN down
            full((L, 1, H)), full((L, 1, H)),           # output LayerNorm
        ],
        out_specs=full((L + 1, BS, H)),
        out_shape=jax.ShapeDtypeStruct((L + 1, BS, H), jnp.float32),
        scratch_shapes=[pltpu.VMEM((BS, H), jnp.float32)],   # per-head ctx writes
    )(x_emb_flat, add_mask,
      p["emb_ln_g"], p["emb_ln_b"],
      p["wqkv"], p["bqkv"], p["wo"], p["bo"],
      p["ln1_g"], p["ln1_b"],
      p["wi"], p["bi"], p["wf"], p["bf"],
      p["ln2_g"], p["ln2_b"])


# ---------------- parameter init (deterministic, synthetic) ----------------
def init_params(key):
    def nrm(k, shape):
        return 0.02 * jax.random.normal(k, shape, jnp.float32)

    keys = iter(jax.random.split(key, 8 * NUM_LAYERS + 8))
    params = {
        "word_emb": nrm(next(keys), (VOCAB, HIDDEN)),
        "pos_emb": nrm(next(keys), (MAX_POS, HIDDEN)),
        "type_emb": nrm(next(keys), (TYPE_VOCAB, HIDDEN)),
        "emb_ln_g": jnp.ones((HIDDEN,), jnp.float32),
        "emb_ln_b": jnp.zeros((HIDDEN,), jnp.float32),
        "layers": [],
        "wp": nrm(next(keys), (HIDDEN, HIDDEN)),
        "bp": jnp.zeros((HIDDEN,), jnp.float32),
        "wc": nrm(next(keys), (HIDDEN, NUM_LABELS)),
        "bc": jnp.zeros((NUM_LABELS,), jnp.float32),
    }
    for _ in range(NUM_LAYERS):
        layer = {
            "wqkv": nrm(next(keys), (HIDDEN, 3 * HIDDEN)),   # fused [wq | wk | wv]
            "bqkv": jnp.zeros((3 * HIDDEN,), jnp.float32),
            "wo": nrm(next(keys), (HIDDEN, HIDDEN)),
            "bo": jnp.zeros((HIDDEN,), jnp.float32),
            "attn_ln_g": jnp.ones((HIDDEN,), jnp.float32),
            "attn_ln_b": jnp.zeros((HIDDEN,), jnp.float32),
            "wi": nrm(next(keys), (HIDDEN, INTERMEDIATE)),
            "bi": jnp.zeros((INTERMEDIATE,), jnp.float32),
            "wf": nrm(next(keys), (INTERMEDIATE, HIDDEN)),
            "bf": jnp.zeros((HIDDEN,), jnp.float32),
            "out_ln_g": jnp.ones((HIDDEN,), jnp.float32),
            "out_ln_b": jnp.zeros((HIDDEN,), jnp.float32),
        }
        params["layers"].append(layer)
    return params


def prep_params(params):
    """Stack per-layer weights (leading L axis), fold softmax scale into Q columns,
    pre-cast matmul weights to bf16 (biases / LN params stay f32)."""
    H, L, I = HIDDEN, NUM_LAYERS, INTERMEDIATE
    scale = 1.0 / math.sqrt(HEAD_DIM)

    def stack(name):
        return jnp.stack([layer[name] for layer in params["layers"]])

    wqkv = stack("wqkv").at[:, :, :H].multiply(scale)     # fold 1/sqrt(dH) into Q cols
    bqkv = stack("bqkv").at[:, :H].multiply(scale)
    return {
        "emb_ln_g": params["emb_ln_g"].reshape(1, H),
        "emb_ln_b": params["emb_ln_b"].reshape(1, H),
        "wqkv": wqkv.astype(MATMUL_DTYPE),
        "bqkv": bqkv.reshape(L, 1, 3 * H),
        "wo": stack("wo").astype(MATMUL_DTYPE),
        "bo": stack("bo").reshape(L, 1, H),
        "ln1_g": stack("attn_ln_g").reshape(L, 1, H),
        "ln1_b": stack("attn_ln_b").reshape(L, 1, H),
        "wi": stack("wi").astype(MATMUL_DTYPE),
        "bi": stack("bi").reshape(L, 1, I),
        "wf": stack("wf").astype(MATMUL_DTYPE),
        "bf": stack("bf").reshape(L, 1, H),
        "ln2_g": stack("out_ln_g").reshape(L, 1, H),
        "ln2_b": stack("out_ln_b").reshape(L, 1, H),
    }


# ---------------- forward pass (mirrors CustomBertModel.forward) ----------------
def bert_forward(params, input_ids, attention_mask, labels):
    B, S = input_ids.shape
    prep = prep_params(params)

    # Embeddings (gather is plain-JAX glue); token_type_ids=None -> type id 0 everywhere.
    x = (params["word_emb"][input_ids]
         + params["pos_emb"][:S][None, :, :]
         + params["type_emb"][0][None, None, :])
    # Dropout is identity (inference semantics).

    # Additive mask [B, 1, S]; passed once per batch (no per-head duplication).
    add_mask = ((1.0 - attention_mask.astype(jnp.float32)) * (-10000.0)).reshape(B, 1, S)

    # Single fused kernel: embedding LN + all encoder layers -> stacked hidden states.
    hs_stack = bert_encoder(x.reshape(B * S, HIDDEN), add_mask, prep)
    hs_stack = hs_stack.reshape(NUM_LAYERS + 1, B, S, HIDDEN)
    hidden_states = tuple(hs_stack[i] for i in range(NUM_LAYERS + 1))

    last_hidden_layer = hidden_states[-1]
    representations = last_hidden_layer[:, 0, :]                 # [B, H] (CLS token)

    # Pooler + classifier + cross-entropy: far below one vreg of work -> plain JAX.
    pooled = jnp.tanh(representations @ params["wp"] + params["bp"])
    logits = pooled @ params["wc"] + params["bc"]                # [B, num_labels]
    logp = jax.nn.log_softmax(logits, axis=-1)
    loss = -jnp.mean(jnp.take_along_axis(logp, labels[:, None], axis=-1))

    return loss, logits, hidden_states, representations


if __name__ == "__main__":
    key = jax.random.PRNGKey(0)
    pkey, ikey, lkey = jax.random.split(key, 3)
    params = init_params(pkey)

    input_ids = jax.random.randint(ikey, (BATCH, SEQ), 0, VOCAB, dtype=jnp.int32)
    attention_mask = jnp.array([[1] * SEQ, [1] * 6 + [0] * 2], dtype=jnp.int32)
    labels = jax.random.randint(lkey, (BATCH,), 0, NUM_LABELS, dtype=jnp.int32)

    fwd = jax.jit(bert_forward)
    loss, logits, hidden_states, reps = fwd(params, input_ids, attention_mask, labels)
    jax.block_until_ready((loss, logits, hidden_states, reps))

    assert logits.shape == (BATCH, NUM_LABELS)
    assert reps.shape == (BATCH, HIDDEN)
    assert len(hidden_states) == NUM_LAYERS + 1
    print("KERNEL_OK")
</pallas_src>

<mosaic_0001>
module attributes {stable_mosaic.version = 11 : i64} {
  func.func @_bert_fused_kernel(%arg0: i32, %arg1: memref<16x32xf32, #tpu.memory_space<vmem>>, %arg2: memref<2x1x8xf32, #tpu.memory_space<vmem>>, %arg3: memref<1x32xf32, #tpu.memory_space<vmem>>, %arg4: memref<1x32xf32, #tpu.memory_space<vmem>>, %arg5: memref<2x32x96xbf16, #tpu.memory_space<vmem>>, %arg6: memref<2x1x96xf32, #tpu.memory_space<vmem>>, %arg7: memref<2x32x32xbf16, #tpu.memory_space<vmem>>, %arg8: memref<2x1x32xf32, #tpu.memory_space<vmem>>, %arg9: memref<2x1x32xf32, #tpu.memory_space<vmem>>, %arg10: memref<2x1x32xf32, #tpu.memory_space<vmem>>, %arg11: memref<2x32x64xbf16, #tpu.memory_space<vmem>>, %arg12: memref<2x1x64xf32, #tpu.memory_space<vmem>>, %arg13: memref<2x64x32xbf16, #tpu.memory_space<vmem>>, %arg14: memref<2x1x32xf32, #tpu.memory_space<vmem>>, %arg15: memref<2x1x32xf32, #tpu.memory_space<vmem>>, %arg16: memref<2x1x32xf32, #tpu.memory_space<vmem>>, %arg17: memref<3x16x32xf32, #tpu.memory_space<vmem>>, %arg18: memref<16x32xf32, #tpu.memory_space<vmem>>) attributes {dimension_semantics = [#tpu.dimension_semantics<arbitrary>], iteration_bounds = array<i64: 1>, scalar_prefetch = 0 : i64, scratch_operands = 1 : i64, tpu.core_type = #tpu.core_type<tc>, window_params = [{pipeline_mode = #tpu.pipeline_mode<synchronous>, transform_indices = @transform_0, window_bounds = array<i64: 16, 32>}, {pipeline_mode = #tpu.pipeline_mode<synchronous>, transform_indices = @transform_1, window_bounds = array<i64: 2, 1, 8>}, {pipeline_mode = #tpu.pipeline_mode<synchronous>, transform_indices = @transform_2, window_bounds = array<i64: 1, 32>}, {pipeline_mode = #tpu.pipeline_mode<synchronous>, transform_indices = @transform_3, window_bounds = array<i64: 1, 32>}, {pipeline_mode = #tpu.pipeline_mode<synchronous>, transform_indices = @transform_4, window_bounds = array<i64: 2, 32, 96>}, {pipeline_mode = #tpu.pipeline_mode<synchronous>, transform_indices = @transform_5, window_bounds = array<i64: 2, 1, 96>}, {pipeline_mode = #tpu.pipeline_mode<synchronous>, transform_indices = @transform_6, window_bounds = array<i64: 2, 32, 32>}, {pipeline_mode = #tpu.pipeline_mode<synchronous>, transform_indices = @transform_7, window_bounds = array<i64: 2, 1, 32>}, {pipeline_mode = #tpu.pipeline_mode<synchronous>, transform_indices = @transform_8, window_bounds = array<i64: 2, 1, 32>}, {pipeline_mode = #tpu.pipeline_mode<synchronous>, transform_indices = @transform_9, window_bounds = array<i64: 2, 1, 32>}, {pipeline_mode = #tpu.pipeline_mode<synchronous>, transform_indices = @transform_10, window_bounds = array<i64: 2, 32, 64>}, {pipeline_mode = #tpu.pipeline_mode<synchronous>, transform_indices = @transform_11, window_bounds = array<i64: 2, 1, 64>}, {pipeline_mode = #tpu.pipeline_mode<synchronous>, transform_indices = @transform_12, window_bounds = array<i64: 2, 64, 32>}, {pipeline_mode = #tpu.pipeline_mode<synchronous>, transform_indices = @transform_13, window_bounds = array<i64: 2, 1, 32>}, {pipeline_mode = #tpu.pipeline_mode<synchronous>, transform_indices = @transform_14, window_bounds = array<i64: 2, 1, 32>}, {pipeline_mode = #tpu.pipeline_mode<synchronous>, transform_indices = @transform_15, window_bounds = array<i64: 2, 1, 32>}, {pipeline_mode = #tpu.pipeline_mode<synchronous>, transform_indices = @transform_16, window_bounds = array<i64: 3, 16, 32>}]} {
    %c0 = arith.constant 0 : index
    %c0_0 = arith.constant 0 : index
    %0 = vector.load %arg1[%c0, %c0_0] : memref<16x32xf32, #tpu.memory_space<vmem>>, vector<16x32xf32>
    %c0_1 = arith.constant 0 : index
    %c0_2 = arith.constant 0 : index
    %1 = vector.load %arg3[%c0_1, %c0_2] : memref<1x32xf32, #tpu.memory_space<vmem>>, vector<1x32xf32>
    %c0_3 = arith.constant 0 : index
    %c0_4 = arith.constant 0 : index
    %2 = vector.load %arg4[%c0_3, %c0_4] : memref<1x32xf32, #tpu.memory_space<vmem>>, vector<1x32xf32>
    %cst = arith.constant dense<0.000000e+00> : vector<16xf32>
    %3 = vector.multi_reduction <add>, %0, %cst [1] : vector<16x32xf32> to vector<16xf32>
    %4 = vector.shape_cast %3 : vector<16xf32> to vector<16x1xf32>
    %cst_5 = arith.constant 3.200000e+01 : f32
    %5 = vector.broadcast %cst_5 : f32 to vector<16x1xf32>
    %6 = arith.divf %4, %5 : vector<16x1xf32>
    %7 = vector.broadcast %6 : vector<16x1xf32> to vector<16x32xf32>
    %8 = arith.subf %0, %7 : vector<16x32xf32>
    %9 = arith.mulf %8, %8 : vector<16x32xf32>
    %cst_6 = arith.constant dense<0.000000e+00> : vector<16xf32>
    %10 = vector.multi_reduction <add>, %9, %cst_6 [1] : vector<16x32xf32> to vector<16xf32>
    %11 = vector.shape_cast %10 : vector<16xf32> to vector<16x1xf32>
    %cst_7 = arith.constant 3.200000e+01 : f32
    %12 = vector.broadcast %cst_7 : f32 to vector<16x1xf32>
    %13 = arith.divf %11, %12 : vector<16x1xf32>
    %14 = vector.broadcast %6 : vector<16x1xf32> to vector<16x32xf32>
    %15 = arith.subf %0, %14 : vector<16x32xf32>
    %cst_8 = arith.constant 9.99999996E-13 : f32
    %16 = vector.broadcast %cst_8 : f32 to vector<16x1xf32>
    %17 = arith.addf %13, %16 : vector<16x1xf32>
    %18 = math.rsqrt %17 : vector<16x1xf32>
    %19 = vector.broadcast %18 : vector<16x1xf32> to vector<16x32xf32>
    %20 = arith.mulf %15, %19 : vector<16x32xf32>
    %21 = vector.broadcast %1 : vector<1x32xf32> to vector<16x32xf32>
    %22 = arith.mulf %20, %21 : vector<16x32xf32>
    %23 = vector.broadcast %2 : vector<1x32xf32> to vector<16x32xf32>
    %24 = arith.addf %22, %23 : vector<16x32xf32>
    %c0_9 = arith.constant 0 : index
    %c0_10 = arith.constant 0 : index
    %c0_11 = arith.constant 0 : index
    %25 = vector.load %arg17[%c0_9, %c0_10, %c0_11] : memref<3x16x32xf32, #tpu.memory_space<vmem>>, vector<1x16x32xf32>
    %26 = vector.shape_cast %25 : vector<1x16x32xf32> to vector<16x32xf32>
    %27 = vector.shape_cast %24 : vector<16x32xf32> to vector<1x16x32xf32>
    tpu.vector_store %arg17[%c0_9, %c0_10, %c0_11], %27 {strides = array<i32>} : memref<3x16x32xf32, #tpu.memory_space<vmem>>, vector<1x16x32xf32>,
    %c0_12 = arith.constant 0 : index
    %c0_13 = arith.constant 0 : index
    %c0_14 = arith.constant 0 : index
    %28 = vector.load %arg5[%c0_12, %c0_13, %c0_14] : memref<2x32x96xbf16, #tpu.memory_space<vmem>>, vector<1x32x96xbf16>
    %29 = vector.shape_cast %28 : vector<1x32x96xbf16> to vector<32x96xbf16>
    %30 = arith.truncf %24 : vector<16x32xf32> to vector<16x32xbf16>
    %cst_15 = arith.constant dense<0.000000e+00> : vector<16x96xf32>
    %31 = tpu.matmul %30, %29, %cst_15 {dimension_numbers = #tpu.dot_dimension_numbers<[1], [0], [0], [1], [0, 0, 1, 1], [], []>} : vector<16x32xbf16>, vector<32x96xbf16>, vector<16x96xf32> -> vector<16x96xf32>
    %c0_16 = arith.constant 0 : index
    %c0_17 = arith.constant 0 : index
    %c0_18 = arith.constant 0 : index
    %32 = vector.load %arg6[%c0_16, %c0_17, %c0_18] : memref<2x1x96xf32, #tpu.memory_space<vmem>>, vector<1x1x96xf32>
    %33 = vector.shape_cast %32 : vector<1x1x96xf32> to vector<1x96xf32>
    %34 = vector.broadcast %33 : vector<1x96xf32> to vector<16x96xf32>
    %35 = arith.addf %31, %34 : vector<16x96xf32>
    %36 = arith.truncf %35 : vector<16x96xf32> to vector<16x96xbf16>
    %c0_19 = arith.constant 0 : index
    %c0_20 = arith.constant 0 : index
    %c0_21 = arith.constant 0 : index
    %37 = vector.load %arg2[%c0_19, %c0_20, %c0_21] : memref<2x1x8xf32, #tpu.memory_space<vmem>>, vector<1x1x8xf32>
    %38 = vector.shape_cast %37 : vector<1x1x8xf32> to vector<1x8xf32>
    %39 = vector.extract_strided_slice %36 {offsets = [0, 0], sizes = [8, 8], strides = [1, 1]} : vector<16x96xbf16> to vector<8x8xbf16>
    %40 = vector.extract_strided_slice %36 {offsets = [0, 32], sizes = [8, 8], strides = [1, 1]} : vector<16x96xbf16> to vector<8x8xbf16>
    %41 = vector.extract_strided_slice %36 {offsets = [0, 64], sizes = [8, 8], strides = [1, 1]} : vector<16x96xbf16> to vector<8x8xbf16>
    %cst_22 = arith.constant dense<0.000000e+00> : vector<8x8xf32>
    %42 = tpu.matmul %39, %40, %cst_22 {dimension_numbers = #tpu.dot_dimension_numbers<[1], [1], [0], [0], [0, 0, 1, 0], [], []>} : vector<8x8xbf16>, vector<8x8xbf16>, vector<8x8xf32> -> vector<8x8xf32>
    %43 = vector.broadcast %38 : vector<1x8xf32> to vector<8x8xf32>
    %44 = arith.addf %42, %43 : vector<8x8xf32>
    %cst_23 = arith.constant dense<0xFF800000> : vector<8xf32>
    %45 = vector.multi_reduction <maximumf>, %44, %cst_23 [1] : vector<8x8xf32> to vector<8xf32>
    %46 = vector.shape_cast %45 : vector<8xf32> to vector<8x1xf32>
    %47 = vector.broadcast %46 : vector<8x1xf32> to vector<8x8xf32>
    %48 = arith.subf %44, %47 : vector<8x8xf32>
    %49 = math.exp %48 : vector<8x8xf32>
    %cst_24 = arith.constant dense<0.000000e+00> : vector<8xf32>
    %50 = vector.multi_reduction <add>, %49, %cst_24 [1] : vector<8x8xf32> to vector<8xf32>
    %51 = vector.shape_cast %50 : vector<8xf32> to vector<8x1xf32>
    %52 = tpu.reciprocal %51 : vector<8x1xf32> -> vector<8x1xf32>
    %53 = vector.broadcast %52 : vector<8x1xf32> to vector<8x8xf32>
    %54 = arith.mulf %49, %53 : vector<8x8xf32>
    %55 = arith.truncf %54 : vector<8x8xf32> to vector<8x8xbf16>
    %cst_25 = arith.constant dense<0.000000e+00> : vector<8x8xf32>
    %56 = tpu.matmul %55, %41, %cst_25 {dimension_numbers = #tpu.dot_dimension_numbers<[1], [0], [0], [1], [0, 0, 1, 1], [], []>} : vector<8x8xbf16>, vector<8x8xbf16>, vector<8x8xf32> -> vector<8x8xf32>
    %c0_26 = arith.constant 0 : index
    %c0_27 = arith.constant 0 : index
    %57 = vector.load %arg18[%c0_26, %c0_27] : memref<16x32xf32, #tpu.memory_space<vmem>>, vector<8x8xf32>
    tpu.vector_store %arg18[%c0_26, %c0_27], %56 {strides = array<i32>} : memref<16x32xf32, #tpu.memory_space<vmem>>, vector<8x8xf32>,
    %58 = vector.extract_strided_slice %36 {offsets = [0, 8], sizes = [8, 8], strides = [1, 1]} : vector<16x96xbf16> to vector<8x8xbf16>
    %59 = vector.extract_strided_slice %36 {offsets = [0, 40], sizes = [8, 8], strides = [1, 1]} : vector<16x96xbf16> to vector<8x8xbf16>
    %60 = vector.extract_strided_slice %36 {offsets = [0, 72], sizes = [8, 8], strides = [1, 1]} : vector<16x96xbf16> to vector<8x8xbf16>
    %cst_28 = arith.constant dense<0.000000e+00> : vector<8x8xf32>
    %61 = tpu.matmul %58, %59, %cst_28 {dimension_numbers = #tpu.dot_dimension_numbers<[1], [1], [0], [0], [0, 0, 1, 0], [], []>} : vector<8x8xbf16>, vector<8x8xbf16>, vector<8x8xf32> -> vector<8x8xf32>
    %62 = vector.broadcast %38 : vector<1x8xf32> to vector<8x8xf32>
    %63 = arith.addf %61, %62 : vector<8x8xf32>
    %cst_29 = arith.constant dense<0xFF800000> : vector<8xf32>
    %64 = vector.multi_reduction <maximumf>, %63, %cst_29 [1] : vector<8x8xf32> to vector<8xf32>
    %65 = vector.shape_cast %64 : vector<8xf32> to vector<8x1xf32>
    %66 = vector.broadcast %65 : vector<8x1xf32> to vector<8x8xf32>
    %67 = arith.subf %63, %66 : vector<8x8xf32>
    %68 = math.exp %67 : vector<8x8xf32>
    %cst_30 = arith.constant dense<0.000000e+00> : vector<8xf32>
    %69 = vector.multi_reduction <add>, %68, %cst_30 [1] : vector<8x8xf32> to vector<8xf32>
    %70 = vector.shape_cast %69 : vector<8xf32> to vector<8x1xf32>
    %71 = tpu.reciprocal %70 : vector<8x1xf32> -> vector<8x1xf32>
    %72 = vector.broadcast %71 : vector<8x1xf32> to vector<8x8xf32>
    %73 = arith.mulf %68, %72 : vector<8x8xf32>
    %74 = arith.truncf %73 : vector<8x8xf32> to vector<8x8xbf16>
    %cst_31 = arith.constant dense<0.000000e+00> : vector<8x8xf32>
    %75 = tpu.matmul %74, %60, %cst_31 {dimension_numbers = #tpu.dot_dimension_numbers<[1], [0], [0], [1], [0, 0, 1, 1], [], []>} : vector<8x8xbf16>, vector<8x8xbf16>, vector<8x8xf32> -> vector<8x8xf32>
    %c0_32 = arith.constant 0 : index
    %c8 = arith.constant 8 : index
    %76 = vector.load %arg18[%c0_32, %c8] : memref<16x32xf32, #tpu.memory_space<vmem>>, vector<8x8xf32>
    tpu.vector_store %arg18[%c0_32, %c8], %75 {strides = array<i32>} : memref<16x32xf32, #tpu.memory_space<vmem>>, vector<8x8xf32>,
    %77 = vector.extract_strided_slice %36 {offsets = [0, 16], sizes = [8, 8], strides = [1, 1]} : vector<16x96xbf16> to vector<8x8xbf16>
    %78 = vector.extract_strided_slice %36 {offsets = [0, 48], sizes = [8, 8], strides = [1, 1]} : vector<16x96xbf16> to vector<8x8xbf16>
    %79 = vector.extract_strided_slice %36 {offsets = [0, 80], sizes = [8, 8], strides = [1, 1]} : vector<16x96xbf16> to vector<8x8xbf16>
    %cst_33 = arith.constant dense<0.000000e+00> : vector<8x8xf32>
    %80 = tpu.matmul %77, %78, %cst_33 {dimension_numbers = #tpu.dot_dimension_numbers<[1], [1], [0], [0], [0, 0, 1, 0], [], []>} : vector<8x8xbf16>, vector<8x8xbf16>, vector<8x8xf32> -> vector<8x8xf32>
    %81 = vector.broadcast %38 : vector<1x8xf32> to vector<8x8xf32>
    %82 = arith.addf %80, %81 : vector<8x8xf32>
    %cst_34 = arith.constant dense<0xFF800000> : vector<8xf32>
    %83 = vector.multi_reduction <maximumf>, %82, %cst_34 [1] : vector<8x8xf32> to vector<8xf32>
    %84 = vector.shape_cast %83 : vector<8xf32> to vector<8x1xf32>
    %85 = vector.broadcast %84 : vector<8x1xf32> to vector<8x8xf32>
    %86 = arith.subf %82, %85 : vector<8x8xf32>
    %87 = math.exp %86 : vector<8x8xf32>
    %cst_35 = arith.constant dense<0.000000e+00> : vector<8xf32>
    %88 = vector.multi_reduction <add>, %87, %cst_35 [1] : vector<8x8xf32> to vector<8xf32>
    %89 = vector.shape_cast %88 : vector<8xf32> to vector<8x1xf32>
    %90 = tpu.reciprocal %89 : vector<8x1xf32> -> vector<8x1xf32>
    %91 = vector.broadcast %90 : vector<8x1xf32> to vector<8x8xf32>
    %92 = arith.mulf %87, %91 : vector<8x8xf32>
    %93 = arith.truncf %92 : vector<8x8xf32> to vector<8x8xbf16>
    %cst_36 = arith.constant dense<0.000000e+00> : vector<8x8xf32>
    %94 = tpu.matmul %93, %79, %cst_36 {dimension_numbers = #tpu.dot_dimension_numbers<[1], [0], [0], [1], [0, 0, 1, 1], [], []>} : vector<8x8xbf16>, vector<8x8xbf16>, vector<8x8xf32> -> vector<8x8xf32>
    %c0_37 = arith.constant 0 : index
    %c16 = arith.constant 16 : index
    %95 = vector.load %arg18[%c0_37, %c16] : memref<16x32xf32, #tpu.memory_space<vmem>>, vector<8x8xf32>
    tpu.vector_store %arg18[%c0_37, %c16], %94 {strides = array<i32>} : memref<16x32xf32, #tpu.memory_space<vmem>>, vector<8x8xf32>,
    %96 = vector.extract_strided_slice %36 {offsets = [0, 24], sizes = [8, 8], strides = [1, 1]} : vector<16x96xbf16> to vector<8x8xbf16>
    %97 = vector.extract_strided_slice %36 {offsets = [0, 56], sizes = [8, 8], strides = [1, 1]} : vector<16x96xbf16> to vector<8x8xbf16>
    %98 = vector.extract_strided_slice %36 {offsets = [0, 88], sizes = [8, 8], strides = [1, 1]} : vector<16x96xbf16> to vector<8x8xbf16>
    %cst_38 = arith.constant dense<0.000000e+00> : vector<8x8xf32>
    %99 = tpu.matmul %96, %97, %cst_38 {dimension_numbers = #tpu.dot_dimension_numbers<[1], [1], [0], [0], [0, 0, 1, 0], [], []>} : vector<8x8xbf16>, vector<8x8xbf16>, vector<8x8xf32> -> vector<8x8xf32>
    %100 = vector.broadcast %38 : vector<1x8xf32> to vector<8x8xf32>
    %101 = arith.addf %99, %100 : vector<8x8xf32>
    %cst_39 = arith.constant dense<0xFF800000> : vector<8xf32>
    %102 = vector.multi_reduction <maximumf>, %101, %cst_39 [1] : vector<8x8xf32> to vector<8xf32>
    %103 = vector.shape_cast %102 : vector<8xf32> to vector<8x1xf32>
    %104 = vector.broadcast %103 : vector<8x1xf32> to vector<8x8xf32>
    %105 = arith.subf %101, %104 : vector<8x8xf32>
    %106 = math.exp %105 : vector<8x8xf32>
    %cst_40 = arith.constant dense<0.000000e+00> : vector<8xf32>
    %107 = vector.multi_reduction <add>, %106, %cst_40 [1] : vector<8x8xf32> to vector<8xf32>
    %108 = vector.shape_cast %107 : vector<8xf32> to vector<8x1xf32>
    %109 = tpu.reciprocal %108 : vector<8x1xf32> -> vector<8x1xf32>
    %110 = vector.broadcast %109 : vector<8x1xf32> to vector<8x8xf32>
    %111 = arith.mulf %106, %110 : vector<8x8xf32>
    %112 = arith.truncf %111 : vector<8x8xf32> to vector<8x8xbf16>
    %cst_41 = arith.constant dense<0.000000e+00> : vector<8x8xf32>
    %113 = tpu.matmul %112, %98, %cst_41 {dimension_numbers = #tpu.dot_dimension_numbers<[1], [0], [0], [1], [0, 0, 1, 1], [], []>} : vector<8x8xbf16>, vector<8x8xbf16>, vector<8x8xf32> -> vector<8x8xf32>
    %c0_42 = arith.constant 0 : index
    %c24 = arith.constant 24 : index
    %114 = vector.load %arg18[%c0_42, %c24] : memref<16x32xf32, #tpu.memory_space<vmem>>, vector<8x8xf32>
    tpu.vector_store %arg18[%c0_42, %c24], %113 {strides = array<i32>} : memref<16x32xf32, #tpu.memory_space<vmem>>, vector<8x8xf32>,
    %c1 = arith.constant 1 : index
    %c0_43 = arith.constant 0 : index
    %c0_44 = arith.constant 0 : index
    %115 = vector.load %arg2[%c1, %c0_43, %c0_44] : memref<2x1x8xf32, #tpu.memory_space<vmem>>, vector<1x1x8xf32>
    %116 = vector.shape_cast %115 : vector<1x1x8xf32> to vector<1x8xf32>
    %117 = vector.extract_strided_slice %36 {offsets = [8, 0], sizes = [8, 8], strides = [1, 1]} : vector<16x96xbf16> to vector<8x8xbf16>
    %118 = vector.extract_strided_slice %36 {offsets = [8, 32], sizes = [8, 8], strides = [1, 1]} : vector<16x96xbf16> to vector<8x8xbf16>
    %119 = vector.extract_strided_slice %36 {offsets = [8, 64], sizes = [8, 8], strides = [1, 1]} : vector<16x96xbf16> to vector<8x8xbf16>
    %cst_45 = arith.constant dense<0.000000e+00> : vector<8x8xf32>
    %120 = tpu.matmul %117, %118, %cst_45 {dimension_numbers = #tpu.dot_dimension_numbers<[1], [1], [0], [0], [0, 0, 1, 0], [], []>} : vector<8x8xbf16>, vector<8x8xbf16>, vector<8x8xf32> -> vector<8x8xf32>
    %121 = vector.broadcast %116 : vector<1x8xf32> to vector<8x8xf32>
    %122 = arith.addf %120, %121 : vector<8x8xf32>
    %cst_46 = arith.constant dense<0xFF800000> : vector<8xf32>
    %123 = vector.multi_reduction <maximumf>, %122, %cst_46 [1] : vector<8x8xf32> to vector<8xf32>
    %124 = vector.shape_cast %123 : vector<8xf32> to vector<8x1xf32>
    %125 = vector.broadcast %124 : vector<8x1xf32> to vector<8x8xf32>
    %126 = arith.subf %122, %125 : vector<8x8xf32>
    %127 = math.exp %126 : vector<8x8xf32>
    %cst_47 = arith.constant dense<0.000000e+00> : vector<8xf32>
    %128 = vector.multi_reduction <add>, %127, %cst_47 [1] : vector<8x8xf32> to vector<8xf32>
    %129 = vector.shape_cast %128 : vector<8xf32> to vector<8x1xf32>
    %130 = tpu.reciprocal %129 : vector<8x1xf32> -> vector<8x1xf32>
    %131 = vector.broadcast %130 : vector<8x1xf32> to vector<8x8xf32>
    %132 = arith.mulf %127, %131 : vector<8x8xf32>
    %133 = arith.truncf %132 : vector<8x8xf32> to vector<8x8xbf16>
    %cst_48 = arith.constant dense<0.000000e+00> : vector<8x8xf32>
    %134 = tpu.matmul %133, %119, %cst_48 {dimension_numbers = #tpu.dot_dimension_numbers<[1], [0], [0], [1], [0, 0, 1, 1], [], []>} : vector<8x8xbf16>, vector<8x8xbf16>, vector<8x8xf32> -> vector<8x8xf32>
    %c8_49 = arith.constant 8 : index
    %c0_50 = arith.constant 0 : index
    %135 = vector.load %arg18[%c8_49, %c0_50] : memref<16x32xf32, #tpu.memory_space<vmem>>, vector<8x8xf32>
    tpu.vector_store %arg18[%c8_49, %c0_50], %134 {strides = array<i32>} : memref<16x32xf32, #tpu.memory_space<vmem>>, vector<8x8xf32>,
    %136 = vector.extract_strided_slice %36 {offsets = [8, 8], sizes = [8, 8], strides = [1, 1]} : vector<16x96xbf16> to vector<8x8xbf16>
    %137 = vector.extract_strided_slice %36 {offsets = [8, 40], sizes = [8, 8], strides = [1, 1]} : vector<16x96xbf16> to vector<8x8xbf16>
    %138 = vector.extract_strided_slice %36 {offsets = [8, 72], sizes = [8, 8], strides = [1, 1]} : vector<16x96xbf16> to vector<8x8xbf16>
    %cst_51 = arith.constant dense<0.000000e+00> : vector<8x8xf32>
    %139 = tpu.matmul %136, %137, %cst_51 {dimension_numbers = #tpu.dot_dimension_numbers<[1], [1], [0], [0], [0, 0, 1, 0], [], []>} : vector<8x8xbf16>, vector<8x8xbf16>, vector<8x8xf32> -> vector<8x8xf32>
    %140 = vector.broadcast %116 : vector<1x8xf32> to vector<8x8xf32>
    %141 = arith.addf %139, %140 : vector<8x8xf32>
    %cst_52 = arith.constant dense<0xFF800000> : vector<8xf32>
    %142 = vector.multi_reduction <maximumf>, %141, %cst_52 [1] : vector<8x8xf32> to vector<8xf32>
    %143 = vector.shape_cast %142 : vector<8xf32> to vector<8x1xf32>
    %144 = vector.broadcast %143 : vector<8x1xf32> to vector<8x8xf32>
    %145 = arith.subf %141, %144 : vector<8x8xf32>
    %146 = math.exp %145 : vector<8x8xf32>
    %cst_53 = arith.constant dense<0.000000e+00> : vector<8xf32>
    %147 = vector.multi_reduction <add>, %146, %cst_53 [1] : vector<8x8xf32> to vector<8xf32>
    %148 = vector.shape_cast %147 : vector<8xf32> to vector<8x1xf32>
    %149 = tpu.reciprocal %148 : vector<8x1xf32> -> vector<8x1xf32>
    %150 = vector.broadcast %149 : vector<8x1xf32> to vector<8x8xf32>
    %151 = arith.mulf %146, %150 : vector<8x8xf32>
    %152 = arith.truncf %151 : vector<8x8xf32> to vector<8x8xbf16>
    %cst_54 = arith.constant dense<0.000000e+00> : vector<8x8xf32>
    %153 = tpu.matmul %152, %138, %cst_54 {dimension_numbers = #tpu.dot_dimension_numbers<[1], [0], [0], [1], [0, 0, 1, 1], [], []>} : vector<8x8xbf16>, vector<8x8xbf16>, vector<8x8xf32> -> vector<8x8xf32>
    %c8_55 = arith.constant 8 : index
    %c8_56 = arith.constant 8 : index
    %154 = vector.load %arg18[%c8_55, %c8_56] : memref<16x32xf32, #tpu.memory_space<vmem>>, vector<8x8xf32>
    tpu.vector_store %arg18[%c8_55, %c8_56], %153 {strides = array<i32>} : memref<16x32xf32, #tpu.memory_space<vmem>>, vector<8x8xf32>,
    %155 = vector.extract_strided_slice %36 {offsets = [8, 16], sizes = [8, 8], strides = [1, 1]} : vector<16x96xbf16> to vector<8x8xbf16>
    %156 = vector.extract_strided_slice %36 {offsets = [8, 48], sizes = [8, 8], strides = [1, 1]} : vector<16x96xbf16> to vector<8x8xbf16>
    %157 = vector.extract_strided_slice %36 {offsets = [8, 80], sizes = [8, 8], strides = [1, 1]} : vector<16x96xbf16> to vector<8x8xbf16>
    %cst_57 = arith.constant dense<0.000000e+00> : vector<8x8xf32>
    %158 = tpu.matmul %155, %156, %cst_57 {dimension_numbers = #tpu.dot_dimension_numbers<[1], [1], [0], [0], [0, 0, 1, 0], [], []>} : vector<8x8xbf16>, vector<8x8xbf16>, vector<8x8xf32> -> vector<8x8xf32>
    %159 = vector.broadcast %116 : vector<1x8xf32> to vector<8x8xf32>
    %160 = arith.addf %158, %159 : vector<8x8xf32>
    %cst_58 = arith.constant dense<0xFF800000> : vector<8xf32>
    %161 = vector.multi_reduction <maximumf>, %160, %cst_58 [1] : vector<8x8xf32> to vector<8xf32>
    %162 = vector.shape_cast %161 : vector<8xf32> to vector<8x1xf32>
    %163 = vector.broadcast %162 : vector<8x1xf32> to vector<8x8xf32>
    %164 = arith.subf %160, %163 : vector<8x8xf32>
    %165 = math.exp %164 : vector<8x8xf32>
    %cst_59 = arith.constant dense<0.000000e+00> : vector<8xf32>
    %166 = vector.multi_reduction <add>, %165, %cst_59 [1] : vector<8x8xf32> to vector<8xf32>
    %167 = vector.shape_cast %166 : vector<8xf32> to vector<8x1xf32>
    %168 = tpu.reciprocal %167 : vector<8x1xf32> -> vector<8x1xf32>
    %169 = vector.broadcast %168 : vector<8x1xf32> to vector<8x8xf32>
    %170 = arith.mulf %165, %169 : vector<8x8xf32>
    %171 = arith.truncf %170 : vector<8x8xf32> to vector<8x8xbf16>
    %cst_60 = arith.constant dense<0.000000e+00> : vector<8x8xf32>
    %172 = tpu.matmul %171, %157, %cst_60 {dimension_numbers = #tpu.dot_dimension_numbers<[1], [0], [0], [1], [0, 0, 1, 1], [], []>} : vector<8x8xbf16>, vector<8x8xbf16>, vector<8x8xf32> -> vector<8x8xf32>
    %c8_61 = arith.constant 8 : index
    %c16_62 = arith.constant 16 : index
    %173 = vector.load %arg18[%c8_61, %c16_62] : memref<16x32xf32, #tpu.memory_space<vmem>>, vector<8x8xf32>
    tpu.vector_store %arg18[%c8_61, %c16_62], %172 {strides = array<i32>} : memref<16x32xf32, #tpu.memory_space<vmem>>, vector<8x8xf32>,
    %174 = vector.extract_strided_slice %36 {offsets = [8, 24], sizes = [8, 8], strides = [1, 1]} : vector<16x96xbf16> to vector<8x8xbf16>
    %175 = vector.extract_strided_slice %36 {offsets = [8, 56], sizes = [8, 8], strides = [1, 1]} : vector<16x96xbf16> to vector<8x8xbf16>
    %176 = vector.extract_strided_slice %36 {offsets = [8, 88], sizes = [8, 8], strides = [1, 1]} : vector<16x96xbf16> to vector<8x8xbf16>
    %cst_63 = arith.constant dense<0.000000e+00> : vector<8x8xf32>
    %177 = tpu.matmul %174, %175, %cst_63 {dimension_numbers = #tpu.dot_dimension_numbers<[1], [1], [0], [0], [0, 0, 1, 0], [], []>} : vector<8x8xbf16>, vector<8x8xbf16>, vector<8x8xf32> -> vector<8x8xf32>
    %178 = vector.broadcast %116 : vector<1x8xf32> to vector<8x8xf32>
    %179 = arith.addf %177, %178 : vector<8x8xf32>
    %cst_64 = arith.constant dense<0xFF800000> : vector<8xf32>
    %180 = vector.multi_reduction <maximumf>, %179, %cst_64 [1] : vector<8x8xf32> to vector<8xf32>
    %181 = vector.shape_cast %180 : vector<8xf32> to vector<8x1xf32>
    %182 = vector.broadcast %181 : vector<8x1xf32> to vector<8x8xf32>
    %183 = arith.subf %179, %182 : vector<8x8xf32>
    %184 = math.exp %183 : vector<8x8xf32>
    %cst_65 = arith.constant dense<0.000000e+00> : vector<8xf32>
    %185 = vector.multi_reduction <add>, %184, %cst_65 [1] : vector<8x8xf32> to vector<8xf32>
    %186 = vector.shape_cast %185 : vector<8xf32> to vector<8x1xf32>
    %187 = tpu.reciprocal %186 : vector<8x1xf32> -> vector<8x1xf32>
    %188 = vector.broadcast %187 : vector<8x1xf32> to vector<8x8xf32>
    %189 = arith.mulf %184, %188 : vector<8x8xf32>
    %190 = arith.truncf %189 : vector<8x8xf32> to vector<8x8xbf16>
    %cst_66 = arith.constant dense<0.000000e+00> : vector<8x8xf32>
    %191 = tpu.matmul %190, %176, %cst_66 {dimension_numbers = #tpu.dot_dimension_numbers<[1], [0], [0], [1], [0, 0, 1, 1], [], []>} : vector<8x8xbf16>, vector<8x8xbf16>, vector<8x8xf32> -> vector<8x8xf32>
    %c8_67 = arith.constant 8 : index
    %c24_68 = arith.constant 24 : index
    %192 = vector.load %arg18[%c8_67, %c24_68] : memref<16x32xf32, #tpu.memory_space<vmem>>, vector<8x8xf32>
    tpu.vector_store %arg18[%c8_67, %c24_68], %191 {strides = array<i32>} : memref<16x32xf32, #tpu.memory_space<vmem>>, vector<8x8xf32>,
    %c0_69 = arith.constant 0 : index
    %c0_70 = arith.constant 0 : index
    %193 = vector.load %arg18[%c0_69, %c0_70] : memref<16x32xf32, #tpu.memory_space<vmem>>, vector<16x32xf32>
    %c0_71 = arith.constant 0 : index
    %c0_72 = arith.constant 0 : index
    %c0_73 = arith.constant 0 : index
    %194 = vector.load %arg7[%c0_71, %c0_72, %c0_73] : memref<2x32x32xbf16, #tpu.memory_space<vmem>>, vector<1x32x32xbf16>
    %195 = vector.shape_cast %194 : vector<1x32x32xbf16> to vector<32x32xbf16>
    %196 = arith.truncf %193 : vector<16x32xf32> to vector<16x32xbf16>
    %cst_74 = arith.constant dense<0.000000e+00> : vector<16x32xf32>
    %197 = tpu.matmul %196, %195, %cst_74 {dimension_numbers = #tpu.dot_dimension_numbers<[1], [0], [0], [1], [0, 0, 1, 1], [], []>} : vector<16x32xbf16>, vector<32x32xbf16>, vector<16x32xf32> -> vector<16x32xf32>
    %c0_75 = arith.constant 0 : index
    %c0_76 = arith.constant 0 : index
    %c0_77 = arith.constant 0 : index
    %198 = vector.load %arg8[%c0_75, %c0_76, %c0_77] : memref<2x1x32xf32, #tpu.memory_space<vmem>>, vector<1x1x32xf32>
    %199 = vector.shape_cast %198 : vector<1x1x32xf32> to vector<1x32xf32>
    %200 = vector.broadcast %199 : vector<1x32xf32> to vector<16x32xf32>
    %201 = arith.addf %197, %200 : vector<16x32xf32>
    %202 = arith.addf %201, %24 : vector<16x32xf32>
    %c0_78 = arith.constant 0 : index
    %c0_79 = arith.constant 0 : index
    %c0_80 = arith.constant 0 : index
    %203 = vector.load %arg9[%c0_78, %c0_79, %c0_80] : memref<2x1x32xf32, #tpu.memory_space<vmem>>, vector<1x1x32xf32>
    %204 = vector.shape_cast %203 : vector<1x1x32xf32> to vector<1x32xf32>
    %c0_81 = arith.constant 0 : index
    %c0_82 = arith.constant 0 : index
    %c0_83 = arith.constant 0 : index
    %205 = vector.load %arg10[%c0_81, %c0_82, %c0_83] : memref<2x1x32xf32, #tpu.memory_space<vmem>>, vector<1x1x32xf32>
    %206 = vector.shape_cast %205 : vector<1x1x32xf32> to vector<1x32xf32>
    %cst_84 = arith.constant dense<0.000000e+00> : vector<16xf32>
    %207 = vector.multi_reduction <add>, %202, %cst_84 [1] : vector<16x32xf32> to vector<16xf32>
    %208 = vector.shape_cast %207 : vector<16xf32> to vector<16x1xf32>
    %cst_85 = arith.constant 3.200000e+01 : f32
    %209 = vector.broadcast %cst_85 : f32 to vector<16x1xf32>
    %210 = arith.divf %208, %209 : vector<16x1xf32>
    %211 = vector.broadcast %210 : vector<16x1xf32> to vector<16x32xf32>
    %212 = arith.subf %202, %211 : vector<16x32xf32>
    %213 = arith.mulf %212, %212 : vector<16x32xf32>
    %cst_86 = arith.constant dense<0.000000e+00> : vector<16xf32>
    %214 = vector.multi_reduction <add>, %213, %cst_86 [1] : vector<16x32xf32> to vector<16xf32>
    %215 = vector.shape_cast %214 : vector<16xf32> to vector<16x1xf32>
    %cst_87 = arith.constant 3.200000e+01 : f32
    %216 = vector.broadcast %cst_87 : f32 to vector<16x1xf32>
    %217 = arith.divf %215, %216 : vector<16x1xf32>
    %218 = vector.broadcast %210 : vector<16x1xf32> to vector<16x32xf32>
    %219 = arith.subf %202, %218 : vector<16x32xf32>
    %cst_88 = arith.constant 9.99999996E-13 : f32
    %220 = vector.broadcast %cst_88 : f32 to vector<16x1xf32>
    %221 = arith.addf %217, %220 : vector<16x1xf32>
    %222 = math.rsqrt %221 : vector<16x1xf32>
    %223 = vector.broadcast %222 : vector<16x1xf32> to vector<16x32xf32>
    %224 = arith.mulf %219, %223 : vector<16x32xf32>
    %225 = vector.broadcast %204 : vector<1x32xf32> to vector<16x32xf32>
    %226 = arith.mulf %224, %225 : vector<16x32xf32>
    %227 = vector.broadcast %206 : vector<1x32xf32> to vector<16x32xf32>
    %228 = arith.addf %226, %227 : vector<16x32xf32>
    %c0_89 = arith.constant 0 : index
    %c0_90 = arith.constant 0 : index
    %c0_91 = arith.constant 0 : index
    %229 = vector.load %arg11[%c0_89, %c0_90, %c0_91] : memref<2x32x64xbf16, #tpu.memory_space<vmem>>, vector<1x32x64xbf16>
    %230 = vector.shape_cast %229 : vector<1x32x64xbf16> to vector<32x64xbf16>
    %231 = arith.truncf %228 : vector<16x32xf32> to vector<16x32xbf16>
    %cst_92 = arith.constant dense<0.000000e+00> : vector<16x64xf32>
    %232 = tpu.matmul %231, %230, %cst_92 {dimension_numbers = #tpu.dot_dimension_numbers<[1], [0], [0], [1], [0, 0, 1, 1], [], []>} : vector<16x32xbf16>, vector<32x64xbf16>, vector<16x64xf32> -> vector<16x64xf32>
    %c0_93 = arith.constant 0 : index
    %c0_94 = arith.constant 0 : index
    %c0_95 = arith.constant 0 : index
    %233 = vector.load %arg12[%c0_93, %c0_94, %c0_95] : memref<2x1x64xf32, #tpu.memory_space<vmem>>, vector<1x1x64xf32>
    %234 = vector.shape_cast %233 : vector<1x1x64xf32> to vector<1x64xf32>
    %235 = vector.broadcast %234 : vector<1x64xf32> to vector<16x64xf32>
    %236 = arith.addf %232, %235 : vector<16x64xf32>
    %237 = arith.mulf %236, %236 : vector<16x64xf32>
    %238 = arith.mulf %236, %237 : vector<16x64xf32>
    %cst_96 = arith.constant 4.471500e-02 : f32
    %239 = vector.broadcast %cst_96 : f32 to vector<16x64xf32>
    %240 = arith.mulf %239, %238 : vector<16x64xf32>
    %241 = arith.addf %236, %240 : vector<16x64xf32>
    %cst_97 = arith.constant 0.797884583 : f32
    %242 = vector.broadcast %cst_97 : f32 to vector<16x64xf32>
    %243 = arith.mulf %242, %241 : vector<16x64xf32>
    %244 = math.tanh %243 : vector<16x64xf32>
    %cst_98 = arith.constant 1.000000e+00 : f32
    %245 = vector.broadcast %cst_98 : f32 to vector<16x64xf32>
    %246 = arith.addf %245, %244 : vector<16x64xf32>
    %cst_99 = arith.constant 5.000000e-01 : f32
    %247 = vector.broadcast %cst_99 : f32 to vector<16x64xf32>
    %248 = arith.mulf %247, %246 : vector<16x64xf32>
    %249 = arith.mulf %236, %248 : vector<16x64xf32>
    %c0_100 = arith.constant 0 : index
    %c0_101 = arith.constant 0 : index
    %c0_102 = arith.constant 0 : index
    %250 = vector.load %arg13[%c0_100, %c0_101, %c0_102] : memref<2x64x32xbf16, #tpu.memory_space<vmem>>, vector<1x64x32xbf16>
    %251 = vector.shape_cast %250 : vector<1x64x32xbf16> to vector<64x32xbf16>
    %252 = arith.truncf %249 : vector<16x64xf32> to vector<16x64xbf16>
    %cst_103 = arith.constant dense<0.000000e+00> : vector<16x32xf32>
    %253 = tpu.matmul %252, %251, %cst_103 {dimension_numbers = #tpu.dot_dimension_numbers<[1], [0], [0], [1], [0, 0, 1, 1], [], []>} : vector<16x64xbf16>, vector<64x32xbf16>, vector<16x32xf32> -> vector<16x32xf32>
    %c0_104 = arith.constant 0 : index
    %c0_105 = arith.constant 0 : index
    %c0_106 = arith.constant 0 : index
    %254 = vector.load %arg14[%c0_104, %c0_105, %c0_106] : memref<2x1x32xf32, #tpu.memory_space<vmem>>, vector<1x1x32xf32>
    %255 = vector.shape_cast %254 : vector<1x1x32xf32> to vector<1x32xf32>
    %256 = vector.broadcast %255 : vector<1x32xf32> to vector<16x32xf32>
    %257 = arith.addf %253, %256 : vector<16x32xf32>
    %258 = arith.addf %257, %228 : vector<16x32xf32>
    %c0_107 = arith.constant 0 : index
    %c0_108 = arith.constant 0 : index
    %c0_109 = arith.constant 0 : index
    %259 = vector.load %arg15[%c0_107, %c0_108, %c0_109] : memref<2x1x32xf32, #tpu.memory_space<vmem>>, vector<1x1x32xf32>
    %260 = vector.shape_cast %259 : vector<1x1x32xf32> to vector<1x32xf32>
    %c0_110 = arith.constant 0 : index
    %c0_111 = arith.constant 0 : index
    %c0_112 = arith.constant 0 : index
    %261 = vector.load %arg16[%c0_110, %c0_111, %c0_112] : memref<2x1x32xf32, #tpu.memory_space<vmem>>, vector<1x1x32xf32>
    %262 = vector.shape_cast %261 : vector<1x1x32xf32> to vector<1x32xf32>
    %cst_113 = arith.constant dense<0.000000e+00> : vector<16xf32>
    %263 = vector.multi_reduction <add>, %258, %cst_113 [1] : vector<16x32xf32> to vector<16xf32>
    %264 = vector.shape_cast %263 : vector<16xf32> to vector<16x1xf32>
    %cst_114 = arith.constant 3.200000e+01 : f32
    %265 = vector.broadcast %cst_114 : f32 to vector<16x1xf32>
    %266 = arith.divf %264, %265 : vector<16x1xf32>
    %267 = vector.broadcast %266 : vector<16x1xf32> to vector<16x32xf32>
    %268 = arith.subf %258, %267 : vector<16x32xf32>
    %269 = arith.mulf %268, %268 : vector<16x32xf32>
    %cst_115 = arith.constant dense<0.000000e+00> : vector<16xf32>
    %270 = vector.multi_reduction <add>, %269, %cst_115 [1] : vector<16x32xf32> to vector<16xf32>
    %271 = vector.shape_cast %270 : vector<16xf32> to vector<16x1xf32>
    %cst_116 = arith.constant 3.200000e+01 : f32
    %272 = vector.broadcast %cst_116 : f32 to vector<16x1xf32>
    %273 = arith.divf %271, %272 : vector<16x1xf32>
    %274 = vector.broadcast %266 : vector<16x1xf32> to vector<16x32xf32>
    %275 = arith.subf %258, %274 : vector<16x32xf32>
    %cst_117 = arith.constant 9.99999996E-13 : f32
    %276 = vector.broadcast %cst_117 : f32 to vector<16x1xf32>
    %277 = arith.addf %273, %276 : vector<16x1xf32>
    %278 = math.rsqrt %277 : vector<16x1xf32>
    %279 = vector.broadcast %278 : vector<16x1xf32> to vector<16x32xf32>
    %280 = arith.mulf %275, %279 : vector<16x32xf32>
    %281 = vector.broadcast %260 : vector<1x32xf32> to vector<16x32xf32>
    %282 = arith.mulf %280, %281 : vector<16x32xf32>
    %283 = vector.broadcast %262 : vector<1x32xf32> to vector<16x32xf32>
    %284 = arith.addf %282, %283 : vector<16x32xf32>
    %c1_118 = arith.constant 1 : index
    %c0_119 = arith.constant 0 : index
    %c0_120 = arith.constant 0 : index
    %285 = vector.load %arg17[%c1_118, %c0_119, %c0_120] : memref<3x16x32xf32, #tpu.memory_space<vmem>>, vector<1x16x32xf32>
    %286 = vector.shape_cast %285 : vector<1x16x32xf32> to vector<16x32xf32>
    %287 = vector.shape_cast %284 : vector<16x32xf32> to vector<1x16x32xf32>
    tpu.vector_store %arg17[%c1_118, %c0_119, %c0_120], %287 {strides = array<i32>} : memref<3x16x32xf32, #tpu.memory_space<vmem>>, vector<1x16x32xf32>,
    %c1_121 = arith.constant 1 : index
    %c0_122 = arith.constant 0 : index
    %c0_123 = arith.constant 0 : index
    %288 = vector.load %arg5[%c1_121, %c0_122, %c0_123] : memref<2x32x96xbf16, #tpu.memory_space<vmem>>, vector<1x32x96xbf16>
    %289 = vector.shape_cast %288 : vector<1x32x96xbf16> to vector<32x96xbf16>
    %290 = arith.truncf %284 : vector<16x32xf32> to vector<16x32xbf16>
    %cst_124 = arith.constant dense<0.000000e+00> : vector<16x96xf32>
    %291 = tpu.matmul %290, %289, %cst_124 {dimension_numbers = #tpu.dot_dimension_numbers<[1], [0], [0], [1], [0, 0, 1, 1], [], []>} : vector<16x32xbf16>, vector<32x96xbf16>, vector<16x96xf32> -> vector<16x96xf32>
    %c1_125 = arith.constant 1 : index
    %c0_126 = arith.constant 0 : index
    %c0_127 = arith.constant 0 : index
    %292 = vector.load %arg6[%c1_125, %c0_126, %c0_127] : memref<2x1x96xf32, #tpu.memory_space<vmem>>, vector<1x1x96xf32>
    %293 = vector.shape_cast %292 : vector<1x1x96xf32> to vector<1x96xf32>
    %294 = vector.broadcast %293 : vector<1x96xf32> to vector<16x96xf32>
    %295 = arith.addf %291, %294 : vector<16x96xf32>
    %296 = arith.truncf %295 : vector<16x96xf32> to vector<16x96xbf16>
    %c0_128 = arith.constant 0 : index
    %c0_129 = arith.constant 0 : index
    %c0_130 = arith.constant 0 : index
    %297 = vector.load %arg2[%c0_128, %c0_129, %c0_130] : memref<2x1x8xf32, #tpu.memory_space<vmem>>, vector<1x1x8xf32>
    %298 = vector.shape_cast %297 : vector<1x1x8xf32> to vector<1x8xf32>
    %299 = vector.extract_strided_slice %296 {offsets = [0, 0], sizes = [8, 8], strides = [1, 1]} : vector<16x96xbf16> to vector<8x8xbf16>
    %300 = vector.extract_strided_slice %296 {offsets = [0, 32], sizes = [8, 8], strides = [1, 1]} : vector<16x96xbf16> to vector<8x8xbf16>
    %301 = vector.extract_strided_slice %296 {offsets = [0, 64], sizes = [8, 8], strides = [1, 1]} : vector<16x96xbf16> to vector<8x8xbf16>
    %cst_131 = arith.constant dense<0.000000e+00> : vector<8x8xf32>
    %302 = tpu.matmul %299, %300, %cst_131 {dimension_numbers = #tpu.dot_dimension_numbers<[1], [1], [0], [0], [0, 0, 1, 0], [], []>} : vector<8x8xbf16>, vector<8x8xbf16>, vector<8x8xf32> -> vector<8x8xf32>
    %303 = vector.broadcast %298 : vector<1x8xf32> to vector<8x8xf32>
    %304 = arith.addf %302, %303 : vector<8x8xf32>
    %cst_132 = arith.constant dense<0xFF800000> : vector<8xf32>
    %305 = vector.multi_reduction <maximumf>, %304, %cst_132 [1] : vector<8x8xf32> to vector<8xf32>
    %306 = vector.shape_cast %305 : vector<8xf32> to vector<8x1xf32>
    %307 = vector.broadcast %306 : vector<8x1xf32> to vector<8x8xf32>
    %308 = arith.subf %304, %307 : vector<8x8xf32>
    %309 = math.exp %308 : vector<8x8xf32>
    %cst_133 = arith.constant dense<0.000000e+00> : vector<8xf32>
    %310 = vector.multi_reduction <add>, %309, %cst_133 [1] : vector<8x8xf32> to vector<8xf32>
    %311 = vector.shape_cast %310 : vector<8xf32> to vector<8x1xf32>
    %312 = tpu.reciprocal %311 : vector<8x1xf32> -> vector<8x1xf32>
    %313 = vector.broadcast %312 : vector<8x1xf32> to vector<8x8xf32>
    %314 = arith.mulf %309, %313 : vector<8x8xf32>
    %315 = arith.truncf %314 : vector<8x8xf32> to vector<8x8xbf16>
    %cst_134 = arith.constant dense<0.000000e+00> : vector<8x8xf32>
    %316 = tpu.matmul %315, %301, %cst_134 {dimension_numbers = #tpu.dot_dimension_numbers<[1], [0], [0], [1], [0, 0, 1, 1], [], []>} : vector<8x8xbf16>, vector<8x8xbf16>, vector<8x8xf32> -> vector<8x8xf32>
    %c0_135 = arith.constant 0 : index
    %c0_136 = arith.constant 0 : index
    %317 = vector.load %arg18[%c0_135, %c0_136] : memref<16x32xf32, #tpu.memory_space<vmem>>, vector<8x8xf32>
    tpu.vector_store %arg18[%c0_135, %c0_136], %316 {strides = array<i32>} : memref<16x32xf32, #tpu.memory_space<vmem>>, vector<8x8xf32>,
    %318 = vector.extract_strided_slice %296 {offsets = [0, 8], sizes = [8, 8], strides = [1, 1]} : vector<16x96xbf16> to vector<8x8xbf16>
    %319 = vector.extract_strided_slice %296 {offsets = [0, 40], sizes = [8, 8], strides = [1, 1]} : vector<16x96xbf16> to vector<8x8xbf16>
    %320 = vector.extract_strided_slice %296 {offsets = [0, 72], sizes = [8, 8], strides = [1, 1]} : vector<16x96xbf16> to vector<8x8xbf16>
    %cst_137 = arith.constant dense<0.000000e+00> : vector<8x8xf32>
    %321 = tpu.matmul %318, %319, %cst_137 {dimension_numbers = #tpu.dot_dimension_numbers<[1], [1], [0], [0], [0, 0, 1, 0], [], []>} : vector<8x8xbf16>, vector<8x8xbf16>, vector<8x8xf32> -> vector<8x8xf32>
    %322 = vector.broadcast %298 : vector<1x8xf32> to vector<8x8xf32>
    %323 = arith.addf %321, %322 : vector<8x8xf32>
    %cst_138 = arith.constant dense<0xFF800000> : vector<8xf32>
    %324 = vector.multi_reduction <maximumf>, %323, %cst_138 [1] : vector<8x8xf32> to vector<8xf32>
    %325 = vector.shape_cast %324 : vector<8xf32> to vector<8x1xf32>
    %326 = vector.broadcast %325 : vector<8x1xf32> to vector<8x8xf32>
    %327 = arith.subf %323, %326 : vector<8x8xf32>
    %328 = math.exp %327 : vector<8x8xf32>
    %cst_139 = arith.constant dense<0.000000e+00> : vector<8xf32>
    %329 = vector.multi_reduction <add>, %328, %cst_139 [1] : vector<8x8xf32> to vector<8xf32>
    %330 = vector.shape_cast %329 : vector<8xf32> to vector<8x1xf32>
    %331 = tpu.reciprocal %330 : vector<8x1xf32> -> vector<8x1xf32>
    %332 = vector.broadcast %331 : vector<8x1xf32> to vector<8x8xf32>
    %333 = arith.mulf %328, %332 : vector<8x8xf32>
    %334 = arith.truncf %333 : vector<8x8xf32> to vector<8x8xbf16>
    %cst_140 = arith.constant dense<0.000000e+00> : vector<8x8xf32>
    %335 = tpu.matmul %334, %320, %cst_140 {dimension_numbers = #tpu.dot_dimension_numbers<[1], [0], [0], [1], [0, 0, 1, 1], [], []>} : vector<8x8xbf16>, vector<8x8xbf16>, vector<8x8xf32> -> vector<8x8xf32>
    %c0_141 = arith.constant 0 : index
    %c8_142 = arith.constant 8 : index
    %336 = vector.load %arg18[%c0_141, %c8_142] : memref<16x32xf32, #tpu.memory_space<vmem>>, vector<8x8xf32>
    tpu.vector_store %arg18[%c0_141, %c8_142], %335 {strides = array<i32>} : memref<16x32xf32, #tpu.memory_space<vmem>>, vector<8x8xf32>,
    %337 = vector.extract_strided_slice %296 {offsets = [0, 16], sizes = [8, 8], strides = [1, 1]} : vector<16x96xbf16> to vector<8x8xbf16>
    %338 = vector.extract_strided_slice %296 {offsets = [0, 48], sizes = [8, 8], strides = [1, 1]} : vector<16x96xbf16> to vector<8x8xbf16>
    %339 = vector.extract_strided_slice %296 {offsets = [0, 80], sizes = [8, 8], strides = [1, 1]} : vector<16x96xbf16> to vector<8x8xbf16>
    %cst_143 = arith.constant dense<0.000000e+00> : vector<8x8xf32>
    %340 = tpu.matmul %337, %338, %cst_143 {dimension_numbers = #tpu.dot_dimension_numbers<[1], [1], [0], [0], [0, 0, 1, 0], [], []>} : vector<8x8xbf16>, vector<8x8xbf16>, vector<8x8xf32> -> vector<8x8xf32>
    %341 = vector.broadcast %298 : vector<1x8xf32> to vector<8x8xf32>
    %342 = arith.addf %340, %341 : vector<8x8xf32>
    %cst_144 = arith.constant dense<0xFF800000> : vector<8xf32>
    %343 = vector.multi_reduction <maximumf>, %342, %cst_144 [1] : vector<8x8xf32> to vector<8xf32>
    %344 = vector.shape_cast %343 : vector<8xf32> to vector<8x1xf32>
    %345 = vector.broadcast %344 : vector<8x1xf32> to vector<8x8xf32>
    %346 = arith.subf %342, %345 : vector<8x8xf32>
    %347 = math.exp %346 : vector<8x8xf32>
    %cst_145 = arith.constant dense<0.000000e+00> : vector<8xf32>
    %348 = vector.multi_reduction <add>, %347, %cst_145 [1] : vector<8x8xf32> to vector<8xf32>
    %349 = vector.shape_cast %348 : vector<8xf32> to vector<8x1xf32>
    %350 = tpu.reciprocal %349 : vector<8x1xf32> -> vector<8x1xf32>
    %351 = vector.broadcast %350 : vector<8x1xf32> to vector<8x8xf32>
    %352 = arith.mulf %347, %351 : vector<8x8xf32>
    %353 = arith.truncf %352 : vector<8x8xf32> to vector<8x8xbf16>
    %cst_146 = arith.constant dense<0.000000e+00> : vector<8x8xf32>
    %354 = tpu.matmul %353, %339, %cst_146 {dimension_numbers = #tpu.dot_dimension_numbers<[1], [0], [0], [1], [0, 0, 1, 1], [], []>} : vector<8x8xbf16>, vector<8x8xbf16>, vector<8x8xf32> -> vector<8x8xf32>
    %c0_147 = arith.constant 0 : index
    %c16_148 = arith.constant 16 : index
    %355 = vector.load %arg18[%c0_147, %c16_148] : memref<16x32xf32, #tpu.memory_space<vmem>>, vector<8x8xf32>
    tpu.vector_store %arg18[%c0_147, %c16_148], %354 {strides = array<i32>} : memref<16x32xf32, #tpu.memory_space<vmem>>, vector<8x8xf32>,
    %356 = vector.extract_strided_slice %296 {offsets = [0, 24], sizes = [8, 8], strides = [1, 1]} : vector<16x96xbf16> to vector<8x8xbf16>
    %357 = vector.extract_strided_slice %296 {offsets = [0, 56], sizes = [8, 8], strides = [1, 1]} : vector<16x96xbf16> to vector<8x8xbf16>
    %358 = vector.extract_strided_slice %296 {offsets = [0, 88], sizes = [8, 8], strides = [1, 1]} : vector<16x96xbf16> to vector<8x8xbf16>
    %cst_149 = arith.constant dense<0.000000e+00> : vector<8x8xf32>
    %359 = tpu.matmul %356, %357, %cst_149 {dimension_numbers = #tpu.dot_dimension_numbers<[1], [1], [0], [0], [0, 0, 1, 0], [], []>} : vector<8x8xbf16>, vector<8x8xbf16>, vector<8x8xf32> -> vector<8x8xf32>
    %360 = vector.broadcast %298 : vector<1x8xf32> to vector<8x8xf32>
    %361 = arith.addf %359, %360 : vector<8x8xf32>
    %cst_150 = arith.constant dense<0xFF800000> : vector<8xf32>
    %362 = vector.multi_reduction <maximumf>, %361, %cst_150 [1] : vector<8x8xf32> to vector<8xf32>
    %363 = vector.shape_cast %362 : vector<8xf32> to vector<8x1xf32>
    %364 = vector.broadcast %363 : vector<8x1xf32> to vector<8x8xf32>
    %365 = arith.subf %361, %364 : vector<8x8xf32>
    %366 = math.exp %365 : vector<8x8xf32>
    %cst_151 = arith.constant dense<0.000000e+00> : vector<8xf32>
    %367 = vector.multi_reduction <add>, %366, %cst_151 [1] : vector<8x8xf32> to vector<8xf32>
    %368 = vector.shape_cast %367 : vector<8xf32> to vector<8x1xf32>
    %369 = tpu.reciprocal %368 : vector<8x1xf32> -> vector<8x1xf32>
    %370 = vector.broadcast %369 : vector<8x1xf32> to vector<8x8xf32>
    %371 = arith.mulf %366, %370 : vector<8x8xf32>
    %372 = arith.truncf %371 : vector<8x8xf32> to vector<8x8xbf16>
    %cst_152 = arith.constant dense<0.000000e+00> : vector<8x8xf32>
    %373 = tpu.matmul %372, %358, %cst_152 {dimension_numbers = #tpu.dot_dimension_numbers<[1], [0], [0], [1], [0, 0, 1, 1], [], []>} : vector<8x8xbf16>, vector<8x8xbf16>, vector<8x8xf32> -> vector<8x8xf32>
    %c0_153 = arith.constant 0 : index
    %c24_154 = arith.constant 24 : index
    %374 = vector.load %arg18[%c0_153, %c24_154] : memref<16x32xf32, #tpu.memory_space<vmem>>, vector<8x8xf32>
    tpu.vector_store %arg18[%c0_153, %c24_154], %373 {strides = array<i32>} : memref<16x32xf32, #tpu.memory_space<vmem>>, vector<8x8xf32>,
    %c1_155 = arith.constant 1 : index
    %c0_156 = arith.constant 0 : index
    %c0_157 = arith.constant 0 : index
    %375 = vector.load %arg2[%c1_155, %c0_156, %c0_157] : memref<2x1x8xf32, #tpu.memory_space<vmem>>, vector<1x1x8xf32>
    %376 = vector.shape_cast %375 : vector<1x1x8xf32> to vector<1x8xf32>
    %377 = vector.extract_strided_slice %296 {offsets = [8, 0], sizes = [8, 8], strides = [1, 1]} : vector<16x96xbf16> to vector<8x8xbf16>
    %378 = vector.extract_strided_slice %296 {offsets = [8, 32], sizes = [8, 8], strides = [1, 1]} : vector<16x96xbf16> to vector<8x8xbf16>
    %379 = vector.extract_strided_slice %296 {offsets = [8, 64], sizes = [8, 8], strides = [1, 1]} : vector<16x96xbf16> to vector<8x8xbf16>
    %cst_158 = arith.constant dense<0.000000e+00> : vector<8x8xf32>
    %380 = tpu.matmul %377, %378, %cst_158 {dimension_numbers = #tpu.dot_dimension_numbers<[1], [1], [0], [0], [0, 0, 1, 0], [], []>} : vector<8x8xbf16>, vector<8x8xbf16>, vector<8x8xf32> -> vector<8x8xf32>
    %381 = vector.broadcast %376 : vector<1x8xf32> to vector<8x8xf32>
    %382 = arith.addf %380, %381 : vector<8x8xf32>
    %cst_159 = arith.constant dense<0xFF800000> : vector<8xf32>
    %383 = vector.multi_reduction <maximumf>, %382, %cst_159 [1] : vector<8x8xf32> to vector<8xf32>
    %384 = vector.shape_cast %383 : vector<8xf32> to vector<8x1xf32>
    %385 = vector.broadcast %384 : vector<8x1xf32> to vector<8x8xf32>
    %386 = arith.subf %382, %385 : vector<8x8xf32>
    %387 = math.exp %386 : vector<8x8xf32>
    %cst_160 = arith.constant dense<0.000000e+00> : vector<8xf32>
    %388 = vector.multi_reduction <add>, %387, %cst_160 [1] : vector<8x8xf32> to vector<8xf32>
    %389 = vector.shape_cast %388 : vector<8xf32> to vector<8x1xf32>
    %390 = tpu.reciprocal %389 : vector<8x1xf32> -> vector<8x1xf32>
    %391 = vector.broadcast %390 : vector<8x1xf32> to vector<8x8xf32>
    %392 = arith.mulf %387, %391 : vector<8x8xf32>
    %393 = arith.truncf %392 : vector<8x8xf32> to vector<8x8xbf16>
    %cst_161 = arith.constant dense<0.000000e+00> : vector<8x8xf32>
    %394 = tpu.matmul %393, %379, %cst_161 {dimension_numbers = #tpu.dot_dimension_numbers<[1], [0], [0], [1], [0, 0, 1, 1], [], []>} : vector<8x8xbf16>, vector<8x8xbf16>, vector<8x8xf32> -> vector<8x8xf32>
    %c8_162 = arith.constant 8 : index
    %c0_163 = arith.constant 0 : index
    %395 = vector.load %arg18[%c8_162, %c0_163] : memref<16x32xf32, #tpu.memory_space<vmem>>, vector<8x8xf32>
    tpu.vector_store %arg18[%c8_162, %c0_163], %394 {strides = array<i32>} : memref<16x32xf32, #tpu.memory_space<vmem>>, vector<8x8xf32>,
    %396 = vector.extract_strided_slice %296 {offsets = [8, 8], sizes = [8, 8], strides = [1, 1]} : vector<16x96xbf16> to vector<8x8xbf16>
    %397 = vector.extract_strided_slice %296 {offsets = [8, 40], sizes = [8, 8], strides = [1, 1]} : vector<16x96xbf16> to vector<8x8xbf16>
    %398 = vector.extract_strided_slice %296 {offsets = [8, 72], sizes = [8, 8], strides = [1, 1]} : vector<16x96xbf16> to vector<8x8xbf16>
    %cst_164 = arith.constant dense<0.000000e+00> : vector<8x8xf32>
    %399 = tpu.matmul %396, %397, %cst_164 {dimension_numbers = #tpu.dot_dimension_numbers<[1], [1], [0], [0], [0, 0, 1, 0], [], []>} : vector<8x8xbf16>, vector<8x8xbf16>, vector<8x8xf32> -> vector<8x8xf32>
    %400 = vector.broadcast %376 : vector<1x8xf32> to vector<8x8xf32>
    %401 = arith.addf %399, %400 : vector<8x8xf32>
    %cst_165 = arith.constant dense<0xFF800000> : vector<8xf32>
    %402 = vector.multi_reduction <maximumf>, %401, %cst_165 [1] : vector<8x8xf32> to vector<8xf32>
    %403 = vector.shape_cast %402 : vector<8xf32> to vector<8x1xf32>
    %404 = vector.broadcast %403 : vector<8x1xf32> to vector<8x8xf32>
    %405 = arith.subf %401, %404 : vector<8x8xf32>
    %406 = math.exp %405 : vector<8x8xf32>
    %cst_166 = arith.constant dense<0.000000e+00> : vector<8xf32>
    %407 = vector.multi_reduction <add>, %406, %cst_166 [1] : vector<8x8xf32> to vector<8xf32>
    %408 = vector.shape_cast %407 : vector<8xf32> to vector<8x1xf32>
    %409 = tpu.reciprocal %408 : vector<8x1xf32> -> vector<8x1xf32>
    %410 = vector.broadcast %409 : vector<8x1xf32> to vector<8x8xf32>
    %411 = arith.mulf %406, %410 : vector<8x8xf32>
    %412 = arith.truncf %411 : vector<8x8xf32> to vector<8x8xbf16>
    %cst_167 = arith.constant dense<0.000000e+00> : vector<8x8xf32>
    %413 = tpu.matmul %412, %398, %cst_167 {dimension_numbers = #tpu.dot_dimension_numbers<[1], [0], [0], [1], [0, 0, 1, 1], [], []>} : vector<8x8xbf16>, vector<8x8xbf16>, vector<8x8xf32> -> vector<8x8xf32>
    %c8_168 = arith.constant 8 : index
    %c8_169 = arith.constant 8 : index
    %414 = vector.load %arg18[%c8_168, %c8_169] : memref<16x32xf32, #tpu.memory_space<vmem>>, vector<8x8xf32>
    tpu.vector_store %arg18[%c8_168, %c8_169], %413 {strides = array<i32>} : memref<16x32xf32, #tpu.memory_space<vmem>>, vector<8x8xf32>,
    %415 = vector.extract_strided_slice %296 {offsets = [8, 16], sizes = [8, 8], strides = [1, 1]} : vector<16x96xbf16> to vector<8x8xbf16>
    %416 = vector.extract_strided_slice %296 {offsets = [8, 48], sizes = [8, 8], strides = [1, 1]} : vector<16x96xbf16> to vector<8x8xbf16>
    %417 = vector.extract_strided_slice %296 {offsets = [8, 80], sizes = [8, 8], strides = [1, 1]} : vector<16x96xbf16> to vector<8x8xbf16>
    %cst_170 = arith.constant dense<0.000000e+00> : vector<8x8xf32>
    %418 = tpu.matmul %415, %416, %cst_170 {dimension_numbers = #tpu.dot_dimension_numbers<[1], [1], [0], [0], [0, 0, 1, 0], [], []>} : vector<8x8xbf16>, vector<8x8xbf16>, vector<8x8xf32> -> vector<8x8xf32>
    %419 = vector.broadcast %376 : vector<1x8xf32> to vector<8x8xf32>
    %420 = arith.addf %418, %419 : vector<8x8xf32>
    %cst_171 = arith.constant dense<0xFF800000> : vector<8xf32>
    %421 = vector.multi_reduction <maximumf>, %420, %cst_171 [1] : vector<8x8xf32> to vector<8xf32>
    %422 = vector.shape_cast %421 : vector<8xf32> to vector<8x1xf32>
    %423 = vector.broadcast %422 : vector<8x1xf32> to vector<8x8xf32>
    %424 = arith.subf %420, %423 : vector<8x8xf32>
    %425 = math.exp %424 : vector<8x8xf32>
    %cst_172 = arith.constant dense<0.000000e+00> : vector<8xf32>
    %426 = vector.multi_reduction <add>, %425, %cst_172 [1] : vector<8x8xf32> to vector<8xf32>
    %427 = vector.shape_cast %426 : vector<8xf32> to vector<8x1xf32>
    %428 = tpu.reciprocal %427 : vector<8x1xf32> -> vector<8x1xf32>
    %429 = vector.broadcast %428 : vector<8x1xf32> to vector<8x8xf32>
    %430 = arith.mulf %425, %429 : vector<8x8xf32>
    %431 = arith.truncf %430 : vector<8x8xf32> to vector<8x8xbf16>
    %cst_173 = arith.constant dense<0.000000e+00> : vector<8x8xf32>
    %432 = tpu.matmul %431, %417, %cst_173 {dimension_numbers = #tpu.dot_dimension_numbers<[1], [0], [0], [1], [0, 0, 1, 1], [], []>} : vector<8x8xbf16>, vector<8x8xbf16>, vector<8x8xf32> -> vector<8x8xf32>
    %c8_174 = arith.constant 8 : index
    %c16_175 = arith.constant 16 : index
    %433 = vector.load %arg18[%c8_174, %c16_175] : memref<16x32xf32, #tpu.memory_space<vmem>>, vector<8x8xf32>
    tpu.vector_store %arg18[%c8_174, %c16_175], %432 {strides = array<i32>} : memref<16x32xf32, #tpu.memory_space<vmem>>, vector<8x8xf32>,
    %434 = vector.extract_strided_slice %296 {offsets = [8, 24], sizes = [8, 8], strides = [1, 1]} : vector<16x96xbf16> to vector<8x8xbf16>
    %435 = vector.extract_strided_slice %296 {offsets = [8, 56], sizes = [8, 8], strides = [1, 1]} : vector<16x96xbf16> to vector<8x8xbf16>
    %436 = vector.extract_strided_slice %296 {offsets = [8, 88], sizes = [8, 8], strides = [1, 1]} : vector<16x96xbf16> to vector<8x8xbf16>
    %cst_176 = arith.constant dense<0.000000e+00> : vector<8x8xf32>
    %437 = tpu.matmul %434, %435, %cst_176 {dimension_numbers = #tpu.dot_dimension_numbers<[1], [1], [0], [0], [0, 0, 1, 0], [], []>} : vector<8x8xbf16>, vector<8x8xbf16>, vector<8x8xf32> -> vector<8x8xf32>
    %438 = vector.broadcast %376 : vector<1x8xf32> to vector<8x8xf32>
    %439 = arith.addf %437, %438 : vector<8x8xf32>
    %cst_177 = arith.constant dense<0xFF800000> : vector<8xf32>
    %440 = vector.multi_reduction <maximumf>, %439, %cst_177 [1] : vector<8x8xf32> to vector<8xf32>
    %441 = vector.shape_cast %440 : vector<8xf32> to vector<8x1xf32>
    %442 = vector.broadcast %441 : vector<8x1xf32> to vector<8x8xf32>
    %443 = arith.subf %439, %442 : vector<8x8xf32>
    %444 = math.exp %443 : vector<8x8xf32>
    %cst_178 = arith.constant dense<0.000000e+00> : vector<8xf32>
    %445 = vector.multi_reduction <add>, %444, %cst_178 [1] : vector<8x8xf32> to vector<8xf32>
    %446 = vector.shape_cast %445 : vector<8xf32> to vector<8x1xf32>
    %447 = tpu.reciprocal %446 : vector<8x1xf32> -> vector<8x1xf32>
    %448 = vector.broadcast %447 : vector<8x1xf32> to vector<8x8xf32>
    %449 = arith.mulf %444, %448 : vector<8x8xf32>
    %450 = arith.truncf %449 : vector<8x8xf32> to vector<8x8xbf16>
    %cst_179 = arith.constant dense<0.000000e+00> : vector<8x8xf32>
    %451 = tpu.matmul %450, %436, %cst_179 {dimension_numbers = #tpu.dot_dimension_numbers<[1], [0], [0], [1], [0, 0, 1, 1], [], []>} : vector<8x8xbf16>, vector<8x8xbf16>, vector<8x8xf32> -> vector<8x8xf32>
    %c8_180 = arith.constant 8 : index
    %c24_181 = arith.constant 24 : index
    %452 = vector.load %arg18[%c8_180, %c24_181] : memref<16x32xf32, #tpu.memory_space<vmem>>, vector<8x8xf32>
    tpu.vector_store %arg18[%c8_180, %c24_181], %451 {strides = array<i32>} : memref<16x32xf32, #tpu.memory_space<vmem>>, vector<8x8xf32>,
    %c0_182 = arith.constant 0 : index
    %c0_183 = arith.constant 0 : index
    %453 = vector.load %arg18[%c0_182, %c0_183] : memref<16x32xf32, #tpu.memory_space<vmem>>, vector<16x32xf32>
    %c1_184 = arith.constant 1 : index
    %c0_185 = arith.constant 0 : index
    %c0_186 = arith.constant 0 : index
    %454 = vector.load %arg7[%c1_184, %c0_185, %c0_186] : memref<2x32x32xbf16, #tpu.memory_space<vmem>>, vector<1x32x32xbf16>
    %455 = vector.shape_cast %454 : vector<1x32x32xbf16> to vector<32x32xbf16>
    %456 = arith.truncf %453 : vector<16x32xf32> to vector<16x32xbf16>
    %cst_187 = arith.constant dense<0.000000e+00> : vector<16x32xf32>
    %457 = tpu.matmul %456, %455, %cst_187 {dimension_numbers = #tpu.dot_dimension_numbers<[1], [0], [0], [1], [0, 0, 1, 1], [], []>} : vector<16x32xbf16>, vector<32x32xbf16>, vector<16x32xf32> -> vector<16x32xf32>
    %c1_188 = arith.constant 1 : index
    %c0_189 = arith.constant 0 : index
    %c0_190 = arith.constant 0 : index
    %458 = vector.load %arg8[%c1_188, %c0_189, %c0_190] : memref<2x1x32xf32, #tpu.memory_space<vmem>>, vector<1x1x32xf32>
    %459 = vector.shape_cast %458 : vector<1x1x32xf32> to vector<1x32xf32>
    %460 = vector.broadcast %459 : vector<1x32xf32> to vector<16x32xf32>
    %461 = arith.addf %457, %460 : vector<16x32xf32>
    %462 = arith.addf %461, %284 : vector<16x32xf32>
    %c1_191 = arith.constant 1 : index
    %c0_192 = arith.constant 0 : index
    %c0_193 = arith.constant 0 : index
    %463 = vector.load %arg9[%c1_191, %c0_192, %c0_193] : memref<2x1x32xf32, #tpu.memory_space<vmem>>, vector<1x1x32xf32>
    %464 = vector.shape_cast %463 : vector<1x1x32xf32> to vector<1x32xf32>
    %c1_194 = arith.constant 1 : index
    %c0_195 = arith.constant 0 : index
    %c0_196 = arith.constant 0 : index
    %465 = vector.load %arg10[%c1_194, %c0_195, %c0_196] : memref<2x1x32xf32, #tpu.memory_space<vmem>>, vector<1x1x32xf32>
    %466 = vector.shape_cast %465 : vector<1x1x32xf32> to vector<1x32xf32>
    %cst_197 = arith.constant dense<0.000000e+00> : vector<16xf32>
    %467 = vector.multi_reduction <add>, %462, %cst_197 [1] : vector<16x32xf32> to vector<16xf32>
    %468 = vector.shape_cast %467 : vector<16xf32> to vector<16x1xf32>
    %cst_198 = arith.constant 3.200000e+01 : f32
    %469 = vector.broadcast %cst_198 : f32 to vector<16x1xf32>
    %470 = arith.divf %468, %469 : vector<16x1xf32>
    %471 = vector.broadcast %470 : vector<16x1xf32> to vector<16x32xf32>
    %472 = arith.subf %462, %471 : vector<16x32xf32>
    %473 = arith.mulf %472, %472 : vector<16x32xf32>
    %cst_199 = arith.constant dense<0.000000e+00> : vector<16xf32>
    %474 = vector.multi_reduction <add>, %473, %cst_199 [1] : vector<16x32xf32> to vector<16xf32>
    %475 = vector.shape_cast %474 : vector<16xf32> to vector<16x1xf32>
    %cst_200 = arith.constant 3.200000e+01 : f32
    %476 = vector.broadcast %cst_200 : f32 to vector<16x1xf32>
    %477 = arith.divf %475, %476 : vector<16x1xf32>
    %478 = vector.broadcast %470 : vector<16x1xf32> to vector<16x32xf32>
    %479 = arith.subf %462, %478 : vector<16x32xf32>
    %cst_201 = arith.constant 9.99999996E-13 : f32
    %480 = vector.broadcast %cst_201 : f32 to vector<16x1xf32>
    %481 = arith.addf %477, %480 : vector<16x1xf32>
    %482 = math.rsqrt %481 : vector<16x1xf32>
    %483 = vector.broadcast %482 : vector<16x1xf32> to vector<16x32xf32>
    %484 = arith.mulf %479, %483 : vector<16x32xf32>
    %485 = vector.broadcast %464 : vector<1x32xf32> to vector<16x32xf32>
    %486 = arith.mulf %484, %485 : vector<16x32xf32>
    %487 = vector.broadcast %466 : vector<1x32xf32> to vector<16x32xf32>
    %488 = arith.addf %486, %487 : vector<16x32xf32>
    %c1_202 = arith.constant 1 : index
    %c0_203 = arith.constant 0 : index
    %c0_204 = arith.constant 0 : index
    %489 = vector.load %arg11[%c1_202, %c0_203, %c0_204] : memref<2x32x64xbf16, #tpu.memory_space<vmem>>, vector<1x32x64xbf16>
    %490 = vector.shape_cast %489 : vector<1x32x64xbf16> to vector<32x64xbf16>
    %491 = arith.truncf %488 : vector<16x32xf32> to vector<16x32xbf16>
    %cst_205 = arith.constant dense<0.000000e+00> : vector<16x64xf32>
    %492 = tpu.matmul %491, %490, %cst_205 {dimension_numbers = #tpu.dot_dimension_numbers<[1], [0], [0], [1], [0, 0, 1, 1], [], []>} : vector<16x32xbf16>, vector<32x64xbf16>, vector<16x64xf32> -> vector<16x64xf32>
    %c1_206 = arith.constant 1 : index
    %c0_207 = arith.constant 0 : index
    %c0_208 = arith.constant 0 : index
    %493 = vector.load %arg12[%c1_206, %c0_207, %c0_208] : memref<2x1x64xf32, #tpu.memory_space<vmem>>, vector<1x1x64xf32>
    %494 = vector.shape_cast %493 : vector<1x1x64xf32> to vector<1x64xf32>
    %495 = vector.broadcast %494 : vector<1x64xf32> to vector<16x64xf32>
    %496 = arith.addf %492, %495 : vector<16x64xf32>
    %497 = arith.mulf %496, %496 : vector<16x64xf32>
    %498 = arith.mulf %496, %497 : vector<16x64xf32>
    %cst_209 = arith.constant 4.471500e-02 : f32
    %499 = vector.broadcast %cst_209 : f32 to vector<16x64xf32>
    %500 = arith.mulf %499, %498 : vector<16x64xf32>
    %501 = arith.addf %496, %500 : vector<16x64xf32>
    %cst_210 = arith.constant 0.797884583 : f32
    %502 = vector.broadcast %cst_210 : f32 to vector<16x64xf32>
    %503 = arith.mulf %502, %501 : vector<16x64xf32>
    %504 = math.tanh %503 : vector<16x64xf32>
    %cst_211 = arith.constant 1.000000e+00 : f32
    %505 = vector.broadcast %cst_211 : f32 to vector<16x64xf32>
    %506 = arith.addf %505, %504 : vector<16x64xf32>
    %cst_212 = arith.constant 5.000000e-01 : f32
    %507 = vector.broadcast %cst_212 : f32 to vector<16x64xf32>
    %508 = arith.mulf %507, %506 : vector<16x64xf32>
    %509 = arith.mulf %496, %508 : vector<16x64xf32>
    %c1_213 = arith.constant 1 : index
    %c0_214 = arith.constant 0 : index
    %c0_215 = arith.constant 0 : index
    %510 = vector.load %arg13[%c1_213, %c0_214, %c0_215] : memref<2x64x32xbf16, #tpu.memory_space<vmem>>, vector<1x64x32xbf16>
    %511 = vector.shape_cast %510 : vector<1x64x32xbf16> to vector<64x32xbf16>
    %512 = arith.truncf %509 : vector<16x64xf32> to vector<16x64xbf16>
    %cst_216 = arith.constant dense<0.000000e+00> : vector<16x32xf32>
    %513 = tpu.matmul %512, %511, %cst_216 {dimension_numbers = #tpu.dot_dimension_numbers<[1], [0], [0], [1], [0, 0, 1, 1], [], []>} : vector<16x64xbf16>, vector<64x32xbf16>, vector<16x32xf32> -> vector<16x32xf32>
    %c1_217 = arith.constant 1 : index
    %c0_218 = arith.constant 0 : index
    %c0_219 = arith.constant 0 : index
    %514 = vector.load %arg14[%c1_217, %c0_218, %c0_219] : memref<2x1x32xf32, #tpu.memory_space<vmem>>, vector<1x1x32xf32>
    %515 = vector.shape_cast %514 : vector<1x1x32xf32> to vector<1x32xf32>
    %516 = vector.broadcast %515 : vector<1x32xf32> to vector<16x32xf32>
    %517 = arith.addf %513, %516 : vector<16x32xf32>
    %518 = arith.addf %517, %488 : vector<16x32xf32>
    %c1_220 = arith.constant 1 : index
    %c0_221 = arith.constant 0 : index
    %c0_222 = arith.constant 0 : index
    %519 = vector.load %arg15[%c1_220, %c0_221, %c0_222] : memref<2x1x32xf32, #tpu.memory_space<vmem>>, vector<1x1x32xf32>
    %520 = vector.shape_cast %519 : vector<1x1x32xf32> to vector<1x32xf32>
    %c1_223 = arith.constant 1 : index
    %c0_224 = arith.constant 0 : index
    %c0_225 = arith.constant 0 : index
    %521 = vector.load %arg16[%c1_223, %c0_224, %c0_225] : memref<2x1x32xf32, #tpu.memory_space<vmem>>, vector<1x1x32xf32>
    %522 = vector.shape_cast %521 : vector<1x1x32xf32> to vector<1x32xf32>
    %cst_226 = arith.constant dense<0.000000e+00> : vector<16xf32>
    %523 = vector.multi_reduction <add>, %518, %cst_226 [1] : vector<16x32xf32> to vector<16xf32>
    %524 = vector.shape_cast %523 : vector<16xf32> to vector<16x1xf32>
    %cst_227 = arith.constant 3.200000e+01 : f32
    %525 = vector.broadcast %cst_227 : f32 to vector<16x1xf32>
    %526 = arith.divf %524, %525 : vector<16x1xf32>
    %527 = vector.broadcast %526 : vector<16x1xf32> to vector<16x32xf32>
    %528 = arith.subf %518, %527 : vector<16x32xf32>
    %529 = arith.mulf %528, %528 : vector<16x32xf32>
    %cst_228 = arith.constant dense<0.000000e+00> : vector<16xf32>
    %530 = vector.multi_reduction <add>, %529, %cst_228 [1] : vector<16x32xf32> to vector<16xf32>
    %531 = vector.shape_cast %530 : vector<16xf32> to vector<16x1xf32>
    %cst_229 = arith.constant 3.200000e+01 : f32
    %532 = vector.broadcast %cst_229 : f32 to vector<16x1xf32>
    %533 = arith.divf %531, %532 : vector<16x1xf32>
    %534 = vector.broadcast %526 : vector<16x1xf32> to vector<16x32xf32>
    %535 = arith.subf %518, %534 : vector<16x32xf32>
    %cst_230 = arith.constant 9.99999996E-13 : f32
    %536 = vector.broadcast %cst_230 : f32 to vector<16x1xf32>
    %537 = arith.addf %533, %536 : vector<16x1xf32>
    %538 = math.rsqrt %537 : vector<16x1xf32>
    %539 = vector.broadcast %538 : vector<16x1xf32> to vector<16x32xf32>
    %540 = arith.mulf %535, %539 : vector<16x32xf32>
    %541 = vector.broadcast %520 : vector<1x32xf32> to vector<16x32xf32>
    %542 = arith.mulf %540, %541 : vector<16x32xf32>
    %543 = vector.broadcast %522 : vector<1x32xf32> to vector<16x32xf32>
    %544 = arith.addf %542, %543 : vector<16x32xf32>
    %c2 = arith.constant 2 : index
    %c0_231 = arith.constant 0 : index
    %c0_232 = arith.constant 0 : index
    %545 = vector.load %arg17[%c2, %c0_231, %c0_232] : memref<3x16x32xf32, #tpu.memory_space<vmem>>, vector<1x16x32xf32>
    %546 = vector.shape_cast %545 : vector<1x16x32xf32> to vector<16x32xf32>
    %547 = vector.shape_cast %544 : vector<16x32xf32> to vector<1x16x32xf32>
    tpu.vector_store %arg17[%c2, %c0_231, %c0_232], %547 {strides = array<i32>} : memref<3x16x32xf32, #tpu.memory_space<vmem>>, vector<1x16x32xf32>,
    return
  }
  func.func @transform_0(%arg0: i32) -> (i32, i32) {
    %c0_i32 = arith.constant 0 : i32
    %c0_i32_0 = arith.constant 0 : i32
    %c0_i32_1 = arith.constant 0 : i32
    return %c0_i32, %c0_i32_0 : i32, i32
  }
  func.func @transform_1(%arg0: i32) -> (i32, i32, i32) {
    %c0_i32 = arith.constant 0 : i32
    %c0_i32_0 = arith.constant 0 : i32
    %c0_i32_1 = arith.constant 0 : i32
    %c0_i32_2 = arith.constant 0 : i32
    return %c0_i32, %c0_i32_0, %c0_i32_1 : i32, i32, i32
  }
  func.func @transform_2(%arg0: i32) -> (i32, i32) {
    %c0_i32 = arith.constant 0 : i32
    %c0_i32_0 = arith.constant 0 : i32
    %c0_i32_1 = arith.constant 0 : i32
    return %c0_i32, %c0_i32_0 : i32, i32
  }
  func.func @transform_3(%arg0: i32) -> (i32, i32) {
    %c0_i32 = arith.constant 0 : i32
    %c0_i32_0 = arith.constant 0 : i32
    %c0_i32_1 = arith.constant 0 : i32
    return %c0_i32, %c0_i32_0 : i32, i32
  }
  func.func @transform_4(%arg0: i32) -> (i32, i32, i32) {
    %c0_i32 = arith.constant 0 : i32
    %c0_i32_0 = arith.constant 0 : i32
    %c0_i32_1 = arith.constant 0 : i32
    %c0_i32_2 = arith.constant 0 : i32
    return %c0_i32, %c0_i32_0, %c0_i32_1 : i32, i32, i32
  }
  func.func @transform_5(%arg0: i32) -> (i32, i32, i32) {
    %c0_i32 = arith.constant 0 : i32
    %c0_i32_0 = arith.constant 0 : i32
    %c0_i32_1 = arith.constant 0 : i32
    %c0_i32_2 = arith.constant 0 : i32
    return %c0_i32, %c0_i32_0, %c0_i32_1 : i32, i32, i32
  }
  func.func @transform_6(%arg0: i32) -> (i32, i32, i32) {
    %c0_i32 = arith.constant 0 : i32
    %c0_i32_0 = arith.constant 0 : i32
    %c0_i32_1 = arith.constant 0 : i32
    %c0_i32_2 = arith.constant 0 : i32
    return %c0_i32, %c0_i32_0, %c0_i32_1 : i32, i32, i32
  }
  func.func @transform_7(%arg0: i32) -> (i32, i32, i32) {
    %c0_i32 = arith.constant 0 : i32
    %c0_i32_0 = arith.constant 0 : i32
    %c0_i32_1 = arith.constant 0 : i32
    %c0_i32_2 = arith.constant 0 : i32
    return %c0_i32, %c0_i32_0, %c0_i32_1 : i32, i32, i32
  }
  func.func @transform_8(%arg0: i32) -> (i32, i32, i32) {
    %c0_i32 = arith.constant 0 : i32
    %c0_i32_0 = arith.constant 0 : i32
    %c0_i32_1 = arith.constant 0 : i32
    %c0_i32_2 = arith.constant 0 : i32
    return %c0_i32, %c0_i32_0, %c0_i32_1 : i32, i32, i32
  }
  func.func @transform_9(%arg0: i32) -> (i32, i32, i32) {
    %c0_i32 = arith.constant 0 : i32
    %c0_i32_0 = arith.constant 0 : i32
    %c0_i32_1 = arith.constant 0 : i32
    %c0_i32_2 = arith.constant 0 : i32
    return %c0_i32, %c0_i32_0, %c0_i32_1 : i32, i32, i32
  }
  func.func @transform_10(%arg0: i32) -> (i32, i32, i32) {
    %c0_i32 = arith.constant 0 : i32
    %c0_i32_0 = arith.constant 0 : i32
    %c0_i32_1 = arith.constant 0 : i32
    %c0_i32_2 = arith.constant 0 : i32
    return %c0_i32, %c0_i32_0, %c0_i32_1 : i32, i32, i32
  }
  func.func @transform_11(%arg0: i32) -> (i32, i32, i32) {
    %c0_i32 = arith.constant 0 : i32
    %c0_i32_0 = arith.constant 0 : i32
    %c0_i32_1 = arith.constant 0 : i32
    %c0_i32_2 = arith.constant 0 : i32
    return %c0_i32, %c0_i32_0, %c0_i32_1 : i32, i32, i32
  }
  func.func @transform_12(%arg0: i32) -> (i32, i32, i32) {
    %c0_i32 = arith.constant 0 : i32
    %c0_i32_0 = arith.constant 0 : i32
    %c0_i32_1 = arith.constant 0 : i32
    %c0_i32_2 = arith.constant 0 : i32
    return %c0_i32, %c0_i32_0, %c0_i32_1 : i32, i32, i32
  }
  func.func @transform_13(%arg0: i32) -> (i32, i32, i32) {
    %c0_i32 = arith.constant 0 : i32
    %c0_i32_0 = arith.constant 0 : i32
    %c0_i32_1 = arith.constant 0 : i32
    %c0_i32_2 = arith.constant 0 : i32
    return %c0_i32, %c0_i32_0, %c0_i32_1 : i32, i32, i32
  }
  func.func @transform_14(%arg0: i32) -> (i32, i32, i32) {
    %c0_i32 = arith.constant 0 : i32
    %c0_i32_0 = arith.constant 0 : i32
    %c0_i32_1 = arith.constant 0 : i32
    %c0_i32_2 = arith.constant 0 : i32
    return %c0_i32, %c0_i32_0, %c0_i32_1 : i32, i32, i32
  }
  func.func @transform_15(%arg0: i32) -> (i32, i32, i32) {
    %c0_i32 = arith.constant 0 : i32
    %c0_i32_0 = arith.constant 0 : i32
    %c0_i32_1 = arith.constant 0 : i32
    %c0_i32_2 = arith.constant 0 : i32
    return %c0_i32, %c0_i32_0, %c0_i32_1 : i32, i32, i32
  }
  func.func @transform_16(%arg0: i32) -> (i32, i32, i32) {
    %c0_i32 = arith.constant 0 : i32
    %c0_i32_0 = arith.constant 0 : i32
    %c0_i32_1 = arith.constant 0 : i32
    %c0_i32_2 = arith.constant 0 : i32
    return %c0_i32, %c0_i32_0, %c0_i32_1 : i32, i32, i32
  }
}

</mosaic_0001>

<bundles_post_ra>
// kernel: bert_forward.1
= control target key start
LH: loop header
LB: loop body
LE: loop exit
PB: predicated region body
PF: predicated region fallthrough
CT: control target
= control target key end

     0   :  { %vm58_vm0 = vcmask 261120   ;;  %v2256_v4 = vmov 32.0   ;;  %s2258_s24 = smov 120   ;;  %s2259_s25 = smov 96   ;;  %vm171_vm8 = vcmask 64512   ;;  %vm221_vm9 = vcmask 1043456   ;;  %s2931_s0 = inlined_call_operand.vmem [shape: f32[16,32], index: 0, kind: input, shape index: {}]   ;;  %s2932_s2 = inlined_call_operand.vmem [shape: f32[1,32], index: 2, kind: input, shape index: {}]   ;;  %s2933_s3 = inlined_call_operand.vmem [shape: f32[1,32], index: 3, kind: input, shape index: {}]   ;;  %s2934_s5 = inlined_call_operand.vmem [shape: f32[2,1,96], index: 5, kind: input, shape index: {}]   ;;  %s2935_s4 = inlined_call_operand.vmem [shape: bf16[2,32,96], index: 4, kind: input, shape index: {}]   ;;  %s2936_s16 = inlined_call_operand.vmem [shape: f32[3,16,32], index: 16, kind: output, shape index: {}]   ;;  %s2937_s1 = inlined_call_operand.vmem [shape: f32[2,1,8], index: 1, kind: input, shape index: {}]   ;;  %s2938_s7 = inlined_call_operand.vmem [shape: f32[2,1,32], index: 7, kind: input, shape index: {}]   ;;  %s2939_s6 = inlined_call_operand.vmem [shape: bf16[2,32,32], index: 6, kind: input, shape index: {}]   ;;  %s2940_s8 = inlined_call_operand.vmem [shape: f32[2,1,32], index: 8, kind: input, shape index: {}]   ;;  %s2941_s9 = inlined_call_operand.vmem [shape: f32[2,1,32], index: 9, kind: input, shape index: {}]   ;;  %s2942_s11 = inlined_call_operand.vmem [shape: f32[2,1,64], index: 11, kind: input, shape index: {}]   ;;  %s2943_s10 = inlined_call_operand.vmem [shape: bf16[2,32,64], index: 10, kind: input, shape index: {}]   ;;  %s2944_s13 = inlined_call_operand.vmem [shape: f32[2,1,32], index: 13, kind: input, shape index: {}]   ;;  %s2945_s12 = inlined_call_operand.vmem [shape: bf16[2,64,32], index: 12, kind: input, shape index: {}]   ;;  %s2946_s14 = inlined_call_operand.vmem [shape: f32[2,1,32], index: 14, kind: input, shape index: {}]   ;;  %s2947_s15 = inlined_call_operand.vmem [shape: f32[2,1,32], index: 15, kind: input, shape index: {}]  }
   0x1   :  { %2961 = sst [smem:[#allocation3_spill]] %s2931_s0  ;;  %2162 = vrcp.f32 %v2256_v4  ;;  %v2106_v21 = vld [vmem:[%s2935_s4 + $0x8] sm:$0xff]  ;;  %v2105_v23 = vld [vmem:[%s2935_s4] sm:$0xff]  ;;  %s2260_s26 = smov 112  }
   0x2   :  { %s2962_s23 = sld [smem:[#allocation3_spill]]  ;;  %152 = vmatpush.bf16.msra.mxu0 %v2106_v21  ;;  %v2140_v37 = vld [vmem:[%s2932_s2] ss:$0 sm:$0xff]  ;;  %s2261_s27 = smov 88  }
   0x3   :  { %v2141_v41 = vld [vmem:[%s2933_s3] ss:$0 sm:$0xff]  ;;  %s2262_s28 = smov 80   ;;  %s2263_s29 = smov 104  }
   0x4   :  { %v2142_v52 = vld [vmem:[%s2934_s5] ss:$0 sm:$0xff]  ;;  %s2959_s17 = smov 64   ;;  %s2957_s18 = smov 56  }
   0x5   :  { %s2955_s3 = smov 48   ;;  %s2267_s20 = smov 40  }
   0x6   :  { %153 = vmatpush.bf16.msra.mxu0 %v2105_v23  ;;  %s2949_s21 = smov 16   ;;  %s2953_s22 = smov 8  }
   0x7   :  { %v2163_v5 = vpop.eup %2162  ;;  %s2951_s30 = smov 24  }
   0x8   :  { %v54_v0 = vld [vmem:[%s2962_s23] sm:$0xff]  ;;  %v55_v2 = vld [vmem:[%s2962_s23 + $0x8] sm:$0xff]  ;;  %v66_v6 = vmul.f32 32.0, %v2163_v5  ;;  %vm70_vm1 = vweird.f32 %v2163_v5  ;;  %s2257_s23 = smov 72  }
   0x9   :  { %v59_v1 = vsel %vm58_vm0, %v54_v0, 0.0  ;;  %v62_v3 = vsel %vm58_vm0, %v55_v2, 0.0 }
   0xa   :  { %60 = vadd.xlane.f32.xlu0 %v59_v1  ;;  %v67_v7 = vsub.f32 1.0, %v66_v6 }
   0xc   :  { %v68_v8 = vmul.f32 %v2163_v5, %v67_v7 }
   0xe   :  { %v69_v9 = vadd.f32 %v2163_v5, %v68_v8 }
  0x10   :  { %v2364_v10 = vsel %vm70_vm1, %v2163_v5, %v69_v9 }
  0x12   :  { %63 = vadd.xlane.f32.xlu0 %v62_v3 }
  0x7d   :  { %v61_v11 = vpop.xlane.xlu0 %60 }
  0x7e   :  { %v72_v12 = vmul.f32 %v2364_v10, %v61_v11 }
  0x80   :  { %v74_v13 = vsub.f32 %v54_v0, %v72_v12 }
  0x82   :  { %v76_v14 = vmul.f32 %v74_v13, %v74_v13 }
  0x84   :  { %v78_v15 = vsel %vm58_vm0, %v76_v14, 0.0 }
  0x85   :  { %79 = vadd.xlane.f32.xlu1 %v78_v15  ;;  %v64_v16 = vpop.xlane.xlu0 %63 }
  0x86   :  { %v73_v17 = vmul.f32 %v2364_v10, %v64_v16 }
  0x88   :  { %v75_v18 = vsub.f32 %v55_v2, %v73_v17 }
  0x8a   :  { %v77_v19 = vmul.f32 %v75_v18, %v75_v18 }
  0x8c   :  { %v81_v20 = vsel %vm58_vm0, %v77_v19, 0.0 }
  0x8d   :  { %82 = vadd.xlane.f32.xlu1 %v81_v20 }
  0xf8   :  { %v80_v22 = vpop.xlane.xlu1 %79 }
  0xf9   :  { %v84_v24 = vmul.f32 %v80_v22, %v2364_v10  ;;  %v2143_v22 = vld [vmem:[%s2937_s1] ss:$0 sm:$0xff] }
  0xfb   :  { %v86_v25 = vadd.f32 1e-12, %v84_v24 }
  0xfd   :  { %2164 = vrsqrt.f32 %v86_v25  ;;  %vm94_vm3 = vweird.f32 %v86_v25 }
 0x100   :  { %v83_v26 = vpop.xlane.xlu1 %82 }
 0x101   :  { %v85_v27 = vmul.f32 %v83_v26, %v2364_v10 }
 0x103   :  { %v2165_v28 = vpop.eup %2164  ;;  %v87_v29 = vadd.f32 1e-12, %v85_v27 }
 0x104   :  { %v89_v30 = vmul.f32 %v2165_v28, %v86_v25  ;;  %vm95_vm2 = vweird.f32 %v2165_v28 }
 0x105   :  { %2166 = vrsqrt.f32 %v87_v29  ;;  %vm96_vm4 = vmor %vm94_vm3, %vm95_vm2  ;;  %vm104_vm6 = vweird.f32 %v87_v29 }
 0x106   :  { %v90_v31 = vmul.f32 %v2165_v28, %v89_v30 }
 0x108   :  { %v91_v32 = vmul.f32 0.5, %v90_v31 }
 0x10a   :  { %v92_v33 = vsub.f32 1.5, %v91_v32 }
 0x10b   :  { %v2167_v34 = vpop.eup %2166 }
 0x10c   :  { %v93_v35 = vmul.f32 %v2165_v28, %v92_v33  ;;  %v99_v36 = vmul.f32 %v2167_v34, %v87_v29  ;;  %vm105_vm5 = vweird.f32 %v2167_v34 }
 0x10d   :  { %vm106_vm7 = vmor %vm104_vm6, %vm105_vm5 }
 0x10e   :  { %v97_v38 = vsel %vm96_vm4, %v2165_v28, %v93_v35  ;;  %v100_v39 = vmul.f32 %v2167_v34, %v99_v36 }
 0x10f   :  { %v108_v40 = vmul.f32 %v97_v38, %v74_v13 }
 0x110   :  { %v101_v42 = vmul.f32 0.5, %v100_v39 }
 0x111   :  { %v113_v43 = vmul.f32 %v2140_v37, %v108_v40 }
 0x112   :  { %v102_v44 = vsub.f32 1.5, %v101_v42 }
 0x113   :  { %v2384_v45 = vadd.f32 %v2141_v41, %v113_v43 }
 0x114   :  { %v103_v46 = vmul.f32 %v2167_v34, %v102_v44 }
 0x115   :  { %120 = vst.msk [vmem:[%s2936_s16] sm:$0xff] %vm58_vm0, %v2384_v45 }
 0x116   :  { %v107_v47 = vsel %vm106_vm7, %v2167_v34, %v103_v46 }
 0x117   :  { %v109_v48 = vmul.f32 %v107_v47, %v75_v18 }
 0x119   :  { %v114_v49 = vmul.f32 %v2140_v37, %v109_v48  ;;  %v2144_v48 = vld [vmem:[%s2937_s1 + $0x1] ss:$0 sm:$0xff] }
 0x11b   :  { %v2391_v50 = vadd.f32 %v2141_v41, %v114_v49 }
 0x11d   :  { %121 = vst.msk [vmem:[%s2936_s16 + $0x8] sm:$0xff] %vm58_vm0, %v2391_v50  ;;  %v126_v51 = vpack.c.bf16 %v2391_v50, %v2384_v45 }
 0x11f   :  { %1959 = vmatmul.msk.bf16.vlgmr.msra.gmra.mxu0 %vm58_vm0, %v126_v51 }
 0x19c   :  { %v155_v53 = vpop.f32.mrf.mxu0 }
 0x19d   :  { %v156_v54 = vadd.f32 %v2142_v52, %v155_v53 }
 0x19f   :  { %v160_v55 = vpack.c.bf16 %v156_v54, %v156_v54 }
 0x1a1   :  { %v167_v56 = vunpack.c.l.b16 %v160_v55 }
 0x1a3   :  { %v2404_v57 = vpack.c.b16 %v167_v56, %v167_v56 }
 0x1a4   :  { %v157_v58 = vpop.f32.mrf.mxu0 }
 0x1a5   :  { %v158_v59 = vadd.f32 %v2142_v52, %v157_v58  ;;  %391 = vrot.lane.b32.xlu1 %v2404_v57, %s2257_s23  ;;  %239 = vrot.lane.b32.xlu0 %v2404_v57, %s2258_s24 }
 0x1a6   :  { %169 = vrot.lane.b32.xlu2 %v2404_v57, %s2259_s25 }
 0x1a7   :  { %v161_v60 = vpack.c.bf16 %v158_v59, %v158_v59 }
 0x1a9   :  { %v470_v61 = vunpack.c.l.b16 %v161_v60 }
 0x1ab   :  { %v2412_v62 = vpack.c.b16 %v470_v61, %v470_v61 }
 0x1ad   :  { %472 = vrot.lane.b32.xlu1 %v2412_v62, %s2259_s25  ;;  %314 = vrot.lane.b32.xlu0 %v2404_v57, %s2260_s26 }
 0x1ae   :  { %241 = vrot.lane.b32.xlu2 %v2404_v57, %s2261_s27 }
 0x1b5   :  { %616 = vrot.lane.b32.xlu1 %v2412_v62, %s2262_s28  ;;  %690 = vrot.lane.b32.xlu0 %v2412_v62, %s2257_s23 }
 0x1b6   :  { %389 = vrot.lane.b32.xlu2 %v2404_v57, %s2263_s29 }
 0x1bd   :  { %614 = vrot.lane.b32.xlu0 %v2412_v62, %s2260_s26 }
 0x1be   :  { %316 = vrot.lane.b32.xlu2 %v2404_v57, %s2262_s28 }
 0x1c6   :  { %542 = vrot.lane.b32.xlu2 %v2412_v62, %s2261_s27 }
 0x1ce   :  { %540 = vrot.lane.b32.xlu2 %v2412_v62, %s2258_s24 }
 0x1d6   :  { %688 = vrot.lane.b32.xlu2 %v2412_v62, %s2263_s29 }
 0x200   :  { %v170_v63 = vpop.permute.xlu2 %169 }
 0x201   :  { %v176_v0 = vsel %vm171_vm8, %v170_v63, 0 }
 0x202   :  { %185 = vmatpush.bf16.xpose.msra.mxu1 %v176_v0 }
 0x208   :  { %v242_v1 = vpop.permute.xlu2 %241 }
 0x209   :  { %1960 = vmatmul.msk.bf16.vlgmr.msra.gmra.mxu1 %vm171_vm8, %v160_v55  ;;  %v247_v2 = vsel %vm171_vm8, %v242_v1, 0 }
 0x20a   :  { %256 = vmatpush.bf16.xpose.msra.mxu3 %v247_v2 }
 0x210   :  { %v390_v3 = vpop.permute.xlu2 %389 }
 0x217   :  { %v392_v4 = vpop.permute.xlu1 %391  ;;  %v240_v5 = vpop.permute.xlu0 %239 }
 0x218   :  { %v317_v6 = vpop.permute.xlu2 %316  ;;  %1962 = vmatmul.msk.bf16.vlgmr.msra.gmra.mxu3 %vm171_vm8, %v240_v5  ;;  %v397_v7 = vsel %vm171_vm8, %v392_v4, 0 }
 0x219   :  { %v322_v8 = vsel %vm171_vm8, %v317_v6, 0  ;;  %406 = vmatpush.bf16.xpose.msrb.mxu3 %v397_v7 }
 0x21a   :  { %331 = vmatpush.bf16.xpose.msrb.mxu0 %v322_v8 }
 0x21f   :  { %v473_v9 = vpop.permute.xlu1 %472  ;;  %v315_v11 = vpop.permute.xlu0 %314 }
 0x220   :  { %v478_v12 = vsel %vm171_vm8, %v473_v9, 0  ;;  %v543_v13 = vpop.permute.xlu2 %542 }
 0x221   :  { %v548_v14 = vsel %vm171_vm8, %v543_v13, 0  ;;  %1964 = vmatmul.msk.bf16.vlgmr.msrb.gmra.mxu0 %vm171_vm8, %v315_v11 }
 0x222   :  { %487 = vmatpush.bf16.xpose.msra.mxu0 %v478_v12  ;;  %557 = vmatpush.bf16.xpose.msra.mxu3 %v548_v14 }
 0x227   :  { %v617_v15 = vpop.permute.xlu1 %616  ;;  %v691_v16 = vpop.permute.xlu0 %690 }
 0x228   :  { %v622_v17 = vsel %vm171_vm8, %v617_v15, 0  ;;  %v696_v18 = vsel %vm171_vm8, %v691_v16, 0  ;;  %1966 = vmatmul.msk.bf16.vlgmr.msrb.gmra.mxu3 %vm171_vm8, %v390_v3  ;;  %v541_v19 = vpop.permute.xlu2 %540 }
 0x22a   :  { %631 = vmatpush.bf16.xpose.msrb.mxu0 %v622_v17  ;;  %705 = vmatpush.bf16.xpose.msrb.mxu3 %v696_v18 }
 0x22f   :  { %v615_v20 = vpop.permute.xlu0 %614 }
 0x230   :  { %v689_v21 = vpop.permute.xlu2 %688 }
 0x231   :  { %1969 = vmatmul.msk.bf16.vlgmr.msra.gmra.mxu0 %vm171_vm8, %v161_v60 }
 0x238   :  { %1971 = vmatmul.msk.bf16.vlgmr.msra.gmra.mxu3 %vm171_vm8, %v541_v19 }
 0x241   :  { %1973 = vmatmul.msk.bf16.vlgmr.msrb.gmra.mxu0 %vm171_vm8, %v615_v20 }
 0x248   :  { %1975 = vmatmul.msk.bf16.vlgmr.msrb.gmra.mxu3 %vm171_vm8, %v689_v21 }
 0x286   :  { %v187_v23 = vpop.f32.mrf.mxu1 }
 0x287   :  { %v188_v24 = vadd.f32 %v2143_v22, %v187_v23 }
 0x289   :  { %v191_v25 = vsel %vm171_vm8, %v188_v24, -inf }
 0x28a   :  { %192 = vmax.xlane.f32.xlu2 %v191_v25 }
 0x28e   :  { %v189_v26 = vpop.f32.mrf.mxu1 }
 0x29b   :  { %v258_v27 = vpop.f32.mrf.mxu3 }
 0x29c   :  { %v259_v28 = vadd.f32 %v2143_v22, %v258_v27 }
 0x29e   :  { %v333_v29 = vpop.f32.mrf.mxu0  ;;  %v262_v30 = vsel %vm171_vm8, %v259_v28, -inf }
 0x29f   :  { %v334_v31 = vadd.f32 %v2143_v22, %v333_v29  ;;  %263 = vmax.xlane.f32.xlu1 %v262_v30 }
 0x2a1   :  { %v337_v32 = vsel %vm171_vm8, %v334_v31, -inf }
 0x2a2   :  { %338 = vmax.xlane.f32.xlu2 %v337_v32 }
 0x2a3   :  { %v260_v33 = vpop.f32.mrf.mxu3 }
 0x2a6   :  { %v335_v34 = vpop.f32.mrf.mxu0 }
 0x2ab   :  { %v408_v35 = vpop.f32.mrf.mxu3 }
 0x2ac   :  { %v2458_v36 = vadd.f32 %v2143_v22, %v408_v35 }
 0x2ae   :  { %v489_v37 = vpop.f32.mrf.mxu0  ;;  %v412_v38 = vsel %vm171_vm8, %v2458_v36, -inf }
 0x2af   :  { %413 = vmax.xlane.f32.xlu0 %v412_v38  ;;  %v490_v51 = vadd.f32 %v2144_v48, %v489_v37 }
 0x2b1   :  { %v493_v53 = vsel %vm171_vm8, %v490_v51, -inf }
 0x2b3   :  { %v410_v39 = vpop.f32.mrf.mxu3 }
 0x2b6   :  { %v491_v40 = vpop.f32.mrf.mxu0 }
 0x2b8   :  { %216 = vrot.lane.b32.xlu1 %v2404_v57, %s2959_s17 }
 0x2ba   :  { %287 = vrot.lane.b32.xlu2 %v2404_v57, %s2957_s18 }
 0x2bb   :  { %v559_v41 = vpop.f32.mrf.mxu3 }
 0x2bc   :  { %v2469_v49 = vadd.f32 %v2144_v48, %v559_v41 }
 0x2be   :  { %v633_v42 = vpop.f32.mrf.mxu0  ;;  %v563_v52 = vsel %vm171_vm8, %v2469_v49, -inf }
 0x2bf   :  { %v634_v55 = vadd.f32 %v2144_v48, %v633_v42 }
 0x2c1   :  { %v637_v58 = vsel %vm171_vm8, %v634_v55, -inf }
 0x2c3   :  { %v561_v43 = vpop.f32.mrf.mxu3 }
 0x2c6   :  { %v635_v44 = vpop.f32.mrf.mxu0 }
 0x2cb   :  { %v707_v46 = vpop.f32.mrf.mxu3 }
 0x2cc   :  { %v708_v54 = vadd.f32 %v2144_v48, %v707_v46 }
 0x2ce   :  { %v711_v56 = vsel %vm171_vm8, %v708_v54, -inf }
 0x2d3   :  { %v709_v47 = vpop.f32.mrf.mxu3 }
 0x2e2   :  { %564 = vmax.xlane.f32.xlu1 %v563_v52 }
 0x2e3   :  { %494 = vmax.xlane.f32.xlu2 %v493_v53 }
 0x2ea   :  { %712 = vmax.xlane.f32.xlu1 %v711_v56 }
 0x2eb   :  { %638 = vmax.xlane.f32.xlu2 %v637_v58 }
 0x2fd   :  { %v193_v59 = vpop.xlane.xlu2 %192 }
 0x2fe   :  { %v194_v60 = vsub.f32 %v188_v24, %v193_v59 }
 0x300   :  { %v195_v61 = vmul.f32 1.442695, %v194_v60 }
 0x302   :  { %2168 = vpow2.f32 %v195_v61 }
 0x303   :  { %362 = vrot.lane.b32.xlu2 %v2404_v57, %s2955_s3  ;;  %437 = vrot.lane.b32.xlu1 %v2404_v57, %s2267_s20 }
 0x308   :  { %v2480_v63 = vpop.eup %2168 }
 0x309   :  { %v197_v0 = vsel %vm171_vm8, %v2480_v63, 0.0 }
 0x30a   :  { %198 = vadd.xlane.f32.xlu0 %v197_v0 }
 0x312   :  { %v264_v1 = vpop.xlane.xlu1 %263 }
 0x313   :  { %v265_v4 = vsub.f32 %v259_v28, %v264_v1 }
 0x315   :  { %v339_v2 = vpop.xlane.xlu2 %338  ;;  %v266_v6 = vmul.f32 1.442695, %v265_v4 }
 0x316   :  { %v340_v3 = vsub.f32 %v334_v31, %v339_v2 }
 0x318   :  { %v341_v5 = vmul.f32 1.442695, %v340_v3 }
 0x31a   :  { %2170 = vpow2.f32 %v341_v5 }
 0x31b   :  { %2172 = vpow2.f32 %v266_v6 }
 0x31d   :  { %v288_v9 = vpop.permute.xlu2 %287 }
 0x31e   :  { %v293_v14 = vsel %vm221_vm9, %v288_v9, 0 }
 0x320   :  { %v2484_v7 = vpop.eup %2170 }
 0x321   :  { %v343_v8 = vsel %vm171_vm8, %v2484_v7, 0.0  ;;  %v2488_v57 = vpop.eup %2172 }
 0x322   :  { %344 = vadd.xlane.f32.xlu0 %v343_v8  ;;  %v268_v11 = vsel %vm171_vm8, %v2488_v57, 0.0  ;;  %v414_v16 = vpop.xlane.xlu0 %413 }
 0x323   :  { %v415_v19 = vsub.f32 %v2458_v36, %v414_v16 }
 0x325   :  { %v416_v21 = vmul.f32 1.442695, %v415_v19 }
 0x32a   :  { %269 = vadd.xlane.f32.xlu0 %v268_v11  ;;  %v217_v12 = vpop.permute.xlu1 %216 }
 0x32b   :  { %v223_v13 = vsel %vm221_vm9, %v217_v12, 0 }
 0x32c   :  { %232 = vmatpush.bf16.msra.mxu2 %v223_v13 }
 0x330   :  { %302 = vmatpush.bf16.msrb.mxu2 %v293_v14 }
 0x355   :  { %v565_v15 = vpop.xlane.xlu1 %564 }
 0x356   :  { %v495_v17 = vpop.xlane.xlu2 %494  ;;  %v566_v28 = vsub.f32 %v2469_v49, %v565_v15 }
 0x357   :  { %v496_v18 = vsub.f32 %v490_v51, %v495_v17 }
 0x358   :  { %v567_v31 = vmul.f32 1.442695, %v566_v28 }
 0x359   :  { %v497_v20 = vmul.f32 1.442695, %v496_v18 }
 0x35b   :  { %2174 = vpow2.f32 %v497_v20 }
 0x35c   :  { %2176 = vpow2.f32 %v416_v21 }
 0x35d   :  { %v713_v22 = vpop.xlane.xlu1 %712 }
 0x35e   :  { %v714_v23 = vsub.f32 %v708_v54, %v713_v22  ;;  %v639_v24 = vpop.xlane.xlu2 %638 }
 0x35f   :  { %v640_v25 = vsub.f32 %v634_v55, %v639_v24 }
 0x360   :  { %v715_v26 = vmul.f32 1.442695, %v714_v23 }
 0x361   :  { %v2495_v27 = vpop.eup %2174  ;;  %v641_v29 = vmul.f32 1.442695, %v640_v25 }
 0x362   :  { %2178 = vpow2.f32 %v715_v26  ;;  %v499_v30 = vsel %vm171_vm8, %v2495_v27, 0.0  ;;  %v2500_v33 = vpop.eup %2176 }
 0x363   :  { %2180 = vpow2.f32 %v641_v29  ;;  %500 = vadd.xlane.f32.xlu0 %v499_v30  ;;  %v418_v38 = vsel %vm171_vm8, %v2500_v33, 0.0 }
 0x364   :  { %2182 = vpow2.f32 %v567_v31 }
 0x366   :  { %v363_v32 = vpop.permute.xlu2 %362 }
 0x367   :  { %v368_v34 = vsel %vm221_vm9, %v363_v32, 0 }
 0x368   :  { %v2503_v35 = vpop.eup %2178  ;;  %377 = vmatpush.bf16.msrb.mxu1 %v368_v34 }
 0x369   :  { %v2505_v36 = vpop.eup %2180  ;;  %v717_v37 = vsel %vm171_vm8, %v2503_v35, 0.0 }
 0x36a   :  { %718 = vadd.xlane.f32.xlu1 %v717_v37  ;;  %v643_v39 = vsel %vm171_vm8, %v2505_v36, 0.0  ;;  %v2513_v40 = vpop.eup %2182 }
 0x36b   :  { %419 = vadd.xlane.f32.xlu0 %v418_v38  ;;  %644 = vadd.xlane.f32.xlu2 %v643_v39  ;;  %v569_v41 = vsel %vm171_vm8, %v2513_v40, 0.0 }
 0x373   :  { %570 = vadd.xlane.f32.xlu0 %v569_v41 }
 0x375   :  { %v438_v56 = vpop.permute.xlu1 %437 }
 0x376   :  { %v443_v59 = vsel %vm221_vm9, %v438_v56, 0 }
 0x37d   :  { %v199_v42 = vpop.xlane.xlu0 %198 }
 0x37e   :  { %2184 = vrcp.f32 %v199_v42  ;;  %v211_v47 = vand.u32 2147483648, %v199_v42  ;;  %v209_v49 = vand.u32 2147483647, %v199_v42  ;;  %vm205_vm11 = vweird.f32 %v199_v42 }
 0x380   :  { %v212_v52 = vor.u32 1.1754944e-38, %v211_v47  ;;  %vm210_vm13 = vcmp.eq.f32.partialorder %v209_v49, 8.507059e+37 }
 0x384   :  { %v2185_v43 = vpop.eup %2184 }
 0x385   :  { %v201_v44 = vmul.f32 %v2185_v43, %v199_v42  ;;  %vm206_vm10 = vweird.f32 %v2185_v43 }
 0x386   :  { %vm207_vm12 = vmor %vm205_vm11, %vm206_vm10 }
 0x387   :  { %v202_v46 = vsub.f32 1.0, %v201_v44  ;;  %588 = vrot.lane.b32.xlu0 %v2412_v62, %s2957_s18 }
 0x389   :  { %v203_v48 = vmul.f32 %v2185_v43, %v202_v46 }
 0x38b   :  { %v204_v51 = vadd.f32 %v2185_v43, %v203_v48 }
 0x38d   :  { %v208_v53 = vsel %vm207_vm12, %v2185_v43, %v204_v51 }
 0x38e   :  { %v213_v54 = vsel %vm210_vm13, %v212_v52, %v208_v53 }
 0x38f   :  { %518 = vrot.lane.b32.xlu0 %v2412_v62, %s2959_s17  ;;  %v214_v55 = vmul.f32 %v2480_v63, %v213_v54 }
 0x391   :  { %v215_v58 = vpack.c.bf16 %v214_v55, %v214_v55 }
 0x393   :  { %1961 = vmatmul.msk.bf16.vlgmr.msra.gmra.mxu2 %vm171_vm8, %v215_v58 }
 0x394   :  { %452 = vmatpush.bf16.msra.mxu2 %v443_v59 }
 0x395   :  { %v345_v60 = vpop.xlane.xlu0 %344 }
 0x396   :  { %2186 = vrcp.f32 %v345_v60  ;;  %v357_v63 = vand.u32 2147483648, %v345_v60  ;;  %v355_v4 = vand.u32 2147483647, %v345_v60  ;;  %vm351_vm15 = vweird.f32 %v345_v60 }
 0x397   :  { %736 = vrot.lane.b32.xlu0 %v2412_v62, %s2267_s20 }
 0x398   :  { %v358_v8 = vor.u32 1.1754944e-38, %v357_v63  ;;  %vm356_vm2 = vcmp.eq.f32.partialorder %v355_v4, 8.507059e+37 }
 0x39c   :  { %v2187_v61 = vpop.eup %2186 }
 0x39d   :  { %v347_v0 = vmul.f32 %v2187_v61, %v345_v60  ;;  %v270_v1 = vpop.xlane.xlu0 %269  ;;  %vm352_vm14 = vweird.f32 %v2187_v61 }
 0x39e   :  { %2188 = vrcp.f32 %v270_v1  ;;  %vm353_vm1 = vmor %vm351_vm15, %vm352_vm14  ;;  %v282_v15 = vand.u32 2147483648, %v270_v1  ;;  %vm276_vm4 = vweird.f32 %v270_v1 }
 0x39f   :  { %v348_v2 = vsub.f32 1.0, %v347_v0  ;;  %662 = vrot.lane.b32.xlu0 %v2412_v62, %s2955_s3  ;;  %v280_v62 = vand.u32 2147483647, %v270_v1 }
 0x3a0   :  { %v283_v19 = vor.u32 1.1754944e-38, %v282_v15 }
 0x3a1   :  { %v349_v3 = vmul.f32 %v2187_v61, %v348_v2  ;;  %vm281_vm6 = vcmp.eq.f32.partialorder %v280_v62, 8.507059e+37 }
 0x3a3   :  { %v350_v5 = vadd.f32 %v2187_v61, %v349_v3 }
 0x3a4   :  { %v2189_v6 = vpop.eup %2188 }
 0x3a5   :  { %v272_v9 = vmul.f32 %v2189_v6, %v270_v1  ;;  %v354_v11 = vsel %vm353_vm1, %v2187_v61, %v350_v5  ;;  %vm277_vm3 = vweird.f32 %v2189_v6 }
 0x3a6   :  { %v359_v12 = vsel %vm356_vm2, %v358_v8, %v354_v11  ;;  %vm278_vm5 = vmor %vm276_vm4, %vm277_vm3 }
 0x3a7   :  { %v273_v13 = vsub.f32 1.0, %v272_v9  ;;  %v360_v14 = vmul.f32 %v2484_v7, %v359_v12 }
 0x3a9   :  { %v274_v16 = vmul.f32 %v2189_v6, %v273_v13  ;;  %v361_v17 = vpack.c.bf16 %v360_v14, %v360_v14 }
 0x3ab   :  { %v275_v18 = vadd.f32 %v2189_v6, %v274_v16  ;;  %1965 = vmatmul.msk.bf16.vlgmr.msrb.gmra.mxu1 %vm171_vm8, %v361_v17 }
 0x3ad   :  { %v279_v20 = vsel %vm278_vm5, %v2189_v6, %v275_v18 }
 0x3ae   :  { %v284_v21 = vsel %vm281_vm6, %v283_v19, %v279_v20 }
 0x3af   :  { %v285_v22 = vmul.f32 %v2488_v57, %v284_v21 }
 0x3b1   :  { %v286_v23 = vpack.c.bf16 %v285_v22, %v285_v22 }
 0x3b3   :  { %1963 = vmatmul.msk.bf16.vlgmr.msrb.gmra.mxu2 %vm171_vm8, %v286_v23 }
 0x3d6   :  { %v501_v7 = vpop.xlane.xlu0 %500 }
 0x3d7   :  { %v513_v61 = vand.u32 2147483648, %v501_v7  ;;  %vm507_vm2 = vweird.f32 %v501_v7 }
 0x3d9   :  { %v514_v6 = vor.u32 1.1754944e-38, %v513_v61  ;;  %v2107_v61 = vld [vmem:[%s2939_s6] sm:$0xff] }
 0x3dd   :  { %v2532_v38 = vpop.xlane.xlu1 %718 }
 0x3de   :  { %v420_v24 = vpop.xlane.xlu0 %419  ;;  %v2534_v44 = vpop.xlane.xlu2 %644  ;;  %v731_v21 = vand.u32 2147483648, %v2532_v38 }
 0x3df   :  { %2190 = vrcp.f32 %v420_v24  ;;  %v432_v31 = vand.u32 2147483648, %v420_v24  ;;  %v430_v37 = vand.u32 2147483647, %v420_v24  ;;  %vm426_vm10 = vweird.f32 %v420_v24 }
 0x3e0   :  { %2192 = vrcp.f32 %v501_v7 }
 0x3e1   :  { %v433_v39 = vor.u32 1.1754944e-38, %v432_v31  ;;  %vm431_vm12 = vcmp.eq.f32.partialorder %v430_v37, 8.507059e+37 }
 0x3e5   :  { %v2191_v25 = vpop.eup %2190 }
 0x3e6   :  { %v422_v26 = vmul.f32 %v2191_v25, %v420_v24  ;;  %v571_v28 = vpop.xlane.xlu0 %570  ;;  %v2193_v29 = vpop.eup %2192  ;;  %vm427_vm7 = vweird.f32 %v2191_v25  ;;  %v732_v24 = vor.u32 1.1754944e-38, %v731_v21 }
 0x3e7   :  { %2194 = vrcp.f32 %v571_v28  ;;  %v503_v32 = vmul.f32 %v2193_v29, %v501_v7  ;;  %vm428_vm11 = vmor %vm426_vm10, %vm427_vm7  ;;  %v583_v56 = vand.u32 2147483648, %v571_v28  ;;  %vm508_vm14 = vweird.f32 %v2193_v29 }
 0x3e8   :  { %v423_v30 = vsub.f32 1.0, %v422_v26  ;;  %2196 = vrcp.f32 %v2532_v38  ;;  %vm577_vm15 = vweird.f32 %v571_v28  ;;  %v581_v59 = vand.u32 2147483647, %v571_v28  ;;  %vm509_vm3 = vmor %vm507_vm2, %vm508_vm14 }
 0x3e9   :  { %v504_v42 = vsub.f32 1.0, %v503_v32  ;;  %2198 = vrcp.f32 %v2534_v44  ;;  %v584_v2 = vor.u32 1.1754944e-38, %v583_v56  ;;  %vm725_vm7 = vweird.f32 %v2532_v38 }
 0x3ea   :  { %v424_v34 = vmul.f32 %v2191_v25, %v423_v30  ;;  %vm582_vm4 = vcmp.eq.f32.partialorder %v581_v59, 8.507059e+37  ;;  %vm387_vm2 = vcmask 195712  }
 0x3eb   :  { %v505_v51 = vmul.f32 %v2193_v29, %v504_v42 }
 0x3ec   :  { %v425_v57 = vadd.f32 %v2191_v25, %v424_v34 }
 0x3ed   :  { %v2195_v41 = vpop.eup %2194  ;;  %v506_v58 = vadd.f32 %v2193_v29, %v505_v51 }
 0x3ee   :  { %v429_v43 = vsel %vm428_vm11, %v2191_v25, %v425_v57  ;;  %v573_v47 = vmul.f32 %v2195_v41, %v571_v28  ;;  %vm578_vm13 = vweird.f32 %v2195_v41  ;;  %v2197_v54 = vpop.eup %2196 }
 0x3ef   :  { %v434_v46 = vsel %vm431_vm12, %v433_v39, %v429_v43  ;;  %v2199_v60 = vpop.eup %2198  ;;  %vm579_vm1 = vmor %vm577_vm15, %vm578_vm13  ;;  %v721_v0 = vmul.f32 %v2197_v54, %v2532_v38  ;;  %v510_v3 = vsel %vm509_vm3, %v2193_v29, %v506_v58  ;;  %vm726_vm6 = vweird.f32 %v2197_v54 }
 0x3f0   :  { %v435_v48 = vmul.f32 %v2500_v33, %v434_v46  ;;  %v574_v49 = vsub.f32 1.0, %v573_v47  ;;  %v511_v33 = vand.u32 2147483647, %v501_v7  ;;  %v647_v4 = vmul.f32 %v2199_v60, %v2534_v44  ;;  %vm727_vm11 = vmor %vm725_vm7, %vm726_vm6 }
 0x3f1   :  { %v722_v9 = vsub.f32 1.0, %v721_v0  ;;  %vm652_vm10 = vweird.f32 %v2199_v60  ;;  %vm651_vm12 = vweird.f32 %v2534_v44  ;;  %v655_v7 = vand.u32 2147483647, %v2534_v44 }
 0x3f2   :  { %v436_v52 = vpack.c.bf16 %v435_v48, %v435_v48  ;;  %v575_v53 = vmul.f32 %v2195_v41, %v574_v49  ;;  %vm512_vm5 = vcmp.eq.f32.partialorder %v511_v33, 8.507059e+37  ;;  %v648_v12 = vsub.f32 1.0, %v647_v4  ;;  %vm653_vm13 = vmor %vm651_vm12, %vm652_vm10 }
 0x3f3   :  { %v515_v11 = vsel %vm512_vm5, %v514_v6, %v510_v3  ;;  %v723_v15 = vmul.f32 %v2197_v54, %v722_v9  ;;  %vm656_vm15 = vcmp.eq.f32.partialorder %v655_v7, 8.507059e+37  ;;  %vm462_vm3 = vcmask 261312  }
 0x3f4   :  { %1967 = vmatmul.msk.bf16.vlgmr.msra.gmra.mxu2 %vm171_vm8, %v436_v52  ;;  %v576_v55 = vadd.f32 %v2195_v41, %v575_v53  ;;  %v516_v14 = vmul.f32 %v2495_v27, %v515_v11  ;;  %v649_v62 = vmul.f32 %v2199_v60, %v648_v12  ;;  %v657_v27 = vand.u32 2147483648, %v2534_v44 }
 0x3f5   :  { %v724_v19 = vadd.f32 %v2197_v54, %v723_v15  ;;  %vm953_vm12 = vcmask 523264  }
 0x3f6   :  { %v580_v1 = vsel %vm579_vm1, %v2195_v41, %v576_v55  ;;  %v517_v20 = vpack.c.bf16 %v516_v14, %v516_v14  ;;  %v650_v22 = vadd.f32 %v2199_v60, %v649_v62  ;;  %v658_v30 = vor.u32 1.1754944e-38, %v657_v27 }
 0x3f7   :  { %v585_v8 = vsel %vm582_vm4, %v584_v2, %v580_v1  ;;  %v728_v23 = vsel %vm727_vm11, %v2197_v54, %v724_v19  ;;  %vm312_vm1 = vcmask 130112  }
 0x3f8   :  { %v586_v13 = vmul.f32 %v2513_v40, %v585_v8  ;;  %v729_v40 = vand.u32 2147483647, %v2532_v38  ;;  %v654_v26 = vsel %vm653_vm13, %v2199_v60, %v650_v22  ;;  %v2108_v60 = vld [vmem:[%s2939_s6 + $0x8] sm:$0xff] }
 0x3f9   :  { %v589_v63 = vpop.permute.xlu0 %588  ;;  %v659_v31 = vsel %vm656_vm15, %v658_v30, %v654_v26  ;;  %794 = vmatpush.bf16.msra.mxu0 %v2108_v60 }
 0x3fa   :  { %v594_v5 = vsel %vm221_vm9, %v589_v63, 0  ;;  %v587_v18 = vpack.c.bf16 %v586_v13, %v586_v13  ;;  %vm730_vm14 = vcmp.eq.f32.partialorder %v729_v40, 8.507059e+37  ;;  %v660_v34 = vmul.f32 %v2505_v36, %v659_v31 }
 0x3fb   :  { %603 = vmatpush.bf16.msrb.mxu2 %v594_v5  ;;  %v733_v29 = vsel %vm730_vm14, %v732_v24, %v728_v23  ;;  %v2145_v5 = vld [vmem:[%s2938_s7] ss:$0 sm:$0xff]  ;;  %v2110_v23 = vld [vmem:[%s2943_s10 + $0x8] sm:$0xff] }
 0x3fc   :  { %v734_v32 = vmul.f32 %v2503_v35, %v733_v29  ;;  %v661_v39 = vpack.c.bf16 %v660_v34, %v660_v34  ;;  %v2109_v24 = vld [vmem:[%s2943_s10] sm:$0xff] }
 0x3fd   :  { %795 = vmatpush.bf16.msra.mxu0 %v2107_v61 }
 0x3fe   :  { %v735_v57 = vpack.c.bf16 %v734_v32, %v734_v32 }
 0x401   :  { %v519_v16 = vpop.permute.xlu0 %518 }
 0x402   :  { %v524_v17 = vsel %vm221_vm9, %v519_v16, 0 }
 0x403   :  { %533 = vmatpush.bf16.msra.mxu1 %v524_v17 }
 0x404   :  { %1972 = vmatmul.msk.bf16.vlgmr.msrb.gmra.mxu2 %vm171_vm8, %v587_v18 }
 0x406   :  { %1970 = vmatmul.msk.bf16.vlgmr.msra.gmra.mxu1 %vm171_vm8, %v517_v20 }
 0x409   :  { %v737_v25 = vpop.permute.xlu0 %736 }
 0x40a   :  { %v742_v28 = vsel %vm221_vm9, %v737_v25, 0 }
 0x40b   :  { %751 = vmatpush.bf16.msra.mxu2 %v742_v28 }
 0x411   :  { %v663_v37 = vpop.permute.xlu0 %662 }
 0x412   :  { %v668_v38 = vsel %vm221_vm9, %v663_v37, 0 }
 0x413   :  { %677 = vmatpush.bf16.msrb.mxu1 %v668_v38 }
 0x414   :  { %1976 = vmatmul.msk.bf16.vlgmr.msra.gmra.mxu2 %vm171_vm8, %v735_v57 }
 0x416   :  { %v234_v41 = vpop.f32.mrf.mxu2  ;;  %1974 = vmatmul.msk.bf16.vlgmr.msrb.gmra.mxu1 %vm171_vm8, %v661_v39 }
 0x417   :  { %238 = vst.msk [vmem:[#allocation2] sm:$0xff] %vm171_vm8, %v234_v41  ;;  %890 = vmatpush.bf16.msra.mxu1 %v2110_v23 }
 0x41b   :  { %891 = vmatpush.bf16.msra.mxu1 %v2109_v24 }
 0x41e   :  { %v236_v42 = vpop.f32.mrf.mxu2 }
 0x428   :  { %v379_v43 = vpop.f32.mrf.mxu1 }
 0x429   :  { %384 = vrot.lane.b32.xlu2 %v379_v43, %s2949_s21 }
 0x430   :  { %v381_v35 = vpop.f32.mrf.mxu1 }
 0x431   :  { %v2146_v35 = vld [vmem:[%s2940_s8] ss:$0 sm:$0xff] }
 0x436   :  { %v304_v36 = vpop.f32.mrf.mxu2 }
 0x437   :  { %309 = vrot.lane.b32.xlu1 %v304_v36, %s2953_s22 }
 0x43e   :  { %v306_v44 = vpop.f32.mrf.mxu2 }
 0x477   :  { %v454_v46 = vpop.f32.mrf.mxu2 }
 0x47f   :  { %v456_v47 = vpop.f32.mrf.mxu2 }
 0x480   :  { %v2147_v47 = vld [vmem:[%s2941_s9] ss:$0 sm:$0xff] }
 0x483   :  { %v535_v48 = vpop.f32.mrf.mxu1  ;;  %v385_v59 = vpop.permute.xlu2 %384 }
 0x484   :  { %539 = vst.msk [vmem:[#allocation2 + $0x8] sm:$0xff] %vm171_vm8, %v535_v48 }
 0x487   :  { %v605_v49 = vpop.f32.mrf.mxu2 }
 0x48b   :  { %v537_v51 = vpop.f32.mrf.mxu1 }
 0x48f   :  { %v607_v52 = vpop.f32.mrf.mxu2 }
 0x493   :  { %v679_v53 = vpop.f32.mrf.mxu1 }
 0x494   :  { %684 = vrot.lane.b32.xlu0 %v679_v53, %s2949_s21 }
 0x497   :  { %v753_v54 = vpop.f32.mrf.mxu2 }
 0x498   :  { %758 = vrot.lane.b32.xlu1 %v753_v54, %s2951_s30 }
 0x49b   :  { %v681_v55 = vpop.f32.mrf.mxu1 }
 0x49c   :  { %610 = vrot.lane.b32.xlu0 %v605_v49, %s2953_s22  ;;  %v2114_v55 = vld [vmem:[%s2945_s12 + $0x18] sm:$0xff] }
 0x49d   :  { %961 = vmatpush.bf16.msra.mxu3 %v2114_v55  ;;  %v2150_v55 = vld [vmem:[%s2946_s14] ss:$0 sm:$0xff] }
 0x49f   :  { %v755_v56 = vpop.f32.mrf.mxu2 }
 0x4a0   :  { %v2113_v56 = vld [vmem:[%s2945_s12 + $0x10] sm:$0xff] }
 0x4a1   :  { %962 = vmatpush.bf16.msra.mxu3 %v2113_v56 }
 0x4a4   :  { %459 = vrot.lane.b32.xlu0 %v454_v46, %s2951_s30 }
 0x4a9   :  { %v310_v58 = vpop.permute.xlu1 %309 }
 0x4aa   :  { %313 = vst.msk [vmem:[#allocation2] sm:$0xff] %vm312_vm1, %v310_v58  ;;  %v2148_v58 = vld [vmem:[%s2942_s11] ss:$0 sm:$0xff] }
 0x4ab   :  { %388 = vst.msk [vmem:[#allocation2] sm:$0xff] %vm387_vm2, %v385_v59  ;;  %v2112_v59 = vld [vmem:[%s2945_s12 + $0x8] sm:$0xff] }
 0x4ac   :  { %963 = vmatpush.bf16.msra.mxu3 %v2112_v59  ;;  %v2151_v59 = vld [vmem:[%s2947_s15] ss:$0 sm:$0xff] }
 0x506   :  { %v685_v33 = vpop.permute.xlu0 %684 }
 0x50a   :  { %v759_v1 = vpop.permute.xlu1 %758 }
 0x50e   :  { %v611_v0 = vpop.permute.xlu0 %610 }
 0x50f   :  { %613 = vst.msk [vmem:[#allocation2 + $0x8] sm:$0xff] %vm312_vm1, %v611_v0 }
 0x510   :  { %687 = vst.msk [vmem:[#allocation2 + $0x8] sm:$0xff] %vm387_vm2, %v685_v33  ;;  %v2111_v33 = vld [vmem:[%s2945_s12] sm:$0xff] }
 0x511   :  { %761 = vst.msk [vmem:[#allocation2 + $0x8] sm:$0xff] %vm462_vm3, %v759_v1  ;;  %964 = vmatpush.bf16.msra.mxu3 %v2111_v33 }
 0x516   :  { %v460_v2 = vpop.permute.xlu0 %459 }
 0x517   :  { %463 = vst.msk [vmem:[#allocation2] sm:$0xff] %vm462_vm3, %v460_v2 }
 0x518   :  { %v763_v3 = vld [vmem:[#allocation2 + $0x8] sm:$0xff] }
 0x51e   :  { %v762_v63 = vld [vmem:[#allocation2] sm:$0xff] }
 0x51f   :  { %v768_v4 = vpack.c.bf16 %v763_v3, %v762_v63 }
 0x521   :  { %1985 = vmatmul.msk.bf16.vlgmr.msra.gmra.mxu0 %vm58_vm0, %v768_v4 }
 0x59e   :  { %v797_v6 = vpop.f32.mrf.mxu0 }
 0x59f   :  { %v798_v8 = vadd.f32 %v2145_v5, %v797_v6 }
 0x5a1   :  { %v802_v9 = vadd.f32 %v798_v8, %v2384_v45 }
 0x5a3   :  { %v806_v11 = vsel %vm58_vm0, %v802_v9, 0.0 }
 0x5a4   :  { %807 = vadd.xlane.f32.xlu0 %v806_v11 }
 0x5a6   :  { %v799_v12 = vpop.f32.mrf.mxu0 }
 0x5a7   :  { %v800_v13 = vadd.f32 %v2145_v5, %v799_v12 }
 0x5a9   :  { %v803_v14 = vadd.f32 %v800_v13, %v2391_v50 }
 0x5ab   :  { %v809_v15 = vsel %vm58_vm0, %v803_v14, 0.0 }
 0x5ac   :  { %810 = vadd.xlane.f32.xlu2 %v809_v15 }
 0x617   :  { %v808_v16 = vpop.xlane.xlu0 %807 }
 0x618   :  { %v812_v62 = vmul.f32 %v808_v16, %v2364_v10 }
 0x61a   :  { %v814_v17 = vsub.f32 %v802_v9, %v812_v62 }
 0x61c   :  { %v816_v18 = vmul.f32 %v814_v17, %v814_v17 }
 0x61e   :  { %v818_v19 = vsel %vm58_vm0, %v816_v18, 0.0 }
 0x61f   :  { %v811_v20 = vpop.xlane.xlu2 %810  ;;  %819 = vadd.xlane.f32.xlu1 %v818_v19 }
 0x620   :  { %v813_v45 = vmul.f32 %v811_v20, %v2364_v10 }
 0x622   :  { %v815_v21 = vsub.f32 %v803_v14, %v813_v45  ;;  %v2149_v45 = vld [vmem:[%s2944_s13] ss:$0 sm:$0xff] }
 0x624   :  { %v817_v40 = vmul.f32 %v815_v21, %v815_v21 }
 0x626   :  { %v821_v22 = vsel %vm58_vm0, %v817_v40, 0.0 }
 0x627   :  { %822 = vadd.xlane.f32.xlu2 %v821_v22 }
 0x692   :  { %v820_v50 = vpop.xlane.xlu1 %819 }
 0x693   :  { %v824_v27 = vmul.f32 %v820_v50, %v2364_v10 }
 0x695   :  { %v826_v7 = vadd.f32 1e-12, %v824_v27 }
 0x697   :  { %2200 = vrsqrt.f32 %v826_v7  ;;  %vm834_vm5 = vweird.f32 %v826_v7 }
 0x69a   :  { %v823_v25 = vpop.xlane.xlu2 %822 }
 0x69b   :  { %v825_v26 = vmul.f32 %v823_v25, %v2364_v10 }
 0x69d   :  { %v2201_v28 = vpop.eup %2200  ;;  %v827_v29 = vadd.f32 1e-12, %v825_v26 }
 0x69e   :  { %v829_v30 = vmul.f32 %v2201_v28, %v826_v7  ;;  %vm835_vm4 = vweird.f32 %v2201_v28 }
 0x69f   :  { %2202 = vrsqrt.f32 %v827_v29  ;;  %vm836_vm6 = vmor %vm834_vm5, %vm835_vm4  ;;  %vm844_vm10 = vweird.f32 %v827_v29 }
 0x6a0   :  { %v830_v31 = vmul.f32 %v2201_v28, %v829_v30 }
 0x6a2   :  { %v831_v32 = vmul.f32 0.5, %v830_v31 }
 0x6a4   :  { %v832_v34 = vsub.f32 1.5, %v831_v32 }
 0x6a5   :  { %v2203_v37 = vpop.eup %2202 }
 0x6a6   :  { %v833_v38 = vmul.f32 %v2201_v28, %v832_v34  ;;  %v839_v57 = vmul.f32 %v2203_v37, %v827_v29  ;;  %vm845_vm7 = vweird.f32 %v2203_v37 }
 0x6a7   :  { %vm846_vm11 = vmor %vm844_vm10, %vm845_vm7 }
 0x6a8   :  { %v840_v39 = vmul.f32 %v2203_v37, %v839_v57  ;;  %v837_v41 = vsel %vm836_vm6, %v2201_v28, %v833_v38 }
 0x6a9   :  { %v848_v36 = vmul.f32 %v837_v41, %v814_v17  ;;  %v2116_v41 = vld [vmem:[%s2935_s4 + $0x18] sm:$0xff] }
 0x6aa   :  { %v841_v42 = vmul.f32 0.5, %v840_v39  ;;  %1064 = vmatpush.bf16.msrb.mxu2 %v2116_v41 }
 0x6ab   :  { %v853_v48 = vmul.f32 %v2146_v35, %v848_v36 }
 0x6ac   :  { %v842_v43 = vsub.f32 1.5, %v841_v42 }
 0x6ad   :  { %v858_v52 = vadd.f32 %v2147_v47, %v853_v48 }
 0x6ae   :  { %v843_v44 = vmul.f32 %v2203_v37, %v842_v43  ;;  %v2115_v43 = vld [vmem:[%s2935_s4 + $0x10] sm:$0xff] }
 0x6af   :  { %1065 = vmatpush.bf16.msrb.mxu2 %v2115_v43 }
 0x6b0   :  { %v847_v46 = vsel %vm846_vm11, %v2203_v37, %v843_v44 }
 0x6b1   :  { %v849_v49 = vmul.f32 %v847_v46, %v815_v21 }
 0x6b3   :  { %v854_v51 = vmul.f32 %v2146_v35, %v849_v49 }
 0x6b5   :  { %v859_v53 = vadd.f32 %v2147_v47, %v854_v51 }
 0x6b7   :  { %v864_v54 = vpack.c.bf16 %v859_v53, %v858_v52 }
 0x6b9   :  { %1994 = vmatmul.msk.bf16.vlgmr.msra.gmra.mxu1 %vm58_vm0, %v864_v54 }
 0x736   :  { %v893_v60 = vpop.f32.mrf.mxu1 }
 0x737   :  { %v894_v61 = vadd.f32 %v2148_v58, %v893_v60 }
 0x739   :  { %v898_v0 = vmul.f32 %v894_v61, %v894_v61 }
 0x73b   :  { %v900_v1 = vmul.f32 %v898_v0, %v894_v61 }
 0x73d   :  { %v902_v2 = vmul.f32 0.044715, %v900_v1 }
 0x73e   :  { %v895_v63 = vpop.f32.mrf.mxu1 }
 0x73f   :  { %v904_v3 = vadd.f32 %v902_v2, %v894_v61  ;;  %v896_v4 = vadd.f32 %v2148_v58, %v895_v63 }
 0x741   :  { %v906_v5 = vmul.f32 0.7978846, %v904_v3  ;;  %v899_v6 = vmul.f32 %v896_v4, %v896_v4 }
 0x743   :  { %v901_v8 = vmul.f32 %v899_v6, %v896_v4  ;;  %2204 = vtanh.f32 %v906_v5 }
 0x745   :  { %v903_v9 = vmul.f32 0.044715, %v901_v8  ;;  %v2152_v8 = vld [vmem:[%s2934_s5 + $0x1] ss:$0 sm:$0xff] }
 0x747   :  { %v905_v11 = vadd.f32 %v903_v9, %v896_v4 }
 0x749   :  { %v907_v12 = vmul.f32 0.7978846, %v905_v11  ;;  %v2205_v13 = vpop.eup %2204 }
 0x74a   :  { %v910_v14 = vadd.f32 1.0, %v2205_v13 }
 0x74b   :  { %2206 = vtanh.f32 %v907_v12 }
 0x74c   :  { %v912_v16 = vmul.f32 0.5, %v910_v14 }
 0x74e   :  { %v914_v18 = vmul.f32 %v912_v16, %v894_v61 }
 0x751   :  { %v2207_v15 = vpop.eup %2206 }
 0x752   :  { %v911_v62 = vadd.f32 1.0, %v2207_v15 }
 0x754   :  { %v913_v17 = vmul.f32 0.5, %v911_v62 }
 0x756   :  { %v915_v19 = vmul.f32 %v913_v17, %v896_v4 }
 0x758   :  { %v924_v20 = vpack.c.bf16 %v915_v19, %v914_v18 }
 0x75a   :  { %2011 = vmatmul.msk.bf16.vlgmr.msra.gmra.mxu3 %vm953_vm12, %v924_v20 }
 0x7dd   :  { %v966_v21 = vpop.f32.mrf.mxu3 }
 0x7de   :  { %v967_v40 = vadd.f32 %v2149_v45, %v966_v21 }
 0x7e0   :  { %v971_v22 = vadd.f32 %v967_v40, %v858_v52 }
 0x7e2   :  { %v975_v50 = vsel %vm58_vm0, %v971_v22, 0.0 }
 0x7e3   :  { %976 = vadd.xlane.f32.xlu0 %v975_v50 }
 0x7e5   :  { %v968_v27 = vpop.f32.mrf.mxu3 }
 0x7e6   :  { %v969_v23 = vadd.f32 %v2149_v45, %v968_v27 }
 0x7e8   :  { %v972_v7 = vadd.f32 %v969_v23, %v859_v53 }
 0x7ea   :  { %v978_v24 = vsel %vm58_vm0, %v972_v7, 0.0 }
 0x7eb   :  { %979 = vadd.xlane.f32.xlu1 %v978_v24 }
 0x856   :  { %v977_v25 = vpop.xlane.xlu0 %976 }
 0x857   :  { %v981_v26 = vmul.f32 %v977_v25, %v2364_v10 }
 0x859   :  { %v983_v28 = vsub.f32 %v971_v22, %v981_v26 }
 0x85b   :  { %v985_v29 = vmul.f32 %v983_v28, %v983_v28 }
 0x85d   :  { %v987_v30 = vsel %vm58_vm0, %v985_v29, 0.0 }
 0x85e   :  { %v980_v31 = vpop.xlane.xlu1 %979  ;;  %988 = vadd.xlane.f32.xlu2 %v987_v30 }
 0x85f   :  { %v982_v32 = vmul.f32 %v980_v31, %v2364_v10 }
 0x861   :  { %v984_v34 = vsub.f32 %v972_v7, %v982_v32 }
 0x863   :  { %v986_v37 = vmul.f32 %v984_v34, %v984_v34 }
 0x865   :  { %v990_v38 = vsel %vm58_vm0, %v986_v37, 0.0 }
 0x866   :  { %991 = vadd.xlane.f32.xlu0 %v990_v38 }
 0x8d1   :  { %v989_v57 = vpop.xlane.xlu2 %988 }
 0x8d2   :  { %v993_v39 = vmul.f32 %v989_v57, %v2364_v10 }
 0x8d4   :  { %v995_v42 = vadd.f32 1e-12, %v993_v39  ;;  %v2153_v39 = vld [vmem:[%s2937_s1] ss:$0 sm:$0xff] }
 0x8d6   :  { %2208 = vrsqrt.f32 %v995_v42  ;;  %vm1003_vm14 = vweird.f32 %v995_v42 }
 0x8d9   :  { %v992_v35 = vpop.xlane.xlu0 %991 }
 0x8da   :  { %v994_v36 = vmul.f32 %v992_v35, %v2364_v10 }
 0x8dc   :  { %v2209_v44 = vpop.eup %2208  ;;  %v996_v46 = vadd.f32 1e-12, %v994_v36 }
 0x8dd   :  { %v998_v47 = vmul.f32 %v2209_v44, %v995_v42  ;;  %vm1004_vm13 = vweird.f32 %v2209_v44 }
 0x8de   :  { %2210 = vrsqrt.f32 %v996_v46  ;;  %vm1005_vm15 = vmor %vm1003_vm14, %vm1004_vm13  ;;  %vm1013_vm5 = vweird.f32 %v996_v46 }
 0x8df   :  { %v999_v48 = vmul.f32 %v2209_v44, %v998_v47 }
 0x8e1   :  { %v1000_v49 = vmul.f32 0.5, %v999_v48 }
 0x8e3   :  { %v1001_v51 = vsub.f32 1.5, %v1000_v49 }
 0x8e4   :  { %v2211_v52 = vpop.eup %2210 }
 0x8e5   :  { %v1002_v53 = vmul.f32 %v2209_v44, %v1001_v51  ;;  %v1008_v54 = vmul.f32 %v2211_v52, %v996_v46  ;;  %vm1014_vm4 = vweird.f32 %v2211_v52 }
 0x8e6   :  { %vm1015_vm6 = vmor %vm1013_vm5, %vm1014_vm4 }
 0x8e7   :  { %v1006_v56 = vsel %vm1005_vm15, %v2209_v44, %v1002_v53  ;;  %v1009_v58 = vmul.f32 %v2211_v52, %v1008_v54 }
 0x8e8   :  { %v1017_v60 = vmul.f32 %v1006_v56, %v983_v28  ;;  %v2154_v56 = vld [vmem:[%s2937_s1 + $0x1] ss:$0 sm:$0xff]  ;;  %s2963_s1 = smov 64  }
 0x8e9   :  { %v1010_v61 = vmul.f32 0.5, %v1009_v58 }
 0x8ea   :  { %v1022_v33 = vmul.f32 %v2150_v55, %v1017_v60 }
 0x8eb   :  { %v1011_v0 = vsub.f32 1.5, %v1010_v61 }
 0x8ec   :  { %v2646_v1 = vadd.f32 %v2151_v59, %v1022_v33 }
 0x8ed   :  { %v1012_v2 = vmul.f32 %v2211_v52, %v1011_v0 }
 0x8ee   :  { %2012 = vst.msk [vmem:[%s2936_s16 + $0x10] sm:$0xff] %vm58_vm0, %v2646_v1 }
 0x8ef   :  { %v1016_v63 = vsel %vm1015_vm6, %v2211_v52, %v1012_v2 }
 0x8f0   :  { %v1018_v3 = vmul.f32 %v1016_v63, %v984_v34 }
 0x8f2   :  { %v1023_v4 = vmul.f32 %v2150_v55, %v1018_v3 }
 0x8f4   :  { %v2653_v5 = vadd.f32 %v2151_v59, %v1023_v4 }
 0x8f6   :  { %2013 = vst.msk [vmem:[%s2936_s16 + $0x18] sm:$0xff] %vm58_vm0, %v2653_v5  ;;  %v1037_v6 = vpack.c.bf16 %v2653_v5, %v2646_v1 }
 0x8f8   :  { %2027 = vmatmul.msk.bf16.vlgmr.msrb.gmra.mxu2 %vm58_vm0, %v1037_v6 }
 0x97b   :  { %v1067_v9 = vpop.f32.mrf.mxu2 }
 0x97c   :  { %v1068_v11 = vadd.f32 %v2152_v8, %v1067_v9 }
 0x97e   :  { %v1072_v12 = vpack.c.bf16 %v1068_v11, %v1068_v11 }
 0x980   :  { %v1079_v13 = vunpack.c.l.b16 %v1072_v12 }
 0x982   :  { %v2666_v14 = vpack.c.b16 %v1079_v13, %v1079_v13 }
 0x983   :  { %v1069_v15 = vpop.f32.mrf.mxu2 }
 0x984   :  { %1081 = vrot.lane.b32.xlu0 %v2666_v14, %s2259_s25  ;;  %1149 = vrot.lane.b32.xlu2 %v2666_v14, %s2258_s24  ;;  %v1070_v16 = vadd.f32 %v2152_v8, %v1069_v15 }
 0x985   :  { %1151 = vrot.lane.b32.xlu1 %v2666_v14, %s2261_s27 }
 0x986   :  { %v1073_v62 = vpack.c.bf16 %v1070_v16, %v1070_v16 }
 0x988   :  { %v1376_v17 = vunpack.c.l.b16 %v1073_v62 }
 0x98a   :  { %v2680_v18 = vpack.c.b16 %v1376_v17, %v1376_v17 }
 0x98c   :  { %1299 = vrot.lane.b32.xlu0 %v2666_v14, %s2257_s23  ;;  %1225 = vrot.lane.b32.xlu2 %v2666_v14, %s2262_s28 }
 0x98d   :  { %1297 = vrot.lane.b32.xlu1 %v2666_v14, %s2263_s29 }
 0x994   :  { %1448 = vrot.lane.b32.xlu0 %v2680_v18, %s2261_s27  ;;  %1446 = vrot.lane.b32.xlu2 %v2680_v18, %s2258_s24  ;;  %s2965_s27 = smov 48  }
 0x995   :  { %1223 = vrot.lane.b32.xlu1 %v2666_v14, %s2260_s26 }
 0x99c   :  { %1378 = vrot.lane.b32.xlu0 %v2680_v18, %s2259_s25  ;;  %1594 = vrot.lane.b32.xlu2 %v2680_v18, %s2263_s29  ;;  %s2967_s29 = smov 16  }
 0x99d   :  { %1596 = vrot.lane.b32.xlu1 %v2680_v18, %s2257_s23 }
 0x9a4   :  { %1522 = vrot.lane.b32.xlu0 %v2680_v18, %s2262_s28  ;;  %s2966_s28 = smov 8  }
 0x9a5   :  { %1520 = vrot.lane.b32.xlu1 %v2680_v18, %s2260_s26  ;;  %s2964_s26 = smov 56  }
 0x9de   :  { %v1150_v19 = vpop.permute.xlu2 %1149 }
 0x9e6   :  { %v1226_v20 = vpop.permute.xlu2 %1225 }
 0x9e7   :  { %v1231_v22 = vsel %vm171_vm8, %v1226_v20, 0 }
 0x9ee   :  { %v1447_v37 = vpop.permute.xlu2 %1446 }
 0x9f6   :  { %v1082_v45 = vpop.permute.xlu0 %1081  ;;  %v1595_v57 = vpop.permute.xlu2 %1594 }
 0x9f7   :  { %v1087_v21 = vsel %vm171_vm8, %v1082_v45, 0  ;;  %v1152_v40 = vpop.permute.xlu1 %1151 }
 0x9f8   :  { %v1157_v50 = vsel %vm171_vm8, %v1152_v40, 0  ;;  %1096 = vmatpush.bf16.xpose.msrb.mxu0 %v1087_v21 }
 0x9f9   :  { %1166 = vmatpush.bf16.xpose.msrb.mxu3 %v1157_v50 }
 0x9fe   :  { %v1300_v27 = vpop.permute.xlu0 %1299 }
 0x9ff   :  { %v1305_v23 = vsel %vm171_vm8, %v1300_v27, 0  ;;  %v1298_v7 = vpop.permute.xlu1 %1297  ;;  %2028 = vmatmul.msk.bf16.vlgmr.msrb.gmra.mxu0 %vm171_vm8, %v1072_v12 }
 0xa00   :  { %1240 = vmatpush.bf16.xpose.msra.mxu0 %v1231_v22  ;;  %2030 = vmatmul.msk.bf16.vlgmr.msrb.gmra.mxu3 %vm171_vm8, %v1150_v19 }
 0xa01   :  { %1314 = vmatpush.bf16.xpose.msra.mxu3 %v1305_v23 }
 0xa06   :  { %v1449_v24 = vpop.permute.xlu0 %1448 }
 0xa07   :  { %v1454_v25 = vsel %vm171_vm8, %v1449_v24, 0  ;;  %v1224_v26 = vpop.permute.xlu1 %1223 }
 0xa09   :  { %1463 = vmatpush.bf16.xpose.msrb.mxu3 %v1454_v25 }
 0xa0e   :  { %v1379_v28 = vpop.permute.xlu0 %1378 }
 0xa0f   :  { %v1384_v29 = vsel %vm171_vm8, %v1379_v28, 0  ;;  %v1597_v30 = vpop.permute.xlu1 %1596  ;;  %2032 = vmatmul.msk.bf16.vlgmr.msra.gmra.mxu0 %vm171_vm8, %v1224_v26 }
 0xa10   :  { %v1602_v31 = vsel %vm171_vm8, %v1597_v30, 0  ;;  %2034 = vmatmul.msk.bf16.vlgmr.msra.gmra.mxu3 %vm171_vm8, %v1298_v7  ;;  %1393 = vmatpush.bf16.xpose.msrb.mxu0 %v1384_v29 }
 0xa11   :  { %1611 = vmatpush.bf16.xpose.msra.mxu3 %v1602_v31 }
 0xa16   :  { %v1523_v32 = vpop.permute.xlu0 %1522 }
 0xa17   :  { %v1528_v34 = vsel %vm171_vm8, %v1523_v32, 0  ;;  %v1521_v38 = vpop.permute.xlu1 %1520 }
 0xa18   :  { %1537 = vmatpush.bf16.xpose.msra.mxu0 %v1528_v34 }
 0xa1f   :  { %2037 = vmatmul.msk.bf16.vlgmr.msrb.gmra.mxu0 %vm171_vm8, %v1073_v62 }
 0xa20   :  { %2039 = vmatmul.msk.bf16.vlgmr.msrb.gmra.mxu3 %vm171_vm8, %v1447_v37 }
 0xa2f   :  { %2041 = vmatmul.msk.bf16.vlgmr.msra.gmra.mxu0 %vm171_vm8, %v1521_v38 }
 0xa30   :  { %2043 = vmatmul.msk.bf16.vlgmr.msra.gmra.mxu3 %vm171_vm8, %v1595_v57 }
 0xa7c   :  { %v1098_v41 = vpop.f32.mrf.mxu0 }
 0xa7d   :  { %v1099_v42 = vadd.f32 %v2153_v39, %v1098_v41 }
 0xa7f   :  { %v1102_v43 = vsel %vm171_vm8, %v1099_v42, -inf }
 0xa80   :  { %1103 = vmax.xlane.f32.xlu0 %v1102_v43 }
 0xa83   :  { %v1168_v35 = vpop.f32.mrf.mxu3 }
 0xa84   :  { %v1169_v36 = vadd.f32 %v2153_v39, %v1168_v35  ;;  %v1100_v44 = vpop.f32.mrf.mxu0 }
 0xa86   :  { %v1172_v46 = vsel %vm171_vm8, %v1169_v36, -inf }
 0xa87   :  { %1173 = vmax.xlane.f32.xlu2 %v1172_v46 }
 0xa8b   :  { %v1170_v47 = vpop.f32.mrf.mxu3 }
 0xa8c   :  { %v1242_v48 = vpop.f32.mrf.mxu0 }
 0xa8d   :  { %v2719_v49 = vadd.f32 %v2153_v39, %v1242_v48 }
 0xa8f   :  { %v1246_v51 = vsel %vm171_vm8, %v2719_v49, -inf }
 0xa90   :  { %1247 = vmax.xlane.f32.xlu2 %v1246_v51 }
 0xa93   :  { %v1316_v52 = vpop.f32.mrf.mxu3 }
 0xa94   :  { %v2723_v53 = vadd.f32 %v2153_v39, %v1316_v52  ;;  %v1244_v54 = vpop.f32.mrf.mxu0 }
 0xa96   :  { %v1320_v55 = vsel %vm171_vm8, %v2723_v53, -inf }
 0xa97   :  { %1321 = vmax.xlane.f32.xlu1 %v1320_v55 }
 0xa9b   :  { %v1318_v58 = vpop.f32.mrf.mxu3 }
 0xa9c   :  { %v1395_v59 = vpop.f32.mrf.mxu0 }
 0xa9d   :  { %v1396_v60 = vadd.f32 %v2154_v56, %v1395_v59 }
 0xa9f   :  { %v1399_v61 = vsel %vm171_vm8, %v1396_v60, -inf }
 0xaa0   :  { %1400 = vmax.xlane.f32.xlu1 %v1399_v61 }
 0xaa3   :  { %v1465_v33 = vpop.f32.mrf.mxu3 }
 0xaa4   :  { %v1466_v0 = vadd.f32 %v2154_v56, %v1465_v33  ;;  %v1397_v2 = vpop.f32.mrf.mxu0 }
 0xaa6   :  { %v1469_v63 = vsel %vm171_vm8, %v1466_v0, -inf }
 0xaa7   :  { %1470 = vmax.xlane.f32.xlu0 %v1469_v63 }
 0xaa8   :  { %1345 = vrot.lane.b32.xlu2 %v2666_v14, %s2267_s20 }
 0xaab   :  { %v1467_v3 = vpop.f32.mrf.mxu3 }
 0xaac   :  { %v1539_v4 = vpop.f32.mrf.mxu0 }
 0xaad   :  { %v1540_v6 = vadd.f32 %v2154_v56, %v1539_v4 }
 0xaaf   :  { %v1543_v8 = vsel %vm171_vm8, %v1540_v6, -inf }
 0xab0   :  { %1544 = vmax.xlane.f32.xlu1 %v1543_v8 }
 0xab3   :  { %v1613_v9 = vpop.f32.mrf.mxu3 }
 0xab4   :  { %v1541_v11 = vpop.f32.mrf.mxu0  ;;  %v1614_v13 = vadd.f32 %v2154_v56, %v1613_v9 }
 0xab6   :  { %v1617_v15 = vsel %vm171_vm8, %v1614_v13, -inf }
 0xabb   :  { %1127 = vrot.lane.b32.xlu0 %v2666_v14, %s2963_s1  ;;  %v1615_v12 = vpop.f32.mrf.mxu3 }
 0xac9   :  { %1197 = vrot.lane.b32.xlu1 %v2666_v14, %s2964_s26 }
 0xad1   :  { %1618 = vmax.xlane.f32.xlu2 %v1617_v15 }
 0xaf3   :  { %v1104_v16 = vpop.xlane.xlu0 %1103 }
 0xaf4   :  { %v1105_v62 = vsub.f32 %v1099_v42, %v1104_v16 }
 0xaf6   :  { %v1106_v17 = vmul.f32 1.442695, %v1105_v62 }
 0xaf8   :  { %2212 = vpow2.f32 %v1106_v17 }
 0xafa   :  { %v1174_v19 = vpop.xlane.xlu2 %1173 }
 0xafb   :  { %v1175_v20 = vsub.f32 %v1169_v36, %v1174_v19 }
 0xafd   :  { %v1176_v45 = vmul.f32 1.442695, %v1175_v20 }
 0xafe   :  { %v2740_v21 = vpop.eup %2212 }
 0xaff   :  { %2214 = vpow2.f32 %v1176_v45  ;;  %v1108_v40 = vsel %vm171_vm8, %v2740_v21, 0.0 }
 0xb00   :  { %1109 = vadd.xlane.f32.xlu2 %v1108_v40 }
 0xb03   :  { %v1248_v29 = vpop.xlane.xlu2 %1247 }
 0xb04   :  { %v1249_v32 = vsub.f32 %v2719_v49, %v1248_v29 }
 0xb05   :  { %v2744_v22 = vpop.eup %2214 }
 0xb06   :  { %v1178_v50 = vsel %vm171_vm8, %v2744_v22, 0.0  ;;  %v1250_v34 = vmul.f32 1.442695, %v1249_v32 }
 0xb07   :  { %1179 = vadd.xlane.f32.xlu0 %v1178_v50 }
 0xb0a   :  { %v1322_v27 = vpop.xlane.xlu1 %1321 }
 0xb0b   :  { %v1323_v37 = vsub.f32 %v2723_v53, %v1322_v27  ;;  %v1346_v39 = vpop.permute.xlu2 %1345 }
 0xb0c   :  { %v1351_v36 = vsel %vm221_vm9, %v1346_v39, 0 }
 0xb13   :  { %v1401_v23 = vpop.xlane.xlu1 %1400 }
 0xb14   :  { %v1402_v7 = vsub.f32 %v1396_v60, %v1401_v23 }
 0xb16   :  { %v1403_v24 = vmul.f32 1.442695, %v1402_v7 }
 0xb18   :  { %2216 = vpow2.f32 %v1403_v24  ;;  %1494 = vrot.lane.b32.xlu2 %v2680_v18, %s2964_s26 }
 0xb19   :  { %2218 = vpow2.f32 %v1250_v34 }
 0xb1a   :  { %v1471_v28 = vpop.xlane.xlu0 %1470 }
 0xb1b   :  { %1271 = vrot.lane.b32.xlu0 %v2666_v14, %s2965_s27  ;;  %v1324_v14 = vmul.f32 1.442695, %v1323_v37  ;;  %v1472_v57 = vsub.f32 %v1466_v0, %v1471_v28 }
 0xb1d   :  { %2220 = vpow2.f32 %v1324_v14  ;;  %v1473_v41 = vmul.f32 1.442695, %v1472_v57 }
 0xb1e   :  { %v2752_v25 = vpop.eup %2216 }
 0xb1f   :  { %v1405_v26 = vsel %vm171_vm8, %v2752_v25, 0.0  ;;  %v2762_v35 = vpop.eup %2218  ;;  %2222 = vpow2.f32 %v1473_v41 }
 0xb20   :  { %1406 = vadd.xlane.f32.xlu1 %v1405_v26  ;;  %v1252_v46 = vsel %vm171_vm8, %v2762_v35, 0.0 }
 0xb23   :  { %v1545_v38 = vpop.xlane.xlu1 %1544  ;;  %v2767_v47 = vpop.eup %2220 }
 0xb24   :  { %v1546_v44 = vsub.f32 %v1540_v6, %v1545_v38  ;;  %v1326_v51 = vsel %vm171_vm8, %v2767_v47, 0.0 }
 0xb25   :  { %v2771_v52 = vpop.eup %2222 }
 0xb26   :  { %v1547_v48 = vmul.f32 1.442695, %v1546_v44  ;;  %v1475_v55 = vsel %vm171_vm8, %v2771_v52, 0.0 }
 0xb28   :  { %2224 = vpow2.f32 %v1547_v48 }
 0xb2d   :  { %v1128_v30 = vpop.permute.xlu0 %1127 }
 0xb2e   :  { %v1133_v31 = vsel %vm221_vm9, %v1128_v30, 0  ;;  %v2775_v56 = vpop.eup %2224 }
 0xb2f   :  { %1142 = vmatpush.bf16.msrb.mxu1 %v1133_v31  ;;  %v1549_v60 = vsel %vm171_vm8, %v2775_v56, 0.0 }
 0xb39   :  { %1424 = vrot.lane.b32.xlu1 %v2680_v18, %s2963_s1 }
 0xb3b   :  { %v1198_v42 = vpop.permute.xlu1 %1197 }
 0xb3c   :  { %v1203_v43 = vsel %vm221_vm9, %v1198_v42, 0 }
 0xb3d   :  { %1212 = vmatpush.bf16.msra.mxu2 %v1203_v43 }
 0xb41   :  { %1360 = vmatpush.bf16.msrb.mxu2 %v1351_v36  ;;  %1253 = vadd.xlane.f32.xlu2 %v1252_v46 }
 0xb44   :  { %v1619_v49 = vpop.xlane.xlu2 %1618 }
 0xb45   :  { %v1620_v53 = vsub.f32 %v1614_v13, %v1619_v49  ;;  %1327 = vadd.xlane.f32.xlu0 %v1326_v51 }
 0xb47   :  { %v1621_v54 = vmul.f32 1.442695, %v1620_v53 }
 0xb49   :  { %2226 = vpow2.f32 %v1621_v54  ;;  %1476 = vadd.xlane.f32.xlu2 %v1475_v55 }
 0xb4f   :  { %v2777_v58 = vpop.eup %2226 }
 0xb50   :  { %v1623_v59 = vsel %vm171_vm8, %v2777_v58, 0.0 }
 0xb51   :  { %1624 = vadd.xlane.f32.xlu0 %v1623_v59  ;;  %1550 = vadd.xlane.f32.xlu2 %v1549_v60 }
 0xb65   :  { %1642 = vrot.lane.b32.xlu0 %v2680_v18, %s2267_s20  ;;  %s2968_s20 = smov 24  }
 0xb69   :  { %1568 = vrot.lane.b32.xlu2 %v2680_v18, %s2965_s27 }
 0xb73   :  { %v1110_v61 = vpop.xlane.xlu2 %1109 }
 0xb74   :  { %2228 = vrcp.f32 %v1110_v61  ;;  %v1122_v3 = vand.u32 2147483648, %v1110_v61  ;;  %v1120_v6 = vand.u32 2147483647, %v1110_v61  ;;  %vm1116_vm10 = vweird.f32 %v1110_v61 }
 0xb76   :  { %v1123_v11 = vor.u32 1.1754944e-38, %v1122_v3  ;;  %vm1121_vm13 = vcmp.eq.f32.partialorder %v1120_v6, 8.507059e+37 }
 0xb7a   :  { %v2229_v33 = vpop.eup %2228  ;;  %v1180_v0 = vpop.xlane.xlu0 %1179 }
 0xb7b   :  { %v1112_v2 = vmul.f32 %v2229_v33, %v1110_v61  ;;  %2230 = vrcp.f32 %v1180_v0  ;;  %vm1117_vm7 = vweird.f32 %v2229_v33  ;;  %v1192_v62 = vand.u32 2147483648, %v1180_v0  ;;  %v1495_v7 = vpop.permute.xlu2 %1494 }
 0xb7c   :  { %vm1118_vm11 = vmor %vm1116_vm10, %vm1117_vm7  ;;  %v1190_v19 = vand.u32 2147483647, %v1180_v0  ;;  %vm1186_vm15 = vweird.f32 %v1180_v0  ;;  %v1500_v28 = vsel %vm221_vm9, %v1495_v7, 0 }
 0xb7d   :  { %v1113_v63 = vsub.f32 1.0, %v1112_v2  ;;  %v1193_v40 = vor.u32 1.1754944e-38, %v1192_v62 }
 0xb7e   :  { %vm1191_vm5 = vcmp.eq.f32.partialorder %v1190_v19, 8.507059e+37 }
 0xb7f   :  { %v1114_v4 = vmul.f32 %v2229_v33, %v1113_v63 }
 0xb81   :  { %v2231_v8 = vpop.eup %2230  ;;  %v1115_v9 = vadd.f32 %v2229_v33, %v1114_v4 }
 0xb82   :  { %v1182_v12 = vmul.f32 %v2231_v8, %v1180_v0  ;;  %vm1187_vm14 = vweird.f32 %v2231_v8 }
 0xb83   :  { %v1119_v13 = vsel %vm1118_vm11, %v2229_v33, %v1115_v9  ;;  %vm1188_vm4 = vmor %vm1186_vm15, %vm1187_vm14 }
 0xb84   :  { %v1124_v18 = vsel %vm1121_vm13, %v1123_v11, %v1119_v13  ;;  %v1183_v15 = vsub.f32 1.0, %v1182_v12 }
 0xb85   :  { %v1125_v16 = vmul.f32 %v2740_v21, %v1124_v18 }
 0xb86   :  { %v1184_v17 = vmul.f32 %v2231_v8, %v1183_v15 }
 0xb87   :  { %v1126_v20 = vpack.c.bf16 %v1125_v16, %v1125_v16 }
 0xb88   :  { %v1185_v45 = vadd.f32 %v2231_v8, %v1184_v17 }
 0xb89   :  { %2029 = vmatmul.msk.bf16.vlgmr.msrb.gmra.mxu1 %vm171_vm8, %v1126_v20 }
 0xb8a   :  { %v1189_v50 = vsel %vm1188_vm4, %v2231_v8, %v1185_v45 }
 0xb8b   :  { %v1194_v27 = vsel %vm1191_vm5, %v1193_v40, %v1189_v50 }
 0xb8c   :  { %v1195_v23 = vmul.f32 %v2744_v22, %v1194_v27 }
 0xb8d   :  { %v1272_v24 = vpop.permute.xlu0 %1271 }
 0xb8e   :  { %v1277_v21 = vsel %vm221_vm9, %v1272_v24, 0  ;;  %v1196_v26 = vpack.c.bf16 %v1195_v23, %v1195_v23 }
 0xb8f   :  { %1286 = vmatpush.bf16.msra.mxu1 %v1277_v21 }
 0xb90   :  { %2031 = vmatmul.msk.bf16.vlgmr.msra.gmra.mxu2 %vm171_vm8, %v1196_v26 }
 0xb91   :  { %1509 = vmatpush.bf16.msra.mxu2 %v1500_v28 }
 0xb93   :  { %v2793_v29 = vpop.xlane.xlu1 %1406 }
 0xb94   :  { %2232 = vrcp.f32 %v2793_v29  ;;  %v1419_v15 = vand.u32 2147483648, %v2793_v29  ;;  %v1417_v19 = vand.u32 2147483647, %v2793_v29 }
 0xb96   :  { %v1420_v23 = vor.u32 1.1754944e-38, %v1419_v15 }
 0xb9a   :  { %v2797_v34 = vpop.eup %2232 }
 0xb9b   :  { %v1409_v57 = vmul.f32 %v2797_v34, %v2793_v29  ;;  %vm1414_vm5 = vweird.f32 %v2797_v34 }
 0xb9d   :  { %v1410_v46 = vsub.f32 1.0, %v1409_v57 }
 0xb9f   :  { %v1411_v6 = vmul.f32 %v2797_v34, %v1410_v46 }
 0xba1   :  { %v1412_v18 = vadd.f32 %v2797_v34, %v1411_v6 }
 0xbab   :  { %v1425_v30 = vpop.permute.xlu1 %1424 }
 0xbac   :  { %v1430_v31 = vsel %vm221_vm9, %v1425_v30, 0 }
 0xbad   :  { %1439 = vmatpush.bf16.msrb.mxu1 %v1430_v31 }
 0xbb4   :  { %v1254_v22 = vpop.xlane.xlu2 %1253 }
 0xbb5   :  { %2234 = vrcp.f32 %v1254_v22  ;;  %v1264_v42 = vand.u32 2147483647, %v1254_v22  ;;  %v1266_v43 = vand.u32 2147483648, %v1254_v22  ;;  %vm1260_vm7 = vweird.f32 %v1254_v22 }
 0xbb7   :  { %vm1265_vm11 = vcmp.eq.f32.partialorder %v1264_v42, 8.507059e+37  ;;  %v1267_v53 = vor.u32 1.1754944e-38, %v1266_v43 }
 0xbb8   :  { %v1328_v32 = vpop.xlane.xlu0 %1327 }
 0xbb9   :  { %2236 = vrcp.f32 %v1328_v32  ;;  %v1338_v54 = vand.u32 2147483647, %v1328_v32  ;;  %v1340_v55 = vand.u32 2147483648, %v1328_v32  ;;  %vm1334_vm14 = vweird.f32 %v1328_v32 }
 0xbbb   :  { %v2235_v37 = vpop.eup %2234  ;;  %v1341_v8 = vor.u32 1.1754944e-38, %v1340_v55  ;;  %vm1339_vm4 = vcmp.eq.f32.partialorder %v1338_v54, 8.507059e+37 }
 0xbbc   :  { %v1256_v38 = vmul.f32 %v2235_v37, %v1254_v22  ;;  %v2799_v14 = vpop.xlane.xlu2 %1476  ;;  %vm1261_vm6 = vweird.f32 %v2235_v37 }
 0xbbd   :  { %2238 = vrcp.f32 %v2799_v14  ;;  %vm1262_vm10 = vmor %vm1260_vm7, %vm1261_vm6  ;;  %vm1413_vm6 = vweird.f32 %v2793_v29  ;;  %v1489_v50 = vand.u32 2147483648, %v2799_v14  ;;  %v1487_v7 = vand.u32 2147483647, %v2799_v14 }
 0xbbe   :  { %v1257_v39 = vsub.f32 1.0, %v1256_v38  ;;  %vm1415_vm7 = vmor %vm1413_vm6, %vm1414_vm5 }
 0xbbf   :  { %v2237_v41 = vpop.eup %2236  ;;  %v1416_v40 = vsel %vm1415_vm7, %v2797_v34, %v1412_v18  ;;  %v1490_v28 = vor.u32 1.1754944e-38, %v1489_v50 }
 0xbc0   :  { %v1258_v36 = vmul.f32 %v2235_v37, %v1257_v39  ;;  %v1330_v44 = vmul.f32 %v2237_v41, %v1328_v32  ;;  %vm1335_vm13 = vweird.f32 %v2237_v41 }
 0xbc1   :  { %vm1336_vm15 = vmor %vm1334_vm14, %vm1335_vm13  ;;  %vm1418_vm13 = vcmp.eq.f32.partialorder %v1417_v19, 8.507059e+37 }
 0xbc2   :  { %v1259_v48 = vadd.f32 %v2235_v37, %v1258_v36  ;;  %v1331_v49 = vsub.f32 1.0, %v1330_v44  ;;  %v1421_v24 = vsel %vm1418_vm13, %v1420_v23, %v1416_v40 }
 0xbc3   :  { %v2239_v51 = vpop.eup %2238  ;;  %v1422_v30 = vmul.f32 %v2752_v25, %v1421_v24 }
 0xbc4   :  { %v1263_v59 = vsel %vm1262_vm10, %v2235_v37, %v1259_v48  ;;  %v1332_v60 = vmul.f32 %v2237_v41, %v1331_v49  ;;  %v1479_v61 = vmul.f32 %v2239_v51, %v2799_v14  ;;  %v2805_v33 = vpop.xlane.xlu2 %1550  ;;  %v2808_v4 = vpop.xlane.xlu0 %1624  ;;  %vm1484_vm10 = vweird.f32 %v2239_v51 }
 0xbc5   :  { %v1268_v0 = vsel %vm1265_vm11, %v1267_v53, %v1263_v59  ;;  %2240 = vrcp.f32 %v2805_v33  ;;  %vm1483_vm11 = vweird.f32 %v2799_v14  ;;  %v1423_v14 = vpack.c.bf16 %v1422_v30, %v1422_v30 }
 0xbc6   :  { %v1269_v2 = vmul.f32 %v2762_v35, %v1268_v0  ;;  %v1333_v63 = vadd.f32 %v2237_v41, %v1332_v60  ;;  %v1480_v3 = vsub.f32 1.0, %v1479_v61  ;;  %2242 = vrcp.f32 %v2808_v4  ;;  %vm1485_vm14 = vmor %vm1483_vm11, %vm1484_vm10 }
 0xbc7   :  { %vm1557_vm5 = vweird.f32 %v2805_v33  ;;  %v1561_v25 = vand.u32 2147483647, %v2805_v33  ;;  %v1635_v44 = vand.u32 2147483647, %v2808_v4 }
 0xbc8   :  { %v1337_v9 = vsel %vm1336_vm15, %v2237_v41, %v1333_v63  ;;  %v1270_v12 = vpack.c.bf16 %v1269_v2, %v1269_v2  ;;  %v1481_v35 = vmul.f32 %v2239_v51, %v1480_v3  ;;  %vm1488_vm15 = vcmp.eq.f32.partialorder %v1487_v7, 8.507059e+37 }
 0xbc9   :  { %v1342_v11 = vsel %vm1339_vm4, %v1341_v8, %v1337_v9  ;;  %v1563_v41 = vand.u32 2147483648, %v2805_v33  ;;  %vm1562_vm11 = vcmp.eq.f32.partialorder %v1561_v25, 8.507059e+37  ;;  %vm1636_vm13 = vcmp.eq.f32.partialorder %v1635_v44, 8.507059e+37 }
 0xbca   :  { %v1343_v13 = vmul.f32 %v2767_v47, %v1342_v11  ;;  %2033 = vmatmul.msk.bf16.vlgmr.msra.gmra.mxu1 %vm171_vm8, %v1270_v12  ;;  %v1482_v47 = vadd.f32 %v2239_v51, %v1481_v35 }
 0xbcb   :  { %v2241_v17 = vpop.eup %2240  ;;  %v1564_v46 = vor.u32 1.1754944e-38, %v1563_v41  ;;  %v2120_v41 = vld [vmem:[%s2943_s10 + $0x18] sm:$0xff] }
 0xbcc   :  { %v1569_v16 = vpop.permute.xlu2 %1568  ;;  %v1344_v62 = vpack.c.bf16 %v1343_v13, %v1343_v13  ;;  %v2243_v45 = vpop.eup %2242  ;;  %v1553_v27 = vmul.f32 %v2241_v17, %v2805_v33  ;;  %v1486_v21 = vsel %vm1485_vm14, %v2239_v51, %v1482_v47  ;;  %vm1558_vm4 = vweird.f32 %v2241_v17 }
 0xbcd   :  { %v1574_v20 = vsel %vm221_vm9, %v1569_v16, 0  ;;  %v1627_v26 = vmul.f32 %v2243_v45, %v2808_v4  ;;  %v1491_v31 = vsel %vm1488_vm15, %v1490_v28, %v1486_v21  ;;  %vm1632_vm6 = vweird.f32 %v2243_v45  ;;  %vm1559_vm7 = vmor %vm1557_vm5, %vm1558_vm4 }
 0xbce   :  { %2035 = vmatmul.msk.bf16.vlgmr.msrb.gmra.mxu2 %vm171_vm8, %v1344_v62  ;;  %1583 = vmatpush.bf16.msra.mxu1 %v1574_v20  ;;  %v1554_v29 = vsub.f32 1.0, %v1553_v27  ;;  %v1492_v37 = vmul.f32 %v2771_v52, %v1491_v31  ;;  %v1637_v52 = vand.u32 2147483648, %v2808_v4  ;;  %v2118_v62 = vld [vmem:[%s2939_s6 + $0x18] sm:$0xff]  ;;  %v2155_v27 = vld [vmem:[%s2938_s7 + $0x1] ss:$0 sm:$0xff] }
 0xbcf   :  { %v1628_v22 = vsub.f32 1.0, %v1627_v26  ;;  %1702 = vmatpush.bf16.msrb.mxu0 %v2118_v62 }
 0xbd0   :  { %v1555_v32 = vmul.f32 %v2241_v17, %v1554_v29  ;;  %v1493_v42 = vpack.c.bf16 %v1492_v37, %v1492_v37  ;;  %v1638_v51 = vor.u32 1.1754944e-38, %v1637_v52 }
 0xbd1   :  { %v1629_v57 = vmul.f32 %v2243_v45, %v1628_v22 }
 0xbd2   :  { %v1556_v39 = vadd.f32 %v2241_v17, %v1555_v32 }
 0xbd3   :  { %v1630_v43 = vadd.f32 %v2243_v45, %v1629_v57 }
 0xbd4   :  { %v1560_v36 = vsel %vm1559_vm7, %v2241_v17, %v1556_v39  ;;  %v2117_v17 = vld [vmem:[%s2939_s6 + $0x10] sm:$0xff] }
 0xbd5   :  { %v1565_v49 = vsel %vm1562_vm11, %v1564_v46, %v1560_v36  ;;  %1703 = vmatpush.bf16.msrb.mxu0 %v2117_v17  ;;  %v2121_v17 = vld [vmem:[%s2945_s12 + $0x20] sm:$0xff] }
 0xbd6   :  { %v1566_v54 = vmul.f32 %v2775_v56, %v1565_v49 }
 0xbd7   :  { %v1643_v34 = vpop.permute.xlu0 %1642 }
 0xbd8   :  { %v1648_v38 = vsel %vm221_vm9, %v1643_v34, 0  ;;  %vm1631_vm9 = vweird.f32 %v2808_v4  ;;  %v1567_v59 = vpack.c.bf16 %v1566_v54, %v1566_v54 }
 0xbd9   :  { %1657 = vmatpush.bf16.msrb.mxu2 %v1648_v38  ;;  %vm1633_vm10 = vmor %vm1631_vm9, %vm1632_vm6 }
 0xbda   :  { %2038 = vmatmul.msk.bf16.vlgmr.msrb.gmra.mxu1 %vm171_vm8, %v1423_v14  ;;  %v1634_v48 = vsel %vm1633_vm10, %v2243_v45, %v1630_v43  ;;  %v2119_v43 = vld [vmem:[%s2943_s10 + $0x10] sm:$0xff] }
 0xbdb   :  { %v1639_v53 = vsel %vm1636_vm13, %v1638_v51, %v1634_v48  ;;  %1802 = vmatpush.bf16.msrb.mxu1 %v2120_v41 }
 0xbdc   :  { %v1640_v55 = vmul.f32 %v2777_v58, %v1639_v53 }
 0xbde   :  { %2040 = vmatmul.msk.bf16.vlgmr.msra.gmra.mxu2 %vm171_vm8, %v1493_v42  ;;  %v1641_v60 = vpack.c.bf16 %v1640_v55, %v1640_v55 }
 0xbdf   :  { %1803 = vmatpush.bf16.msrb.mxu1 %v2119_v43 }
 0xbea   :  { %2042 = vmatmul.msk.bf16.vlgmr.msra.gmra.mxu1 %vm171_vm8, %v1567_v59 }
 0xbee   :  { %2044 = vmatmul.msk.bf16.vlgmr.msrb.gmra.mxu2 %vm171_vm8, %v1641_v60 }
 0xc06   :  { %v1144_v61 = vpop.f32.mrf.mxu1 }
 0xc07   :  { %1148 = vst.msk [vmem:[#allocation2] sm:$0xff] %vm171_vm8, %v1144_v61 }
 0xc0e   :  { %v1146_v33 = vpop.f32.mrf.mxu1 }
 0xc13   :  { %v1214_v0 = vpop.f32.mrf.mxu2 }
 0xc14   :  { %1219 = vrot.lane.b32.xlu1 %v1214_v0, %s2966_s28 }
 0xc1b   :  { %v1216_v2 = vpop.f32.mrf.mxu2 }
 0xc1c   :  { %v2156_v2 = vld [vmem:[%s2940_s8 + $0x1] ss:$0 sm:$0xff] }
 0xc47   :  { %v1288_v63 = vpop.f32.mrf.mxu1 }
 0xc48   :  { %1293 = vrot.lane.b32.xlu1 %v1288_v63, %s2967_s29 }
 0xc4f   :  { %v1290_v56 = vpop.f32.mrf.mxu1 }
 0xc51   :  { %v1362_v3 = vpop.f32.mrf.mxu2 }
 0xc52   :  { %1367 = vrot.lane.b32.xlu1 %v1362_v3, %s2968_s20 }
 0xc57   :  { %v1441_v58 = vpop.f32.mrf.mxu1 }
 0xc58   :  { %1445 = vst.msk [vmem:[#allocation2 + $0x8] sm:$0xff] %vm171_vm8, %v1441_v58  ;;  %v2157_v58 = vld [vmem:[%s2941_s9 + $0x1] ss:$0 sm:$0xff] }
 0xc59   :  { %v1364_v4 = vpop.f32.mrf.mxu2 }
 0xc5f   :  { %v1443_v6 = vpop.f32.mrf.mxu1 }
 0xc61   :  { %v1511_v8 = vpop.f32.mrf.mxu2 }
 0xc62   :  { %1516 = vrot.lane.b32.xlu0 %v1511_v8, %s2966_s28 }
 0xc67   :  { %v1585_v9 = vpop.f32.mrf.mxu1 }
 0xc69   :  { %v1513_v11 = vpop.f32.mrf.mxu2 }
 0xc6a   :  { %1590 = vrot.lane.b32.xlu0 %v1585_v9, %s2967_s29 }
 0xc6f   :  { %v1587_v12 = vpop.f32.mrf.mxu1 }
 0xc71   :  { %v1659_v13 = vpop.f32.mrf.mxu2 }
 0xc72   :  { %1664 = vrot.lane.b32.xlu0 %v1659_v13, %s2968_s20  ;;  %v2124_v13 = vld [vmem:[%s2945_s12 + $0x38] sm:$0xff] }
 0xc73   :  { %1874 = vmatpush.bf16.msrb.mxu3 %v2124_v13 }
 0xc79   :  { %v1661_v35 = vpop.f32.mrf.mxu2 }
 0xc7a   :  { %v2123_v35 = vld [vmem:[%s2945_s12 + $0x30] sm:$0xff] }
 0xc7b   :  { %1875 = vmatpush.bf16.msrb.mxu3 %v2123_v35 }
 0xc86   :  { %v1220_v18 = vpop.permute.xlu1 %1219 }
 0xc87   :  { %1222 = vst.msk [vmem:[#allocation2] sm:$0xff] %vm312_vm1, %v1220_v18  ;;  %v2158_v18 = vld [vmem:[%s2942_s11 + $0x1] ss:$0 sm:$0xff] }
 0xcba   :  { %v1294_v15 = vpop.permute.xlu1 %1293 }
 0xcbb   :  { %1296 = vst.msk [vmem:[#allocation2] sm:$0xff] %vm387_vm2, %v1294_v15  ;;  %v2122_v15 = vld [vmem:[%s2945_s12 + $0x28] sm:$0xff] }
 0xcbc   :  { %1876 = vmatpush.bf16.msrb.mxu3 %v2122_v15 }
 0xcc0   :  { %1877 = vmatpush.bf16.msrb.mxu3 %v2121_v17 }
 0xcc4   :  { %v1368_v16 = vpop.permute.xlu1 %1367 }
 0xcc5   :  { %1370 = vst.msk [vmem:[#allocation2] sm:$0xff] %vm462_vm3, %v1368_v16 }
 0xccc   :  { %v1668_v45 = vld [vmem:[#allocation2] sm:$0xff] }
 0xcd4   :  { %v1517_v19 = vpop.permute.xlu0 %1516 }
 0xcd5   :  { %1519 = vst.msk [vmem:[#allocation2 + $0x8] sm:$0xff] %vm312_vm1, %v1517_v19 }
 0xcdc   :  { %v1591_v20 = vpop.permute.xlu0 %1590 }
 0xcdd   :  { %1593 = vst.msk [vmem:[#allocation2 + $0x8] sm:$0xff] %vm387_vm2, %v1591_v20 }
 0xce4   :  { %v1665_v47 = vpop.permute.xlu0 %1664 }
 0xce5   :  { %1667 = vst.msk [vmem:[#allocation2 + $0x8] sm:$0xff] %vm462_vm3, %v1665_v47 }
 0xcec   :  { %v1669_v40 = vld [vmem:[#allocation2 + $0x8] sm:$0xff] }
 0xced   :  { %v1675_v50 = vpack.c.bf16 %v1669_v40, %v1668_v45 }
 0xcef   :  { %2058 = vmatmul.msk.bf16.vlgmr.msrb.gmra.mxu0 %vm58_vm0, %v1675_v50 }
 0xd6c   :  { %v1705_v23 = vpop.f32.mrf.mxu0 }
 0xd6d   :  { %v1706_v7 = vadd.f32 %v2155_v27, %v1705_v23 }
 0xd6f   :  { %v1710_v24 = vadd.f32 %v1706_v7, %v2646_v1 }
 0xd71   :  { %v1716_v21 = vsel %vm58_vm0, %v1710_v24, 0.0 }
 0xd72   :  { %1717 = vadd.xlane.f32.xlu2 %v1716_v21 }
 0xd74   :  { %v1707_v26 = vpop.f32.mrf.mxu0 }
 0xd75   :  { %v1708_v28 = vadd.f32 %v2155_v27, %v1707_v26 }
 0xd77   :  { %v1711_v29 = vadd.f32 %v1708_v28, %v2653_v5 }
 0xd79   :  { %v1719_v30 = vsel %vm58_vm0, %v1711_v29, 0.0 }
 0xd7a   :  { %1720 = vadd.xlane.f32.xlu1 %v1719_v30 }
 0xde5   :  { %v1718_v31 = vpop.xlane.xlu2 %1717 }
 0xde6   :  { %v1722_v22 = vmul.f32 %v1718_v31, %v2364_v10 }
 0xde8   :  { %v1724_v32 = vsub.f32 %v1710_v24, %v1722_v22 }
 0xdea   :  { %v1726_v34 = vmul.f32 %v1724_v32, %v1724_v32 }
 0xdec   :  { %v1728_v37 = vsel %vm58_vm0, %v1726_v34, 0.0 }
 0xded   :  { %v1721_v38 = vpop.xlane.xlu1 %1720  ;;  %1729 = vadd.xlane.f32.xlu0 %v1728_v37 }
 0xdee   :  { %v1723_v1 = vmul.f32 %v1721_v38, %v2364_v10 }
 0xdf0   :  { %v1725_v14 = vsub.f32 %v1711_v29, %v1723_v1  ;;  %v2159_v1 = vld [vmem:[%s2944_s13 + $0x1] ss:$0 sm:$0xff] }
 0xdf2   :  { %v1727_v57 = vmul.f32 %v1725_v14, %v1725_v14 }
 0xdf4   :  { %v1731_v39 = vsel %vm58_vm0, %v1727_v57, 0.0 }
 0xdf5   :  { %1732 = vadd.xlane.f32.xlu2 %v1731_v39 }
 0xe60   :  { %v1730_v5 = vpop.xlane.xlu0 %1729 }
 0xe61   :  { %v1734_v42 = vmul.f32 %v1730_v5, %v2364_v10 }
 0xe63   :  { %v1736_v25 = vadd.f32 1e-12, %v1734_v42 }
 0xe65   :  { %2244 = vrsqrt.f32 %v1736_v25  ;;  %vm1744_vm1 = vweird.f32 %v1736_v25 }
 0xe68   :  { %v1733_v52 = vpop.xlane.xlu2 %1732 }
 0xe69   :  { %v1735_v36 = vmul.f32 %v1733_v52, %v2364_v10 }
 0xe6b   :  { %v2245_v44 = vpop.eup %2244  ;;  %v1737_v46 = vadd.f32 1e-12, %v1735_v36 }
 0xe6c   :  { %v1739_v48 = vmul.f32 %v2245_v44, %v1736_v25  ;;  %vm1745_vm8 = vweird.f32 %v2245_v44 }
 0xe6d   :  { %2246 = vrsqrt.f32 %v1737_v46  ;;  %vm1746_vm2 = vmor %vm1744_vm1, %vm1745_vm8  ;;  %vm1754_vm14 = vweird.f32 %v1737_v46 }
 0xe6e   :  { %v1740_v49 = vmul.f32 %v2245_v44, %v1739_v48 }
 0xe70   :  { %v1741_v51 = vmul.f32 0.5, %v1740_v49 }
 0xe72   :  { %v1742_v53 = vsub.f32 1.5, %v1741_v51 }
 0xe73   :  { %v2247_v54 = vpop.eup %2246 }
 0xe74   :  { %v1743_v55 = vmul.f32 %v2245_v44, %v1742_v53  ;;  %v1749_v59 = vmul.f32 %v2247_v54, %v1737_v46  ;;  %vm1755_vm3 = vweird.f32 %v2247_v54 }
 0xe75   :  { %vm1756_vm15 = vmor %vm1754_vm14, %vm1755_vm3 }
 0xe76   :  { %v1750_v60 = vmul.f32 %v2247_v54, %v1749_v59  ;;  %v1747_v61 = vsel %vm1746_vm2, %v2245_v44, %v1743_v55 }
 0xe77   :  { %v1758_v63 = vmul.f32 %v1747_v61, %v1724_v32 }
 0xe78   :  { %v1751_v33 = vmul.f32 0.5, %v1750_v60 }
 0xe79   :  { %v1763_v4 = vmul.f32 %v2156_v2, %v1758_v63 }
 0xe7a   :  { %v1752_v0 = vsub.f32 1.5, %v1751_v33 }
 0xe7b   :  { %v1768_v9 = vadd.f32 %v2157_v58, %v1763_v4 }
 0xe7c   :  { %v1753_v56 = vmul.f32 %v2247_v54, %v1752_v0 }
 0xe7e   :  { %v1757_v3 = vsel %vm1756_vm15, %v2247_v54, %v1753_v56 }
 0xe7f   :  { %v1759_v6 = vmul.f32 %v1757_v3, %v1725_v14 }
 0xe81   :  { %v1764_v8 = vmul.f32 %v2156_v2, %v1759_v6 }
 0xe83   :  { %v1769_v11 = vadd.f32 %v2157_v58, %v1764_v8 }
 0xe85   :  { %v1775_v12 = vpack.c.bf16 %v1769_v11, %v1768_v9 }
 0xe87   :  { %2074 = vmatmul.msk.bf16.vlgmr.msrb.gmra.mxu1 %vm58_vm0, %v1775_v12 }
 0xf04   :  { %v1805_v16 = vpop.f32.mrf.mxu1 }
 0xf05   :  { %v1806_v62 = vadd.f32 %v2158_v18, %v1805_v16 }
 0xf07   :  { %v1810_v19 = vmul.f32 %v1806_v62, %v1806_v62 }
 0xf09   :  { %v1812_v20 = vmul.f32 %v1810_v19, %v1806_v62 }
 0xf0b   :  { %v1814_v47 = vmul.f32 0.044715, %v1812_v20 }
 0xf0c   :  { %v1807_v45 = vpop.f32.mrf.mxu1 }
 0xf0d   :  { %v1816_v40 = vadd.f32 %v1814_v47, %v1806_v62  ;;  %v1808_v50 = vadd.f32 %v2158_v18, %v1807_v45 }
 0xf0f   :  { %v1818_v27 = vmul.f32 0.7978846, %v1816_v40  ;;  %v1811_v23 = vmul.f32 %v1808_v50, %v1808_v50 }
 0xf11   :  { %v1813_v7 = vmul.f32 %v1811_v23, %v1808_v50  ;;  %2248 = vtanh.f32 %v1818_v27 }
 0xf13   :  { %v1815_v24 = vmul.f32 0.044715, %v1813_v7 }
 0xf15   :  { %v1817_v21 = vadd.f32 %v1815_v24, %v1808_v50 }
 0xf17   :  { %v1819_v26 = vmul.f32 0.7978846, %v1817_v21  ;;  %v2249_v28 = vpop.eup %2248 }
 0xf18   :  { %v1822_v29 = vadd.f32 1.0, %v2249_v28 }
 0xf19   :  { %2250 = vtanh.f32 %v1819_v26 }
 0xf1a   :  { %v1824_v31 = vmul.f32 0.5, %v1822_v29 }
 0xf1c   :  { %v1826_v34 = vmul.f32 %v1824_v31, %v1806_v62 }
 0xf1f   :  { %v2251_v30 = vpop.eup %2250 }
 0xf20   :  { %v1823_v22 = vadd.f32 1.0, %v2251_v30 }
 0xf22   :  { %v1825_v32 = vmul.f32 0.5, %v1823_v22 }
 0xf24   :  { %v1827_v37 = vmul.f32 %v1825_v32, %v1808_v50 }
 0xf26   :  { %v1837_v38 = vpack.c.bf16 %v1827_v37, %v1826_v34 }
 0xf28   :  { %2100 = vmatmul.msk.bf16.vlgmr.msrb.gmra.mxu3 %vm953_vm12, %v1837_v38 }
 0xfab   :  { %v1879_v14 = vpop.f32.mrf.mxu3 }
 0xfac   :  { %v1880_v57 = vadd.f32 %v2159_v1, %v1879_v14 }
 0xfae   :  { %v1884_v39 = vadd.f32 %v1880_v57, %v1768_v9 }
 0xfb0   :  { %v1890_v5 = vsel %vm58_vm0, %v1884_v39, 0.0 }
 0xfb1   :  { %1891 = vadd.xlane.f32.xlu1 %v1890_v5 }
 0xfb3   :  { %v1881_v41 = vpop.f32.mrf.mxu3 }
 0xfb4   :  { %v1882_v42 = vadd.f32 %v2159_v1, %v1881_v41 }
 0xfb6   :  { %v1885_v25 = vadd.f32 %v1882_v42, %v1769_v11  ;;  %v2160_v11 = vld [vmem:[%s2946_s14 + $0x1] ss:$0 sm:$0xff] }
 0xfb8   :  { %v1893_v43 = vsel %vm58_vm0, %v1885_v25, 0.0 }
 0xfb9   :  { %1894 = vadd.xlane.f32.xlu0 %v1893_v43 }
0x1024   :  { %v1892_v52 = vpop.xlane.xlu1 %1891 }
0x1025   :  { %v1896_v36 = vmul.f32 %v1892_v52, %v2364_v10 }
0x1027   :  { %v1898_v44 = vsub.f32 %v1884_v39, %v1896_v36 }
0x1029   :  { %v1900_v46 = vmul.f32 %v1898_v44, %v1898_v44 }
0x102b   :  { %v1902_v48 = vsel %vm58_vm0, %v1900_v46, 0.0 }
0x102c   :  { %v1895_v49 = vpop.xlane.xlu0 %1894  ;;  %1903 = vadd.xlane.f32.xlu2 %v1902_v48 }
0x102d   :  { %v1897_v51 = vmul.f32 %v1895_v49, %v2364_v10 }
0x102f   :  { %v1899_v53 = vsub.f32 %v1885_v25, %v1897_v51 }
0x1031   :  { %v1901_v54 = vmul.f32 %v1899_v53, %v1899_v53 }
0x1033   :  { %v1905_v55 = vsel %vm58_vm0, %v1901_v54, 0.0 }
0x1034   :  { %1906 = vadd.xlane.f32.xlu1 %v1905_v55 }
0x109f   :  { %v1904_v59 = vpop.xlane.xlu2 %1903 }
0x10a0   :  { %v1908_v60 = vmul.f32 %v1904_v59, %v2364_v10 }
0x10a2   :  { %v1910_v61 = vadd.f32 1e-12, %v1908_v60 }
0x10a4   :  { %2252 = vrsqrt.f32 %v1910_v61  ;;  %vm1918_vm4 = vweird.f32 %v1910_v61 }
0x10a7   :  { %v1907_v33 = vpop.xlane.xlu1 %1906 }
0x10a8   :  { %v1909_v0 = vmul.f32 %v1907_v33, %v2364_v10  ;;  %v2161_v10 = vld [vmem:[%s2947_s15 + $0x1] ss:$0 sm:$0xff] }
0x10aa   :  { %v2253_v2 = vpop.eup %2252  ;;  %v1911_v63 = vadd.f32 1e-12, %v1909_v0 }
0x10ab   :  { %v1913_v56 = vmul.f32 %v2253_v2, %v1910_v61  ;;  %vm1919_vm12 = vweird.f32 %v2253_v2 }
0x10ac   :  { %2254 = vrsqrt.f32 %v1911_v63  ;;  %vm1920_vm5 = vmor %vm1918_vm4, %vm1919_vm12  ;;  %vm1928_vm7 = vweird.f32 %v1911_v63 }
0x10ad   :  { %v1914_v3 = vmul.f32 %v2253_v2, %v1913_v56 }
0x10af   :  { %v1915_v58 = vmul.f32 0.5, %v1914_v3 }
0x10b1   :  { %v1916_v4 = vsub.f32 1.5, %v1915_v58 }
0x10b2   :  { %v2255_v6 = vpop.eup %2254 }
0x10b3   :  { %v1917_v8 = vmul.f32 %v2253_v2, %v1916_v4  ;;  %v1923_v9 = vmul.f32 %v2255_v6, %v1911_v63  ;;  %vm1929_vm6 = vweird.f32 %v2255_v6 }
0x10b4   :  { %vm1930_vm9 = vmor %vm1928_vm7, %vm1929_vm6 }
0x10b5   :  { %v1921_v12 = vsel %vm1920_vm5, %v2253_v2, %v1917_v8  ;;  %v1924_v13 = vmul.f32 %v2255_v6, %v1923_v9 }
0x10b6   :  { %v1932_v35 = vmul.f32 %v1921_v12, %v1898_v44 }
0x10b7   :  { %v1925_v18 = vmul.f32 0.5, %v1924_v13 }
0x10b8   :  { %v1937_v15 = vmul.f32 %v2160_v11, %v1932_v35 }
0x10b9   :  { %v1926_v16 = vsub.f32 1.5, %v1925_v18 }
0x10ba   :  { %v1942_v62 = vadd.f32 %v2161_v10, %v1937_v15 }
0x10bb   :  { %v1927_v17 = vmul.f32 %v2255_v6, %v1926_v16 }
0x10bc   :  { %2103 = vst.msk [vmem:[%s2936_s16 + $0x20] sm:$0xff] %vm58_vm0, %v1942_v62 }
0x10bd   :  { %v1931_v19 = vsel %vm1930_vm9, %v2255_v6, %v1927_v17 }
0x10be   :  { %v1933_v20 = vmul.f32 %v1931_v19, %v1899_v53 }
0x10c0   :  { %v1938_v47 = vmul.f32 %v2160_v11, %v1933_v20 }
0x10c2   :  { %v1943_v45 = vadd.f32 %v2161_v10, %v1938_v47 }
0x10c4   :  { %2104 = vst.msk [vmem:[%s2936_s16 + $0x28] sm:$0xff] %vm58_vm0, %v1943_v45 }

</bundles_post_ra>
